<compile_context>
chip_gen: v5e
topology: v5e:2x2
jax: 0.10.0
libtpu: 0.0.40
codegen_flags: <defaults>
</compile_context>

<pallas_src>
import functools

import jax
import jax.numpy as jnp
from jax import lax
from jax.experimental import pallas as pl
from jax.experimental.pallas import tpu as pltpu


# ------------------------------ fused kernel -------------------------------- #

def _tail_kernel(x_ref, exp_w_ref, exp_b_ref,
                 dw_w_ref, dw_b_ref,
                 ph_w_ref, ph_b_ref,
                 fc_w_ref, fc_b_ref,
                 o_ref,
                 dw_pad_ref,
                 *, n_img, h, w, gap, strip):
    f32 = jnp.float32
    bf16 = jnp.bfloat16
    hw = h * w
    chid = dw_w_ref.shape[1]
    chead = ph_w_ref.shape[1]

    def mm(a, b):
        # MXU matmul: bf16 operands (pre-cast weights), f32 accumulation.
        return jnp.dot(a, b, preferred_element_type=f32)

    # ---- InvertedResidual expand: 1x1 conv (BN scale pre-folded) + bias + ReLU6
    h1 = jnp.clip(mm(x_ref[...], exp_w_ref[...]) + exp_b_ref[...], 0.0, 6.0)

    # ---- stage h1 into the depthwise scratch with `gap` zero rows before /
    #      between / after images: gives dy zero-padding and keeps images
    #      isolated (replaces the old per-tap row-boundary masks).
    gap_zeros = jnp.zeros((gap, chid), f32)
    for g in range(n_img + 1):
        start = g * (gap + hw)
        dw_pad_ref[start:start + gap, :] = gap_zeros
    for img in range(n_img):
        base = gap + img * (gap + hw)
        dw_pad_ref[base:base + hw, :] = h1[img * hw:(img + 1) * hw, :]

    # ---- hoisted constants for the depthwise / head stages ----
    col = lax.broadcasted_iota(jnp.int32, (strip, 1), 0) % w
    left_ok = jnp.where(col > 0, 1.0, 0.0)           # dx = -1 stays inside row
    right_ok = jnp.where(col < w - 1, 1.0, 0.0)      # dx = +1 stays inside row
    wt = [dw_w_ref[t:t + 1, :] for t in range(9)]    # (1, Chid), BN pre-folded
    dw_b = dw_b_ref[...]
    ph_w = ph_w_ref[...]
    ph_b = ph_b_ref[...]
    inv_hw = 1.0 / float(hw)

    pooled_rows = []
    for img in range(n_img):
        base = gap + img * (gap + hw)
        psum = jnp.zeros((1, chead), f32)
        for s in range(hw // strip):
            r0 = base + s * strip
            # ---- depthwise 3x3 (stride 1, pad 1) + bias + ReLU6, per strip ----
            c_acc = r_acc = l_acc = None
            for k, dy in enumerate((-1, 0, 1)):
                # sublane-aligned slab load (base, strip, w all multiples of 8)
                slab = dw_pad_ref[r0 + dy * w:r0 + dy * w + strip, :]
                cc = slab * wt[3 * k + 1]                             # dx =  0
                rr = pltpu.roll(slab, strip - 1, 0) * wt[3 * k + 2]   # dx = +1
                ll = pltpu.roll(slab, 1, 0) * wt[3 * k + 0]           # dx = -1
                c_acc = cc if c_acc is None else c_acc + cc
                r_acc = rr if r_acc is None else r_acc + rr
                l_acc = ll if l_acc is None else l_acc + ll
            # roll wrap rows always land on x == w-1 / x == 0 and are zeroed
            # here together with the in-row horizontal boundary handling.
            acc = c_acc + r_acc * right_ok + l_acc * left_ok
            h2 = jnp.clip(acc + dw_b, 0.0, 6.0)

            # ---- fused project (linear, BN folded) + head 1x1 conv + ReLU6 ----
            h4 = jnp.clip(mm(h2.astype(bf16), ph_w) + ph_b, 0.0, 6.0)

            # ---- AdaptiveAvgPool2d((1,1)): partial row-sum per strip (XLU) ----
            psum = psum + jnp.sum(h4, axis=0, keepdims=True)
        pooled_rows.append(psum * inv_hw)

    # ---- flatten + classifier (Dropout(0.2) is identity at inference) ----
    pooled = jnp.concatenate(pooled_rows, axis=0)                 # (N, Chead)
    logits = mm(pooled.astype(bf16), fc_w_ref[...]) + fc_b_ref[...]
    o_ref[...] = logits.astype(o_ref.dtype)


# -------------------------------- wrapper ------------------------------------ #

_VMEM = pl.BlockSpec(memory_space=pltpu.MemorySpace.VMEM)


def mobilenetv2_deep_forward(x_nchw, params):
    n, cin, h, w = x_nchw.shape
    hw = h * w
    m = n * hw
    chid = params["exp_w"].shape[1]
    ncls = params["fc_w"].shape[1]
    assert w % 8 == 0, "toy kernel assumes W is a multiple of the sublane count"

    # NCHW (PyTorch) -> NHWC -> pixels-as-rows (M, Cin); channels on TPU lanes.
    x2d = jnp.transpose(x_nchw, (0, 2, 3, 1)).reshape(m, cin).astype(jnp.bfloat16)

    gap = w                                   # zero rows between images (>= W)
    strip = 64 if (hw % 64 == 0 and 64 % w == 0) else w  # W-aligned pixel strips
    rows = (n + 1) * gap + n * hw

    kernel = functools.partial(_tail_kernel, n_img=n, h=h, w=w, gap=gap,
                               strip=strip)
    return pl.pallas_call(
        kernel,
        out_shape=jax.ShapeDtypeStruct((n, ncls), x_nchw.dtype),
        in_specs=[_VMEM] * 9,
        out_specs=_VMEM,
        scratch_shapes=[pltpu.VMEM((rows, chid), jnp.float32)],
        # Total footprint is <1 MiB; keep an explicit, modest limit (v5e scoped
        # default is 16 MiB) with generous headroom for compiler temporaries.
        compiler_params=pltpu.CompilerParams(vmem_limit_bytes=8 * 1024 * 1024),
    )(x2d,
      params["exp_w"], params["exp_b"],
      params["dw_w"], params["dw_b"],
      params["ph_w"], params["ph_b"],
      params["fc_w"], params["fc_b"])


# ----------------------------- parameter setup ------------------------------- #

def _bn_scale_bias(gamma, beta, mean, var, eps=1e-5):
    scale = gamma / jnp.sqrt(var + eps)
    bias = beta - mean * scale
    return scale.reshape(1, -1), bias.reshape(1, -1)


def init_params(key):
    cin, chid, cproj, chead, ncls = 8, 48, 16, 64, 10
    ks = jax.random.split(key, 10)

    def conv_w(k, shape, fan_in):
        return jax.random.normal(k, shape, jnp.float32) / jnp.sqrt(fan_in)

    def bn(k, c):
        k1, k2, k3, k4 = jax.random.split(k, 4)
        gamma = 1.0 + 0.1 * jax.random.normal(k1, (c,), jnp.float32)
        beta = 0.1 * jax.random.normal(k2, (c,), jnp.float32)
        mean = 0.1 * jax.random.normal(k3, (c,), jnp.float32)
        var = 1.0 + 0.1 * jnp.abs(jax.random.normal(k4, (c,), jnp.float32))
        return _bn_scale_bias(gamma, beta, mean, var)

    exp_w = conv_w(ks[0], (cin, chid), cin)           # 1x1 expand
    exp_s, exp_b = bn(ks[1], chid)
    dw_w = conv_w(ks[2], (9, chid), 9.0)              # depthwise 3x3 taps
    dw_s, dw_b = bn(ks[3], chid)
    proj_w = conv_w(ks[4], (chid, cproj), chid)       # 1x1 project (linear)
    proj_s, proj_b = bn(ks[5], cproj)
    head_w = conv_w(ks[6], (cproj, chead), cproj)     # final ConvBNReLU
    head_s, head_b = bn(ks[7], chead)
    fc_w = conv_w(ks[8], (chead, ncls), chead)        # classifier Linear
    fc_b = 0.1 * jax.random.normal(ks[9], (1, ncls), jnp.float32)

    # --- one-time algebraic folds (perf review) ---
    #   * BN scales folded into conv weights (per output channel).
    #   * linear project + head 1x1 fused into a single matmul:
    #       h4 = clip(h2 @ ph_w + ph_b)   (valid: no residual around project).
    head_wf = head_w * head_s
    ph_w = (proj_w * proj_s) @ head_wf
    ph_b = proj_b @ head_wf + head_b

    return {
        "exp_w": (exp_w * exp_s).astype(jnp.bfloat16), "exp_b": exp_b,
        "dw_w": dw_w * dw_s, "dw_b": dw_b,
        "ph_w": ph_w.astype(jnp.bfloat16), "ph_b": ph_b,
        "fc_w": fc_w.astype(jnp.bfloat16), "fc_b": fc_b,
    }


# ----------------------------- pure-JAX reference ---------------------------- #

def reference_forward(x_nchw, params):
    """Reference forward using the same folded / bf16-cast parameters."""
    n, cin, h, w = x_nchw.shape
    f32 = jnp.float32
    x = jnp.transpose(x_nchw, (0, 2, 3, 1)).reshape(n * h * w, cin)
    x = x.astype(jnp.bfloat16)
    h1 = jnp.clip(jnp.dot(x, params["exp_w"], preferred_element_type=f32)
                  + params["exp_b"], 0.0, 6.0)
    h1 = h1.reshape(n, h, w, -1)
    h1p = jnp.pad(h1, ((0, 0), (1, 1), (1, 1), (0, 0)))
    acc = jnp.zeros_like(h1)
    t = 0
    for dy in (-1, 0, 1):
        for dx in (-1, 0, 1):
            acc = acc + (h1p[:, 1 + dy:1 + dy + h, 1 + dx:1 + dx + w, :]
                         * params["dw_w"][t])
            t += 1
    h2 = jnp.clip(acc + params["dw_b"].reshape(1, 1, 1, -1), 0.0, 6.0)
    h2 = h2.reshape(n * h * w, -1)
    h4 = jnp.clip(jnp.dot(h2.astype(jnp.bfloat16), params["ph_w"],
                          preferred_element_type=f32) + params["ph_b"], 0.0, 6.0)
    pooled = h4.reshape(n, h * w, -1).mean(axis=1)
    return (jnp.dot(pooled.astype(jnp.bfloat16), params["fc_w"],
                    preferred_element_type=f32) + params["fc_b"])


if __name__ == "__main__":
    key = jax.random.PRNGKey(0)
    pkey, xkey = jax.random.split(key)
    params = init_params(pkey)

    # PyTorch-style NCHW input: batch=2, channels=8, spatial=16x16
    x = jax.random.normal(xkey, (2, 8, 16, 16), jnp.float32)

    out = mobilenetv2_deep_forward(x, params)
    jax.block_until_ready(out)
    assert out.shape == (2, 10) and out.dtype == jnp.float32
    assert bool(jnp.all(jnp.isfinite(out)))

    ref = reference_forward(x, params)
    assert bool(jnp.allclose(out, ref, rtol=1e-2, atol=1e-2)), (
        "max |err| = %.3e" % float(jnp.max(jnp.abs(out - ref))))
    print("KERNEL_OK")
</pallas_src>

<mosaic_0001>
module attributes {stable_mosaic.version = 11 : i64} {
  func.func @_tail_kernel(%arg0: memref<512x8xbf16, #tpu.memory_space<vmem>>, %arg1: memref<8x48xbf16, #tpu.memory_space<vmem>>, %arg2: memref<1x48xf32, #tpu.memory_space<vmem>>, %arg3: memref<9x48xf32, #tpu.memory_space<vmem>>, %arg4: memref<1x48xf32, #tpu.memory_space<vmem>>, %arg5: memref<48x64xbf16, #tpu.memory_space<vmem>>, %arg6: memref<1x64xf32, #tpu.memory_space<vmem>>, %arg7: memref<64x10xbf16, #tpu.memory_space<vmem>>, %arg8: memref<1x10xf32, #tpu.memory_space<vmem>>, %arg9: memref<2x10xf32, #tpu.memory_space<vmem>>, %arg10: memref<560x48xf32, #tpu.memory_space<vmem>>) attributes {dimension_semantics = [], scalar_prefetch = 0 : i64, scratch_operands = 1 : i64, tpu.core_type = #tpu.core_type<tc>} {
    %c0 = arith.constant 0 : index
    %c0_0 = arith.constant 0 : index
    %0 = vector.load %arg0[%c0, %c0_0] : memref<512x8xbf16, #tpu.memory_space<vmem>>, vector<512x8xbf16>
    %c0_1 = arith.constant 0 : index
    %c0_2 = arith.constant 0 : index
    %1 = vector.load %arg1[%c0_1, %c0_2] : memref<8x48xbf16, #tpu.memory_space<vmem>>, vector<8x48xbf16>
    %cst = arith.constant dense<0.000000e+00> : vector<512x48xf32>
    %2 = tpu.matmul %0, %1, %cst {dimension_numbers = #tpu.dot_dimension_numbers<[1], [0], [0], [1], [0, 0, 1, 1], [], []>} : vector<512x8xbf16>, vector<8x48xbf16>, vector<512x48xf32> -> vector<512x48xf32>
    %c0_3 = arith.constant 0 : index
    %c0_4 = arith.constant 0 : index
    %3 = vector.load %arg2[%c0_3, %c0_4] : memref<1x48xf32, #tpu.memory_space<vmem>>, vector<1x48xf32>
    %4 = vector.broadcast %3 : vector<1x48xf32> to vector<512x48xf32>
    %5 = arith.addf %2, %4 : vector<512x48xf32>
    %cst_5 = arith.constant 0.000000e+00 : f32
    %cst_6 = arith.constant 6.000000e+00 : f32
    %6 = vector.broadcast %cst_5 : f32 to vector<512x48xf32>
    %7 = arith.maximumf %6, %5 : vector<512x48xf32>
    %8 = vector.broadcast %cst_6 : f32 to vector<512x48xf32>
    %9 = arith.minimumf %8, %7 : vector<512x48xf32>
    %cst_7 = arith.constant 0.000000e+00 : f32
    %10 = vector.broadcast %cst_7 : f32 to vector<16x48xf32>
    %c0_8 = arith.constant 0 : index
    %c0_9 = arith.constant 0 : index
    %11 = vector.load %arg10[%c0_8, %c0_9] : memref<560x48xf32, #tpu.memory_space<vmem>>, vector<16x48xf32>
    tpu.vector_store %arg10[%c0_8, %c0_9], %10 {strides = array<i32>} : memref<560x48xf32, #tpu.memory_space<vmem>>, vector<16x48xf32>,
    %c272 = arith.constant 272 : index
    %c0_10 = arith.constant 0 : index
    %12 = vector.load %arg10[%c272, %c0_10] : memref<560x48xf32, #tpu.memory_space<vmem>>, vector<16x48xf32>
    tpu.vector_store %arg10[%c272, %c0_10], %10 {strides = array<i32>} : memref<560x48xf32, #tpu.memory_space<vmem>>, vector<16x48xf32>,
    %c544 = arith.constant 544 : index
    %c0_11 = arith.constant 0 : index
    %13 = vector.load %arg10[%c544, %c0_11] : memref<560x48xf32, #tpu.memory_space<vmem>>, vector<16x48xf32>
    tpu.vector_store %arg10[%c544, %c0_11], %10 {strides = array<i32>} : memref<560x48xf32, #tpu.memory_space<vmem>>, vector<16x48xf32>,
    %14 = vector.extract_strided_slice %9 {offsets = [0, 0], sizes = [256, 48], strides = [1, 1]} : vector<512x48xf32> to vector<256x48xf32>
    %c16 = arith.constant 16 : index
    %c0_12 = arith.constant 0 : index
    %15 = vector.load %arg10[%c16, %c0_12] : memref<560x48xf32, #tpu.memory_space<vmem>>, vector<256x48xf32>
    tpu.vector_store %arg10[%c16, %c0_12], %14 {strides = array<i32>} : memref<560x48xf32, #tpu.memory_space<vmem>>, vector<256x48xf32>,
    %16 = vector.extract_strided_slice %9 {offsets = [256, 0], sizes = [256, 48], strides = [1, 1]} : vector<512x48xf32> to vector<256x48xf32>
    %c288 = arith.constant 288 : index
    %c0_13 = arith.constant 0 : index
    %17 = vector.load %arg10[%c288, %c0_13] : memref<560x48xf32, #tpu.memory_space<vmem>>, vector<256x48xf32>
    tpu.vector_store %arg10[%c288, %c0_13], %16 {strides = array<i32>} : memref<560x48xf32, #tpu.memory_space<vmem>>, vector<256x48xf32>,
    %18 = tpu.iota {dimensions = array<i32: 0>} : vector<64x1xi32>
    %c16_i32 = arith.constant 16 : i32
    %c0_i32 = arith.constant 0 : i32
    %19 = arith.cmpi eq, %c16_i32, %c0_i32 : i32
    %c1_i32 = arith.constant 1 : i32
    %20 = arith.select %19, %c1_i32, %c16_i32 : i32
    %21 = vector.broadcast %20 : i32 to vector<64x1xi32>
    %22 = arith.remsi %18, %21 : vector<64x1xi32>
    %c0_i32_14 = arith.constant 0 : i32
    %23 = vector.broadcast %c0_i32_14 : i32 to vector<64x1xi32>
    %24 = arith.cmpi ne, %22, %23 : vector<64x1xi32>
    %c0_i32_15 = arith.constant 0 : i32
    %25 = vector.broadcast %c0_i32_15 : i32 to vector<64x1xi32>
    %26 = arith.cmpi slt, %22, %25 : vector<64x1xi32>
    %c0_i32_16 = arith.constant 0 : i32
    %27 = arith.cmpi slt, %20, %c0_i32_16 : i32
    %28 = vector.broadcast %27 : i1 to vector<64x1xi1>
    %29 = vector.broadcast %28 : vector<64x1xi1> to vector<64x1xi1>
    %30 = arith.xori %26, %29 : vector<64x1xi1>
    %31 = arith.andi %30, %24 : vector<64x1xi1>
    %32 = vector.broadcast %20 : i32 to vector<64x1xi32>
    %33 = arith.addi %22, %32 : vector<64x1xi32>
    %34 = arith.select %31, %33, %22 : vector<64x1xi1>, vector<64x1xi32>
    %c0_i32_17 = arith.constant 0 : i32
    %35 = vector.broadcast %c0_i32_17 : i32 to vector<64x1xi32>
    %36 = arith.cmpi sgt, %34, %35 : vector<64x1xi32>
    %cst_18 = arith.constant 1.000000e+00 : f32
    %cst_19 = arith.constant 0.000000e+00 : f32
    %37 = vector.broadcast %cst_18 : f32 to vector<64x1xf32>
    %38 = vector.broadcast %cst_19 : f32 to vector<64x1xf32>
    %39 = arith.select %36, %37, %38 : vector<64x1xi1>, vector<64x1xf32>
    %c15_i32 = arith.constant 15 : i32
    %40 = vector.broadcast %c15_i32 : i32 to vector<64x1xi32>
    %41 = arith.cmpi slt, %34, %40 : vector<64x1xi32>
    %cst_20 = arith.constant 1.000000e+00 : f32
    %cst_21 = arith.constant 0.000000e+00 : f32
    %42 = vector.broadcast %cst_20 : f32 to vector<64x1xf32>
    %43 = vector.broadcast %cst_21 : f32 to vector<64x1xf32>
    %44 = arith.select %41, %42, %43 : vector<64x1xi1>, vector<64x1xf32>
    %c0_22 = arith.constant 0 : index
    %c0_23 = arith.constant 0 : index
    %45 = vector.load %arg3[%c0_22, %c0_23] : memref<9x48xf32, #tpu.memory_space<vmem>>, vector<1x48xf32>
    %c1 = arith.constant 1 : index
    %c0_24 = arith.constant 0 : index
    %46 = vector.load %arg3[%c1, %c0_24] : memref<9x48xf32, #tpu.memory_space<vmem>>, vector<1x48xf32>
    %c2 = arith.constant 2 : index
    %c0_25 = arith.constant 0 : index
    %47 = vector.load %arg3[%c2, %c0_25] : memref<9x48xf32, #tpu.memory_space<vmem>>, vector<1x48xf32>
    %c3 = arith.constant 3 : index
    %c0_26 = arith.constant 0 : index
    %48 = vector.load %arg3[%c3, %c0_26] : memref<9x48xf32, #tpu.memory_space<vmem>>, vector<1x48xf32>
    %c4 = arith.constant 4 : index
    %c0_27 = arith.constant 0 : index
    %49 = vector.load %arg3[%c4, %c0_27] : memref<9x48xf32, #tpu.memory_space<vmem>>, vector<1x48xf32>
    %c5 = arith.constant 5 : index
    %c0_28 = arith.constant 0 : index
    %50 = vector.load %arg3[%c5, %c0_28] : memref<9x48xf32, #tpu.memory_space<vmem>>, vector<1x48xf32>
    %c6 = arith.constant 6 : index
    %c0_29 = arith.constant 0 : index
    %51 = vector.load %arg3[%c6, %c0_29] : memref<9x48xf32, #tpu.memory_space<vmem>>, vector<1x48xf32>
    %c7 = arith.constant 7 : index
    %c0_30 = arith.constant 0 : index
    %52 = vector.load %arg3[%c7, %c0_30] : memref<9x48xf32, #tpu.memory_space<vmem>>, vector<1x48xf32>
    %c8 = arith.constant 8 : index
    %c0_31 = arith.constant 0 : index
    %53 = vector.load %arg3[%c8, %c0_31] : memref<9x48xf32, #tpu.memory_space<vmem>>, vector<1x48xf32>
    %c0_32 = arith.constant 0 : index
    %c0_33 = arith.constant 0 : index
    %54 = vector.load %arg4[%c0_32, %c0_33] : memref<1x48xf32, #tpu.memory_space<vmem>>, vector<1x48xf32>
    %c0_34 = arith.constant 0 : index
    %c0_35 = arith.constant 0 : index
    %55 = vector.load %arg5[%c0_34, %c0_35] : memref<48x64xbf16, #tpu.memory_space<vmem>>, vector<48x64xbf16>
    %c0_36 = arith.constant 0 : index
    %c0_37 = arith.constant 0 : index
    %56 = vector.load %arg6[%c0_36, %c0_37] : memref<1x64xf32, #tpu.memory_space<vmem>>, vector<1x64xf32>
    %cst_38 = arith.constant 0.000000e+00 : f32
    %57 = vector.broadcast %cst_38 : f32 to vector<1x64xf32>
    %c0_39 = arith.constant 0 : index
    %c0_40 = arith.constant 0 : index
    %58 = vector.load %arg10[%c0_39, %c0_40] : memref<560x48xf32, #tpu.memory_space<vmem>>, vector<64x48xf32>
    %59 = vector.broadcast %46 : vector<1x48xf32> to vector<64x48xf32>
    %60 = arith.mulf %58, %59 : vector<64x48xf32>
    %c63_i32 = arith.constant 63 : i32
    %61 = tpu.dynamic_rotate %58 by %c63_i32 dim 0 : vector<64x48xf32>, i32 -> vector<64x48xf32>
    %62 = vector.broadcast %47 : vector<1x48xf32> to vector<64x48xf32>
    %63 = arith.mulf %61, %62 : vector<64x48xf32>
    %c1_i32_41 = arith.constant 1 : i32
    %64 = tpu.dynamic_rotate %58 by %c1_i32_41 dim 0 : vector<64x48xf32>, i32 -> vector<64x48xf32>
    %65 = vector.broadcast %45 : vector<1x48xf32> to vector<64x48xf32>
    %66 = arith.mulf %64, %65 : vector<64x48xf32>
    %c16_42 = arith.constant 16 : index
    %c0_43 = arith.constant 0 : index
    %67 = vector.load %arg10[%c16_42, %c0_43] : memref<560x48xf32, #tpu.memory_space<vmem>>, vector<64x48xf32>
    %68 = vector.broadcast %49 : vector<1x48xf32> to vector<64x48xf32>
    %69 = arith.mulf %67, %68 : vector<64x48xf32>
    %c63_i32_44 = arith.constant 63 : i32
    %70 = tpu.dynamic_rotate %67 by %c63_i32_44 dim 0 : vector<64x48xf32>, i32 -> vector<64x48xf32>
    %71 = vector.broadcast %50 : vector<1x48xf32> to vector<64x48xf32>
    %72 = arith.mulf %70, %71 : vector<64x48xf32>
    %c1_i32_45 = arith.constant 1 : i32
    %73 = tpu.dynamic_rotate %67 by %c1_i32_45 dim 0 : vector<64x48xf32>, i32 -> vector<64x48xf32>
    %74 = vector.broadcast %48 : vector<1x48xf32> to vector<64x48xf32>
    %75 = arith.mulf %73, %74 : vector<64x48xf32>
    %76 = arith.addf %60, %69 : vector<64x48xf32>
    %77 = arith.addf %63, %72 : vector<64x48xf32>
    %78 = arith.addf %66, %75 : vector<64x48xf32>
    %c32 = arith.constant 32 : index
    %c0_46 = arith.constant 0 : index
    %79 = vector.load %arg10[%c32, %c0_46] : memref<560x48xf32, #tpu.memory_space<vmem>>, vector<64x48xf32>
    %80 = vector.broadcast %52 : vector<1x48xf32> to vector<64x48xf32>
    %81 = arith.mulf %79, %80 : vector<64x48xf32>
    %c63_i32_47 = arith.constant 63 : i32
    %82 = tpu.dynamic_rotate %79 by %c63_i32_47 dim 0 : vector<64x48xf32>, i32 -> vector<64x48xf32>
    %83 = vector.broadcast %53 : vector<1x48xf32> to vector<64x48xf32>
    %84 = arith.mulf %82, %83 : vector<64x48xf32>
    %c1_i32_48 = arith.constant 1 : i32
    %85 = tpu.dynamic_rotate %79 by %c1_i32_48 dim 0 : vector<64x48xf32>, i32 -> vector<64x48xf32>
    %86 = vector.broadcast %51 : vector<1x48xf32> to vector<64x48xf32>
    %87 = arith.mulf %85, %86 : vector<64x48xf32>
    %88 = arith.addf %76, %81 : vector<64x48xf32>
    %89 = arith.addf %77, %84 : vector<64x48xf32>
    %90 = arith.addf %78, %87 : vector<64x48xf32>
    %91 = vector.broadcast %44 : vector<64x1xf32> to vector<64x48xf32>
    %92 = arith.mulf %89, %91 : vector<64x48xf32>
    %93 = arith.addf %88, %92 : vector<64x48xf32>
    %94 = vector.broadcast %39 : vector<64x1xf32> to vector<64x48xf32>
    %95 = arith.mulf %90, %94 : vector<64x48xf32>
    %96 = arith.addf %93, %95 : vector<64x48xf32>
    %97 = vector.broadcast %54 : vector<1x48xf32> to vector<64x48xf32>
    %98 = arith.addf %96, %97 : vector<64x48xf32>
    %cst_49 = arith.constant 0.000000e+00 : f32
    %cst_50 = arith.constant 6.000000e+00 : f32
    %99 = vector.broadcast %cst_49 : f32 to vector<64x48xf32>
    %100 = arith.maximumf %99, %98 : vector<64x48xf32>
    %101 = vector.broadcast %cst_50 : f32 to vector<64x48xf32>
    %102 = arith.minimumf %101, %100 : vector<64x48xf32>
    %103 = arith.truncf %102 : vector<64x48xf32> to vector<64x48xbf16>
    %cst_51 = arith.constant dense<0.000000e+00> : vector<64x64xf32>
    %104 = tpu.matmul %103, %55, %cst_51 {dimension_numbers = #tpu.dot_dimension_numbers<[1], [0], [0], [1], [0, 0, 1, 1], [], []>} : vector<64x48xbf16>, vector<48x64xbf16>, vector<64x64xf32> -> vector<64x64xf32>
    %105 = vector.broadcast %56 : vector<1x64xf32> to vector<64x64xf32>
    %106 = arith.addf %104, %105 : vector<64x64xf32>
    %cst_52 = arith.constant 0.000000e+00 : f32
    %cst_53 = arith.constant 6.000000e+00 : f32
    %107 = vector.broadcast %cst_52 : f32 to vector<64x64xf32>
    %108 = arith.maximumf %107, %106 : vector<64x64xf32>
    %109 = vector.broadcast %cst_53 : f32 to vector<64x64xf32>
    %110 = arith.minimumf %109, %108 : vector<64x64xf32>
    %cst_54 = arith.constant dense<0.000000e+00> : vector<64xf32>
    %111 = vector.multi_reduction <add>, %110, %cst_54 [0] : vector<64x64xf32> to vector<64xf32>
    %112 = vector.shape_cast %111 : vector<64xf32> to vector<1x64xf32>
    %113 = arith.addf %57, %112 : vector<1x64xf32>
    %c64 = arith.constant 64 : index
    %c0_55 = arith.constant 0 : index
    %114 = vector.load %arg10[%c64, %c0_55] : memref<560x48xf32, #tpu.memory_space<vmem>>, vector<64x48xf32>
    %115 = vector.broadcast %46 : vector<1x48xf32> to vector<64x48xf32>
    %116 = arith.mulf %114, %115 : vector<64x48xf32>
    %c63_i32_56 = arith.constant 63 : i32
    %117 = tpu.dynamic_rotate %114 by %c63_i32_56 dim 0 : vector<64x48xf32>, i32 -> vector<64x48xf32>
    %118 = vector.broadcast %47 : vector<1x48xf32> to vector<64x48xf32>
    %119 = arith.mulf %117, %118 : vector<64x48xf32>
    %c1_i32_57 = arith.constant 1 : i32
    %120 = tpu.dynamic_rotate %114 by %c1_i32_57 dim 0 : vector<64x48xf32>, i32 -> vector<64x48xf32>
    %121 = vector.broadcast %45 : vector<1x48xf32> to vector<64x48xf32>
    %122 = arith.mulf %120, %121 : vector<64x48xf32>
    %c80 = arith.constant 80 : index
    %c0_58 = arith.constant 0 : index
    %123 = vector.load %arg10[%c80, %c0_58] : memref<560x48xf32, #tpu.memory_space<vmem>>, vector<64x48xf32>
    %124 = vector.broadcast %49 : vector<1x48xf32> to vector<64x48xf32>
    %125 = arith.mulf %123, %124 : vector<64x48xf32>
    %c63_i32_59 = arith.constant 63 : i32
    %126 = tpu.dynamic_rotate %123 by %c63_i32_59 dim 0 : vector<64x48xf32>, i32 -> vector<64x48xf32>
    %127 = vector.broadcast %50 : vector<1x48xf32> to vector<64x48xf32>
    %128 = arith.mulf %126, %127 : vector<64x48xf32>
    %c1_i32_60 = arith.constant 1 : i32
    %129 = tpu.dynamic_rotate %123 by %c1_i32_60 dim 0 : vector<64x48xf32>, i32 -> vector<64x48xf32>
    %130 = vector.broadcast %48 : vector<1x48xf32> to vector<64x48xf32>
    %131 = arith.mulf %129, %130 : vector<64x48xf32>
    %132 = arith.addf %116, %125 : vector<64x48xf32>
    %133 = arith.addf %119, %128 : vector<64x48xf32>
    %134 = arith.addf %122, %131 : vector<64x48xf32>
    %c96 = arith.constant 96 : index
    %c0_61 = arith.constant 0 : index
    %135 = vector.load %arg10[%c96, %c0_61] : memref<560x48xf32, #tpu.memory_space<vmem>>, vector<64x48xf32>
    %136 = vector.broadcast %52 : vector<1x48xf32> to vector<64x48xf32>
    %137 = arith.mulf %135, %136 : vector<64x48xf32>
    %c63_i32_62 = arith.constant 63 : i32
    %138 = tpu.dynamic_rotate %135 by %c63_i32_62 dim 0 : vector<64x48xf32>, i32 -> vector<64x48xf32>
    %139 = vector.broadcast %53 : vector<1x48xf32> to vector<64x48xf32>
    %140 = arith.mulf %138, %139 : vector<64x48xf32>
    %c1_i32_63 = arith.constant 1 : i32
    %141 = tpu.dynamic_rotate %135 by %c1_i32_63 dim 0 : vector<64x48xf32>, i32 -> vector<64x48xf32>
    %142 = vector.broadcast %51 : vector<1x48xf32> to vector<64x48xf32>
    %143 = arith.mulf %141, %142 : vector<64x48xf32>
    %144 = arith.addf %132, %137 : vector<64x48xf32>
    %145 = arith.addf %133, %140 : vector<64x48xf32>
    %146 = arith.addf %134, %143 : vector<64x48xf32>
    %147 = vector.broadcast %44 : vector<64x1xf32> to vector<64x48xf32>
    %148 = arith.mulf %145, %147 : vector<64x48xf32>
    %149 = arith.addf %144, %148 : vector<64x48xf32>
    %150 = vector.broadcast %39 : vector<64x1xf32> to vector<64x48xf32>
    %151 = arith.mulf %146, %150 : vector<64x48xf32>
    %152 = arith.addf %149, %151 : vector<64x48xf32>
    %153 = vector.broadcast %54 : vector<1x48xf32> to vector<64x48xf32>
    %154 = arith.addf %152, %153 : vector<64x48xf32>
    %cst_64 = arith.constant 0.000000e+00 : f32
    %cst_65 = arith.constant 6.000000e+00 : f32
    %155 = vector.broadcast %cst_64 : f32 to vector<64x48xf32>
    %156 = arith.maximumf %155, %154 : vector<64x48xf32>
    %157 = vector.broadcast %cst_65 : f32 to vector<64x48xf32>
    %158 = arith.minimumf %157, %156 : vector<64x48xf32>
    %159 = arith.truncf %158 : vector<64x48xf32> to vector<64x48xbf16>
    %cst_66 = arith.constant dense<0.000000e+00> : vector<64x64xf32>
    %160 = tpu.matmul %159, %55, %cst_66 {dimension_numbers = #tpu.dot_dimension_numbers<[1], [0], [0], [1], [0, 0, 1, 1], [], []>} : vector<64x48xbf16>, vector<48x64xbf16>, vector<64x64xf32> -> vector<64x64xf32>
    %161 = vector.broadcast %56 : vector<1x64xf32> to vector<64x64xf32>
    %162 = arith.addf %160, %161 : vector<64x64xf32>
    %cst_67 = arith.constant 0.000000e+00 : f32
    %cst_68 = arith.constant 6.000000e+00 : f32
    %163 = vector.broadcast %cst_67 : f32 to vector<64x64xf32>
    %164 = arith.maximumf %163, %162 : vector<64x64xf32>
    %165 = vector.broadcast %cst_68 : f32 to vector<64x64xf32>
    %166 = arith.minimumf %165, %164 : vector<64x64xf32>
    %cst_69 = arith.constant dense<0.000000e+00> : vector<64xf32>
    %167 = vector.multi_reduction <add>, %166, %cst_69 [0] : vector<64x64xf32> to vector<64xf32>
    %168 = vector.shape_cast %167 : vector<64xf32> to vector<1x64xf32>
    %169 = arith.addf %113, %168 : vector<1x64xf32>
    %c128 = arith.constant 128 : index
    %c0_70 = arith.constant 0 : index
    %170 = vector.load %arg10[%c128, %c0_70] : memref<560x48xf32, #tpu.memory_space<vmem>>, vector<64x48xf32>
    %171 = vector.broadcast %46 : vector<1x48xf32> to vector<64x48xf32>
    %172 = arith.mulf %170, %171 : vector<64x48xf32>
    %c63_i32_71 = arith.constant 63 : i32
    %173 = tpu.dynamic_rotate %170 by %c63_i32_71 dim 0 : vector<64x48xf32>, i32 -> vector<64x48xf32>
    %174 = vector.broadcast %47 : vector<1x48xf32> to vector<64x48xf32>
    %175 = arith.mulf %173, %174 : vector<64x48xf32>
    %c1_i32_72 = arith.constant 1 : i32
    %176 = tpu.dynamic_rotate %170 by %c1_i32_72 dim 0 : vector<64x48xf32>, i32 -> vector<64x48xf32>
    %177 = vector.broadcast %45 : vector<1x48xf32> to vector<64x48xf32>
    %178 = arith.mulf %176, %177 : vector<64x48xf32>
    %c144 = arith.constant 144 : index
    %c0_73 = arith.constant 0 : index
    %179 = vector.load %arg10[%c144, %c0_73] : memref<560x48xf32, #tpu.memory_space<vmem>>, vector<64x48xf32>
    %180 = vector.broadcast %49 : vector<1x48xf32> to vector<64x48xf32>
    %181 = arith.mulf %179, %180 : vector<64x48xf32>
    %c63_i32_74 = arith.constant 63 : i32
    %182 = tpu.dynamic_rotate %179 by %c63_i32_74 dim 0 : vector<64x48xf32>, i32 -> vector<64x48xf32>
    %183 = vector.broadcast %50 : vector<1x48xf32> to vector<64x48xf32>
    %184 = arith.mulf %182, %183 : vector<64x48xf32>
    %c1_i32_75 = arith.constant 1 : i32
    %185 = tpu.dynamic_rotate %179 by %c1_i32_75 dim 0 : vector<64x48xf32>, i32 -> vector<64x48xf32>
    %186 = vector.broadcast %48 : vector<1x48xf32> to vector<64x48xf32>
    %187 = arith.mulf %185, %186 : vector<64x48xf32>
    %188 = arith.addf %172, %181 : vector<64x48xf32>
    %189 = arith.addf %175, %184 : vector<64x48xf32>
    %190 = arith.addf %178, %187 : vector<64x48xf32>
    %c160 = arith.constant 160 : index
    %c0_76 = arith.constant 0 : index
    %191 = vector.load %arg10[%c160, %c0_76] : memref<560x48xf32, #tpu.memory_space<vmem>>, vector<64x48xf32>
    %192 = vector.broadcast %52 : vector<1x48xf32> to vector<64x48xf32>
    %193 = arith.mulf %191, %192 : vector<64x48xf32>
    %c63_i32_77 = arith.constant 63 : i32
    %194 = tpu.dynamic_rotate %191 by %c63_i32_77 dim 0 : vector<64x48xf32>, i32 -> vector<64x48xf32>
    %195 = vector.broadcast %53 : vector<1x48xf32> to vector<64x48xf32>
    %196 = arith.mulf %194, %195 : vector<64x48xf32>
    %c1_i32_78 = arith.constant 1 : i32
    %197 = tpu.dynamic_rotate %191 by %c1_i32_78 dim 0 : vector<64x48xf32>, i32 -> vector<64x48xf32>
    %198 = vector.broadcast %51 : vector<1x48xf32> to vector<64x48xf32>
    %199 = arith.mulf %197, %198 : vector<64x48xf32>
    %200 = arith.addf %188, %193 : vector<64x48xf32>
    %201 = arith.addf %189, %196 : vector<64x48xf32>
    %202 = arith.addf %190, %199 : vector<64x48xf32>
    %203 = vector.broadcast %44 : vector<64x1xf32> to vector<64x48xf32>
    %204 = arith.mulf %201, %203 : vector<64x48xf32>
    %205 = arith.addf %200, %204 : vector<64x48xf32>
    %206 = vector.broadcast %39 : vector<64x1xf32> to vector<64x48xf32>
    %207 = arith.mulf %202, %206 : vector<64x48xf32>
    %208 = arith.addf %205, %207 : vector<64x48xf32>
    %209 = vector.broadcast %54 : vector<1x48xf32> to vector<64x48xf32>
    %210 = arith.addf %208, %209 : vector<64x48xf32>
    %cst_79 = arith.constant 0.000000e+00 : f32
    %cst_80 = arith.constant 6.000000e+00 : f32
    %211 = vector.broadcast %cst_79 : f32 to vector<64x48xf32>
    %212 = arith.maximumf %211, %210 : vector<64x48xf32>
    %213 = vector.broadcast %cst_80 : f32 to vector<64x48xf32>
    %214 = arith.minimumf %213, %212 : vector<64x48xf32>
    %215 = arith.truncf %214 : vector<64x48xf32> to vector<64x48xbf16>
    %cst_81 = arith.constant dense<0.000000e+00> : vector<64x64xf32>
    %216 = tpu.matmul %215, %55, %cst_81 {dimension_numbers = #tpu.dot_dimension_numbers<[1], [0], [0], [1], [0, 0, 1, 1], [], []>} : vector<64x48xbf16>, vector<48x64xbf16>, vector<64x64xf32> -> vector<64x64xf32>
    %217 = vector.broadcast %56 : vector<1x64xf32> to vector<64x64xf32>
    %218 = arith.addf %216, %217 : vector<64x64xf32>
    %cst_82 = arith.constant 0.000000e+00 : f32
    %cst_83 = arith.constant 6.000000e+00 : f32
    %219 = vector.broadcast %cst_82 : f32 to vector<64x64xf32>
    %220 = arith.maximumf %219, %218 : vector<64x64xf32>
    %221 = vector.broadcast %cst_83 : f32 to vector<64x64xf32>
    %222 = arith.minimumf %221, %220 : vector<64x64xf32>
    %cst_84 = arith.constant dense<0.000000e+00> : vector<64xf32>
    %223 = vector.multi_reduction <add>, %222, %cst_84 [0] : vector<64x64xf32> to vector<64xf32>
    %224 = vector.shape_cast %223 : vector<64xf32> to vector<1x64xf32>
    %225 = arith.addf %169, %224 : vector<1x64xf32>
    %c192 = arith.constant 192 : index
    %c0_85 = arith.constant 0 : index
    %226 = vector.load %arg10[%c192, %c0_85] : memref<560x48xf32, #tpu.memory_space<vmem>>, vector<64x48xf32>
    %227 = vector.broadcast %46 : vector<1x48xf32> to vector<64x48xf32>
    %228 = arith.mulf %226, %227 : vector<64x48xf32>
    %c63_i32_86 = arith.constant 63 : i32
    %229 = tpu.dynamic_rotate %226 by %c63_i32_86 dim 0 : vector<64x48xf32>, i32 -> vector<64x48xf32>
    %230 = vector.broadcast %47 : vector<1x48xf32> to vector<64x48xf32>
    %231 = arith.mulf %229, %230 : vector<64x48xf32>
    %c1_i32_87 = arith.constant 1 : i32
    %232 = tpu.dynamic_rotate %226 by %c1_i32_87 dim 0 : vector<64x48xf32>, i32 -> vector<64x48xf32>
    %233 = vector.broadcast %45 : vector<1x48xf32> to vector<64x48xf32>
    %234 = arith.mulf %232, %233 : vector<64x48xf32>
    %c208 = arith.constant 208 : index
    %c0_88 = arith.constant 0 : index
    %235 = vector.load %arg10[%c208, %c0_88] : memref<560x48xf32, #tpu.memory_space<vmem>>, vector<64x48xf32>
    %236 = vector.broadcast %49 : vector<1x48xf32> to vector<64x48xf32>
    %237 = arith.mulf %235, %236 : vector<64x48xf32>
    %c63_i32_89 = arith.constant 63 : i32
    %238 = tpu.dynamic_rotate %235 by %c63_i32_89 dim 0 : vector<64x48xf32>, i32 -> vector<64x48xf32>
    %239 = vector.broadcast %50 : vector<1x48xf32> to vector<64x48xf32>
    %240 = arith.mulf %238, %239 : vector<64x48xf32>
    %c1_i32_90 = arith.constant 1 : i32
    %241 = tpu.dynamic_rotate %235 by %c1_i32_90 dim 0 : vector<64x48xf32>, i32 -> vector<64x48xf32>
    %242 = vector.broadcast %48 : vector<1x48xf32> to vector<64x48xf32>
    %243 = arith.mulf %241, %242 : vector<64x48xf32>
    %244 = arith.addf %228, %237 : vector<64x48xf32>
    %245 = arith.addf %231, %240 : vector<64x48xf32>
    %246 = arith.addf %234, %243 : vector<64x48xf32>
    %c224 = arith.constant 224 : index
    %c0_91 = arith.constant 0 : index
    %247 = vector.load %arg10[%c224, %c0_91] : memref<560x48xf32, #tpu.memory_space<vmem>>, vector<64x48xf32>
    %248 = vector.broadcast %52 : vector<1x48xf32> to vector<64x48xf32>
    %249 = arith.mulf %247, %248 : vector<64x48xf32>
    %c63_i32_92 = arith.constant 63 : i32
    %250 = tpu.dynamic_rotate %247 by %c63_i32_92 dim 0 : vector<64x48xf32>, i32 -> vector<64x48xf32>
    %251 = vector.broadcast %53 : vector<1x48xf32> to vector<64x48xf32>
    %252 = arith.mulf %250, %251 : vector<64x48xf32>
    %c1_i32_93 = arith.constant 1 : i32
    %253 = tpu.dynamic_rotate %247 by %c1_i32_93 dim 0 : vector<64x48xf32>, i32 -> vector<64x48xf32>
    %254 = vector.broadcast %51 : vector<1x48xf32> to vector<64x48xf32>
    %255 = arith.mulf %253, %254 : vector<64x48xf32>
    %256 = arith.addf %244, %249 : vector<64x48xf32>
    %257 = arith.addf %245, %252 : vector<64x48xf32>
    %258 = arith.addf %246, %255 : vector<64x48xf32>
    %259 = vector.broadcast %44 : vector<64x1xf32> to vector<64x48xf32>
    %260 = arith.mulf %257, %259 : vector<64x48xf32>
    %261 = arith.addf %256, %260 : vector<64x48xf32>
    %262 = vector.broadcast %39 : vector<64x1xf32> to vector<64x48xf32>
    %263 = arith.mulf %258, %262 : vector<64x48xf32>
    %264 = arith.addf %261, %263 : vector<64x48xf32>
    %265 = vector.broadcast %54 : vector<1x48xf32> to vector<64x48xf32>
    %266 = arith.addf %264, %265 : vector<64x48xf32>
    %cst_94 = arith.constant 0.000000e+00 : f32
    %cst_95 = arith.constant 6.000000e+00 : f32
    %267 = vector.broadcast %cst_94 : f32 to vector<64x48xf32>
    %268 = arith.maximumf %267, %266 : vector<64x48xf32>
    %269 = vector.broadcast %cst_95 : f32 to vector<64x48xf32>
    %270 = arith.minimumf %269, %268 : vector<64x48xf32>
    %271 = arith.truncf %270 : vector<64x48xf32> to vector<64x48xbf16>
    %cst_96 = arith.constant dense<0.000000e+00> : vector<64x64xf32>
    %272 = tpu.matmul %271, %55, %cst_96 {dimension_numbers = #tpu.dot_dimension_numbers<[1], [0], [0], [1], [0, 0, 1, 1], [], []>} : vector<64x48xbf16>, vector<48x64xbf16>, vector<64x64xf32> -> vector<64x64xf32>
    %273 = vector.broadcast %56 : vector<1x64xf32> to vector<64x64xf32>
    %274 = arith.addf %272, %273 : vector<64x64xf32>
    %cst_97 = arith.constant 0.000000e+00 : f32
    %cst_98 = arith.constant 6.000000e+00 : f32
    %275 = vector.broadcast %cst_97 : f32 to vector<64x64xf32>
    %276 = arith.maximumf %275, %274 : vector<64x64xf32>
    %277 = vector.broadcast %cst_98 : f32 to vector<64x64xf32>
    %278 = arith.minimumf %277, %276 : vector<64x64xf32>
    %cst_99 = arith.constant dense<0.000000e+00> : vector<64xf32>
    %279 = vector.multi_reduction <add>, %278, %cst_99 [0] : vector<64x64xf32> to vector<64xf32>
    %280 = vector.shape_cast %279 : vector<64xf32> to vector<1x64xf32>
    %281 = arith.addf %225, %280 : vector<1x64xf32>
    %cst_100 = arith.constant 3.906250e-03 : f32
    %282 = vector.broadcast %cst_100 : f32 to vector<1x64xf32>
    %283 = arith.mulf %281, %282 : vector<1x64xf32>
    %cst_101 = arith.constant 0.000000e+00 : f32
    %284 = vector.broadcast %cst_101 : f32 to vector<1x64xf32>
    %c272_102 = arith.constant 272 : index
    %c0_103 = arith.constant 0 : index
    %285 = vector.load %arg10[%c272_102, %c0_103] : memref<560x48xf32, #tpu.memory_space<vmem>>, vector<64x48xf32>
    %286 = vector.broadcast %46 : vector<1x48xf32> to vector<64x48xf32>
    %287 = arith.mulf %285, %286 : vector<64x48xf32>
    %c63_i32_104 = arith.constant 63 : i32
    %288 = tpu.dynamic_rotate %285 by %c63_i32_104 dim 0 : vector<64x48xf32>, i32 -> vector<64x48xf32>
    %289 = vector.broadcast %47 : vector<1x48xf32> to vector<64x48xf32>
    %290 = arith.mulf %288, %289 : vector<64x48xf32>
    %c1_i32_105 = arith.constant 1 : i32
    %291 = tpu.dynamic_rotate %285 by %c1_i32_105 dim 0 : vector<64x48xf32>, i32 -> vector<64x48xf32>
    %292 = vector.broadcast %45 : vector<1x48xf32> to vector<64x48xf32>
    %293 = arith.mulf %291, %292 : vector<64x48xf32>
    %c288_106 = arith.constant 288 : index
    %c0_107 = arith.constant 0 : index
    %294 = vector.load %arg10[%c288_106, %c0_107] : memref<560x48xf32, #tpu.memory_space<vmem>>, vector<64x48xf32>
    %295 = vector.broadcast %49 : vector<1x48xf32> to vector<64x48xf32>
    %296 = arith.mulf %294, %295 : vector<64x48xf32>
    %c63_i32_108 = arith.constant 63 : i32
    %297 = tpu.dynamic_rotate %294 by %c63_i32_108 dim 0 : vector<64x48xf32>, i32 -> vector<64x48xf32>
    %298 = vector.broadcast %50 : vector<1x48xf32> to vector<64x48xf32>
    %299 = arith.mulf %297, %298 : vector<64x48xf32>
    %c1_i32_109 = arith.constant 1 : i32
    %300 = tpu.dynamic_rotate %294 by %c1_i32_109 dim 0 : vector<64x48xf32>, i32 -> vector<64x48xf32>
    %301 = vector.broadcast %48 : vector<1x48xf32> to vector<64x48xf32>
    %302 = arith.mulf %300, %301 : vector<64x48xf32>
    %303 = arith.addf %287, %296 : vector<64x48xf32>
    %304 = arith.addf %290, %299 : vector<64x48xf32>
    %305 = arith.addf %293, %302 : vector<64x48xf32>
    %c304 = arith.constant 304 : index
    %c0_110 = arith.constant 0 : index
    %306 = vector.load %arg10[%c304, %c0_110] : memref<560x48xf32, #tpu.memory_space<vmem>>, vector<64x48xf32>
    %307 = vector.broadcast %52 : vector<1x48xf32> to vector<64x48xf32>
    %308 = arith.mulf %306, %307 : vector<64x48xf32>
    %c63_i32_111 = arith.constant 63 : i32
    %309 = tpu.dynamic_rotate %306 by %c63_i32_111 dim 0 : vector<64x48xf32>, i32 -> vector<64x48xf32>
    %310 = vector.broadcast %53 : vector<1x48xf32> to vector<64x48xf32>
    %311 = arith.mulf %309, %310 : vector<64x48xf32>
    %c1_i32_112 = arith.constant 1 : i32
    %312 = tpu.dynamic_rotate %306 by %c1_i32_112 dim 0 : vector<64x48xf32>, i32 -> vector<64x48xf32>
    %313 = vector.broadcast %51 : vector<1x48xf32> to vector<64x48xf32>
    %314 = arith.mulf %312, %313 : vector<64x48xf32>
    %315 = arith.addf %303, %308 : vector<64x48xf32>
    %316 = arith.addf %304, %311 : vector<64x48xf32>
    %317 = arith.addf %305, %314 : vector<64x48xf32>
    %318 = vector.broadcast %44 : vector<64x1xf32> to vector<64x48xf32>
    %319 = arith.mulf %316, %318 : vector<64x48xf32>
    %320 = arith.addf %315, %319 : vector<64x48xf32>
    %321 = vector.broadcast %39 : vector<64x1xf32> to vector<64x48xf32>
    %322 = arith.mulf %317, %321 : vector<64x48xf32>
    %323 = arith.addf %320, %322 : vector<64x48xf32>
    %324 = vector.broadcast %54 : vector<1x48xf32> to vector<64x48xf32>
    %325 = arith.addf %323, %324 : vector<64x48xf32>
    %cst_113 = arith.constant 0.000000e+00 : f32
    %cst_114 = arith.constant 6.000000e+00 : f32
    %326 = vector.broadcast %cst_113 : f32 to vector<64x48xf32>
    %327 = arith.maximumf %326, %325 : vector<64x48xf32>
    %328 = vector.broadcast %cst_114 : f32 to vector<64x48xf32>
    %329 = arith.minimumf %328, %327 : vector<64x48xf32>
    %330 = arith.truncf %329 : vector<64x48xf32> to vector<64x48xbf16>
    %cst_115 = arith.constant dense<0.000000e+00> : vector<64x64xf32>
    %331 = tpu.matmul %330, %55, %cst_115 {dimension_numbers = #tpu.dot_dimension_numbers<[1], [0], [0], [1], [0, 0, 1, 1], [], []>} : vector<64x48xbf16>, vector<48x64xbf16>, vector<64x64xf32> -> vector<64x64xf32>
    %332 = vector.broadcast %56 : vector<1x64xf32> to vector<64x64xf32>
    %333 = arith.addf %331, %332 : vector<64x64xf32>
    %cst_116 = arith.constant 0.000000e+00 : f32
    %cst_117 = arith.constant 6.000000e+00 : f32
    %334 = vector.broadcast %cst_116 : f32 to vector<64x64xf32>
    %335 = arith.maximumf %334, %333 : vector<64x64xf32>
    %336 = vector.broadcast %cst_117 : f32 to vector<64x64xf32>
    %337 = arith.minimumf %336, %335 : vector<64x64xf32>
    %cst_118 = arith.constant dense<0.000000e+00> : vector<64xf32>
    %338 = vector.multi_reduction <add>, %337, %cst_118 [0] : vector<64x64xf32> to vector<64xf32>
    %339 = vector.shape_cast %338 : vector<64xf32> to vector<1x64xf32>
    %340 = arith.addf %284, %339 : vector<1x64xf32>
    %c336 = arith.constant 336 : index
    %c0_119 = arith.constant 0 : index
    %341 = vector.load %arg10[%c336, %c0_119] : memref<560x48xf32, #tpu.memory_space<vmem>>, vector<64x48xf32>
    %342 = vector.broadcast %46 : vector<1x48xf32> to vector<64x48xf32>
    %343 = arith.mulf %341, %342 : vector<64x48xf32>
    %c63_i32_120 = arith.constant 63 : i32
    %344 = tpu.dynamic_rotate %341 by %c63_i32_120 dim 0 : vector<64x48xf32>, i32 -> vector<64x48xf32>
    %345 = vector.broadcast %47 : vector<1x48xf32> to vector<64x48xf32>
    %346 = arith.mulf %344, %345 : vector<64x48xf32>
    %c1_i32_121 = arith.constant 1 : i32
    %347 = tpu.dynamic_rotate %341 by %c1_i32_121 dim 0 : vector<64x48xf32>, i32 -> vector<64x48xf32>
    %348 = vector.broadcast %45 : vector<1x48xf32> to vector<64x48xf32>
    %349 = arith.mulf %347, %348 : vector<64x48xf32>
    %c352 = arith.constant 352 : index
    %c0_122 = arith.constant 0 : index
    %350 = vector.load %arg10[%c352, %c0_122] : memref<560x48xf32, #tpu.memory_space<vmem>>, vector<64x48xf32>
    %351 = vector.broadcast %49 : vector<1x48xf32> to vector<64x48xf32>
    %352 = arith.mulf %350, %351 : vector<64x48xf32>
    %c63_i32_123 = arith.constant 63 : i32
    %353 = tpu.dynamic_rotate %350 by %c63_i32_123 dim 0 : vector<64x48xf32>, i32 -> vector<64x48xf32>
    %354 = vector.broadcast %50 : vector<1x48xf32> to vector<64x48xf32>
    %355 = arith.mulf %353, %354 : vector<64x48xf32>
    %c1_i32_124 = arith.constant 1 : i32
    %356 = tpu.dynamic_rotate %350 by %c1_i32_124 dim 0 : vector<64x48xf32>, i32 -> vector<64x48xf32>
    %357 = vector.broadcast %48 : vector<1x48xf32> to vector<64x48xf32>
    %358 = arith.mulf %356, %357 : vector<64x48xf32>
    %359 = arith.addf %343, %352 : vector<64x48xf32>
    %360 = arith.addf %346, %355 : vector<64x48xf32>
    %361 = arith.addf %349, %358 : vector<64x48xf32>
    %c368 = arith.constant 368 : index
    %c0_125 = arith.constant 0 : index
    %362 = vector.load %arg10[%c368, %c0_125] : memref<560x48xf32, #tpu.memory_space<vmem>>, vector<64x48xf32>
    %363 = vector.broadcast %52 : vector<1x48xf32> to vector<64x48xf32>
    %364 = arith.mulf %362, %363 : vector<64x48xf32>
    %c63_i32_126 = arith.constant 63 : i32
    %365 = tpu.dynamic_rotate %362 by %c63_i32_126 dim 0 : vector<64x48xf32>, i32 -> vector<64x48xf32>
    %366 = vector.broadcast %53 : vector<1x48xf32> to vector<64x48xf32>
    %367 = arith.mulf %365, %366 : vector<64x48xf32>
    %c1_i32_127 = arith.constant 1 : i32
    %368 = tpu.dynamic_rotate %362 by %c1_i32_127 dim 0 : vector<64x48xf32>, i32 -> vector<64x48xf32>
    %369 = vector.broadcast %51 : vector<1x48xf32> to vector<64x48xf32>
    %370 = arith.mulf %368, %369 : vector<64x48xf32>
    %371 = arith.addf %359, %364 : vector<64x48xf32>
    %372 = arith.addf %360, %367 : vector<64x48xf32>
    %373 = arith.addf %361, %370 : vector<64x48xf32>
    %374 = vector.broadcast %44 : vector<64x1xf32> to vector<64x48xf32>
    %375 = arith.mulf %372, %374 : vector<64x48xf32>
    %376 = arith.addf %371, %375 : vector<64x48xf32>
    %377 = vector.broadcast %39 : vector<64x1xf32> to vector<64x48xf32>
    %378 = arith.mulf %373, %377 : vector<64x48xf32>
    %379 = arith.addf %376, %378 : vector<64x48xf32>
    %380 = vector.broadcast %54 : vector<1x48xf32> to vector<64x48xf32>
    %381 = arith.addf %379, %380 : vector<64x48xf32>
    %cst_128 = arith.constant 0.000000e+00 : f32
    %cst_129 = arith.constant 6.000000e+00 : f32
    %382 = vector.broadcast %cst_128 : f32 to vector<64x48xf32>
    %383 = arith.maximumf %382, %381 : vector<64x48xf32>
    %384 = vector.broadcast %cst_129 : f32 to vector<64x48xf32>
    %385 = arith.minimumf %384, %383 : vector<64x48xf32>
    %386 = arith.truncf %385 : vector<64x48xf32> to vector<64x48xbf16>
    %cst_130 = arith.constant dense<0.000000e+00> : vector<64x64xf32>
    %387 = tpu.matmul %386, %55, %cst_130 {dimension_numbers = #tpu.dot_dimension_numbers<[1], [0], [0], [1], [0, 0, 1, 1], [], []>} : vector<64x48xbf16>, vector<48x64xbf16>, vector<64x64xf32> -> vector<64x64xf32>
    %388 = vector.broadcast %56 : vector<1x64xf32> to vector<64x64xf32>
    %389 = arith.addf %387, %388 : vector<64x64xf32>
    %cst_131 = arith.constant 0.000000e+00 : f32
    %cst_132 = arith.constant 6.000000e+00 : f32
    %390 = vector.broadcast %cst_131 : f32 to vector<64x64xf32>
    %391 = arith.maximumf %390, %389 : vector<64x64xf32>
    %392 = vector.broadcast %cst_132 : f32 to vector<64x64xf32>
    %393 = arith.minimumf %392, %391 : vector<64x64xf32>
    %cst_133 = arith.constant dense<0.000000e+00> : vector<64xf32>
    %394 = vector.multi_reduction <add>, %393, %cst_133 [0] : vector<64x64xf32> to vector<64xf32>
    %395 = vector.shape_cast %394 : vector<64xf32> to vector<1x64xf32>
    %396 = arith.addf %340, %395 : vector<1x64xf32>
    %c400 = arith.constant 400 : index
    %c0_134 = arith.constant 0 : index
    %397 = vector.load %arg10[%c400, %c0_134] : memref<560x48xf32, #tpu.memory_space<vmem>>, vector<64x48xf32>
    %398 = vector.broadcast %46 : vector<1x48xf32> to vector<64x48xf32>
    %399 = arith.mulf %397, %398 : vector<64x48xf32>
    %c63_i32_135 = arith.constant 63 : i32
    %400 = tpu.dynamic_rotate %397 by %c63_i32_135 dim 0 : vector<64x48xf32>, i32 -> vector<64x48xf32>
    %401 = vector.broadcast %47 : vector<1x48xf32> to vector<64x48xf32>
    %402 = arith.mulf %400, %401 : vector<64x48xf32>
    %c1_i32_136 = arith.constant 1 : i32
    %403 = tpu.dynamic_rotate %397 by %c1_i32_136 dim 0 : vector<64x48xf32>, i32 -> vector<64x48xf32>
    %404 = vector.broadcast %45 : vector<1x48xf32> to vector<64x48xf32>
    %405 = arith.mulf %403, %404 : vector<64x48xf32>
    %c416 = arith.constant 416 : index
    %c0_137 = arith.constant 0 : index
    %406 = vector.load %arg10[%c416, %c0_137] : memref<560x48xf32, #tpu.memory_space<vmem>>, vector<64x48xf32>
    %407 = vector.broadcast %49 : vector<1x48xf32> to vector<64x48xf32>
    %408 = arith.mulf %406, %407 : vector<64x48xf32>
    %c63_i32_138 = arith.constant 63 : i32
    %409 = tpu.dynamic_rotate %406 by %c63_i32_138 dim 0 : vector<64x48xf32>, i32 -> vector<64x48xf32>
    %410 = vector.broadcast %50 : vector<1x48xf32> to vector<64x48xf32>
    %411 = arith.mulf %409, %410 : vector<64x48xf32>
    %c1_i32_139 = arith.constant 1 : i32
    %412 = tpu.dynamic_rotate %406 by %c1_i32_139 dim 0 : vector<64x48xf32>, i32 -> vector<64x48xf32>
    %413 = vector.broadcast %48 : vector<1x48xf32> to vector<64x48xf32>
    %414 = arith.mulf %412, %413 : vector<64x48xf32>
    %415 = arith.addf %399, %408 : vector<64x48xf32>
    %416 = arith.addf %402, %411 : vector<64x48xf32>
    %417 = arith.addf %405, %414 : vector<64x48xf32>
    %c432 = arith.constant 432 : index
    %c0_140 = arith.constant 0 : index
    %418 = vector.load %arg10[%c432, %c0_140] : memref<560x48xf32, #tpu.memory_space<vmem>>, vector<64x48xf32>
    %419 = vector.broadcast %52 : vector<1x48xf32> to vector<64x48xf32>
    %420 = arith.mulf %418, %419 : vector<64x48xf32>
    %c63_i32_141 = arith.constant 63 : i32
    %421 = tpu.dynamic_rotate %418 by %c63_i32_141 dim 0 : vector<64x48xf32>, i32 -> vector<64x48xf32>
    %422 = vector.broadcast %53 : vector<1x48xf32> to vector<64x48xf32>
    %423 = arith.mulf %421, %422 : vector<64x48xf32>
    %c1_i32_142 = arith.constant 1 : i32
    %424 = tpu.dynamic_rotate %418 by %c1_i32_142 dim 0 : vector<64x48xf32>, i32 -> vector<64x48xf32>
    %425 = vector.broadcast %51 : vector<1x48xf32> to vector<64x48xf32>
    %426 = arith.mulf %424, %425 : vector<64x48xf32>
    %427 = arith.addf %415, %420 : vector<64x48xf32>
    %428 = arith.addf %416, %423 : vector<64x48xf32>
    %429 = arith.addf %417, %426 : vector<64x48xf32>
    %430 = vector.broadcast %44 : vector<64x1xf32> to vector<64x48xf32>
    %431 = arith.mulf %428, %430 : vector<64x48xf32>
    %432 = arith.addf %427, %431 : vector<64x48xf32>
    %433 = vector.broadcast %39 : vector<64x1xf32> to vector<64x48xf32>
    %434 = arith.mulf %429, %433 : vector<64x48xf32>
    %435 = arith.addf %432, %434 : vector<64x48xf32>
    %436 = vector.broadcast %54 : vector<1x48xf32> to vector<64x48xf32>
    %437 = arith.addf %435, %436 : vector<64x48xf32>
    %cst_143 = arith.constant 0.000000e+00 : f32
    %cst_144 = arith.constant 6.000000e+00 : f32
    %438 = vector.broadcast %cst_143 : f32 to vector<64x48xf32>
    %439 = arith.maximumf %438, %437 : vector<64x48xf32>
    %440 = vector.broadcast %cst_144 : f32 to vector<64x48xf32>
    %441 = arith.minimumf %440, %439 : vector<64x48xf32>
    %442 = arith.truncf %441 : vector<64x48xf32> to vector<64x48xbf16>
    %cst_145 = arith.constant dense<0.000000e+00> : vector<64x64xf32>
    %443 = tpu.matmul %442, %55, %cst_145 {dimension_numbers = #tpu.dot_dimension_numbers<[1], [0], [0], [1], [0, 0, 1, 1], [], []>} : vector<64x48xbf16>, vector<48x64xbf16>, vector<64x64xf32> -> vector<64x64xf32>
    %444 = vector.broadcast %56 : vector<1x64xf32> to vector<64x64xf32>
    %445 = arith.addf %443, %444 : vector<64x64xf32>
    %cst_146 = arith.constant 0.000000e+00 : f32
    %cst_147 = arith.constant 6.000000e+00 : f32
    %446 = vector.broadcast %cst_146 : f32 to vector<64x64xf32>
    %447 = arith.maximumf %446, %445 : vector<64x64xf32>
    %448 = vector.broadcast %cst_147 : f32 to vector<64x64xf32>
    %449 = arith.minimumf %448, %447 : vector<64x64xf32>
    %cst_148 = arith.constant dense<0.000000e+00> : vector<64xf32>
    %450 = vector.multi_reduction <add>, %449, %cst_148 [0] : vector<64x64xf32> to vector<64xf32>
    %451 = vector.shape_cast %450 : vector<64xf32> to vector<1x64xf32>
    %452 = arith.addf %396, %451 : vector<1x64xf32>
    %c464 = arith.constant 464 : index
    %c0_149 = arith.constant 0 : index
    %453 = vector.load %arg10[%c464, %c0_149] : memref<560x48xf32, #tpu.memory_space<vmem>>, vector<64x48xf32>
    %454 = vector.broadcast %46 : vector<1x48xf32> to vector<64x48xf32>
    %455 = arith.mulf %453, %454 : vector<64x48xf32>
    %c63_i32_150 = arith.constant 63 : i32
    %456 = tpu.dynamic_rotate %453 by %c63_i32_150 dim 0 : vector<64x48xf32>, i32 -> vector<64x48xf32>
    %457 = vector.broadcast %47 : vector<1x48xf32> to vector<64x48xf32>
    %458 = arith.mulf %456, %457 : vector<64x48xf32>
    %c1_i32_151 = arith.constant 1 : i32
    %459 = tpu.dynamic_rotate %453 by %c1_i32_151 dim 0 : vector<64x48xf32>, i32 -> vector<64x48xf32>
    %460 = vector.broadcast %45 : vector<1x48xf32> to vector<64x48xf32>
    %461 = arith.mulf %459, %460 : vector<64x48xf32>
    %c480 = arith.constant 480 : index
    %c0_152 = arith.constant 0 : index
    %462 = vector.load %arg10[%c480, %c0_152] : memref<560x48xf32, #tpu.memory_space<vmem>>, vector<64x48xf32>
    %463 = vector.broadcast %49 : vector<1x48xf32> to vector<64x48xf32>
    %464 = arith.mulf %462, %463 : vector<64x48xf32>
    %c63_i32_153 = arith.constant 63 : i32
    %465 = tpu.dynamic_rotate %462 by %c63_i32_153 dim 0 : vector<64x48xf32>, i32 -> vector<64x48xf32>
    %466 = vector.broadcast %50 : vector<1x48xf32> to vector<64x48xf32>
    %467 = arith.mulf %465, %466 : vector<64x48xf32>
    %c1_i32_154 = arith.constant 1 : i32
    %468 = tpu.dynamic_rotate %462 by %c1_i32_154 dim 0 : vector<64x48xf32>, i32 -> vector<64x48xf32>
    %469 = vector.broadcast %48 : vector<1x48xf32> to vector<64x48xf32>
    %470 = arith.mulf %468, %469 : vector<64x48xf32>
    %471 = arith.addf %455, %464 : vector<64x48xf32>
    %472 = arith.addf %458, %467 : vector<64x48xf32>
    %473 = arith.addf %461, %470 : vector<64x48xf32>
    %c496 = arith.constant 496 : index
    %c0_155 = arith.constant 0 : index
    %474 = vector.load %arg10[%c496, %c0_155] : memref<560x48xf32, #tpu.memory_space<vmem>>, vector<64x48xf32>
    %475 = vector.broadcast %52 : vector<1x48xf32> to vector<64x48xf32>
    %476 = arith.mulf %474, %475 : vector<64x48xf32>
    %c63_i32_156 = arith.constant 63 : i32
    %477 = tpu.dynamic_rotate %474 by %c63_i32_156 dim 0 : vector<64x48xf32>, i32 -> vector<64x48xf32>
    %478 = vector.broadcast %53 : vector<1x48xf32> to vector<64x48xf32>
    %479 = arith.mulf %477, %478 : vector<64x48xf32>
    %c1_i32_157 = arith.constant 1 : i32
    %480 = tpu.dynamic_rotate %474 by %c1_i32_157 dim 0 : vector<64x48xf32>, i32 -> vector<64x48xf32>
    %481 = vector.broadcast %51 : vector<1x48xf32> to vector<64x48xf32>
    %482 = arith.mulf %480, %481 : vector<64x48xf32>
    %483 = arith.addf %471, %476 : vector<64x48xf32>
    %484 = arith.addf %472, %479 : vector<64x48xf32>
    %485 = arith.addf %473, %482 : vector<64x48xf32>
    %486 = vector.broadcast %44 : vector<64x1xf32> to vector<64x48xf32>
    %487 = arith.mulf %484, %486 : vector<64x48xf32>
    %488 = arith.addf %483, %487 : vector<64x48xf32>
    %489 = vector.broadcast %39 : vector<64x1xf32> to vector<64x48xf32>
    %490 = arith.mulf %485, %489 : vector<64x48xf32>
    %491 = arith.addf %488, %490 : vector<64x48xf32>
    %492 = vector.broadcast %54 : vector<1x48xf32> to vector<64x48xf32>
    %493 = arith.addf %491, %492 : vector<64x48xf32>
    %cst_158 = arith.constant 0.000000e+00 : f32
    %cst_159 = arith.constant 6.000000e+00 : f32
    %494 = vector.broadcast %cst_158 : f32 to vector<64x48xf32>
    %495 = arith.maximumf %494, %493 : vector<64x48xf32>
    %496 = vector.broadcast %cst_159 : f32 to vector<64x48xf32>
    %497 = arith.minimumf %496, %495 : vector<64x48xf32>
    %498 = arith.truncf %497 : vector<64x48xf32> to vector<64x48xbf16>
    %cst_160 = arith.constant dense<0.000000e+00> : vector<64x64xf32>
    %499 = tpu.matmul %498, %55, %cst_160 {dimension_numbers = #tpu.dot_dimension_numbers<[1], [0], [0], [1], [0, 0, 1, 1], [], []>} : vector<64x48xbf16>, vector<48x64xbf16>, vector<64x64xf32> -> vector<64x64xf32>
    %500 = vector.broadcast %56 : vector<1x64xf32> to vector<64x64xf32>
    %501 = arith.addf %499, %500 : vector<64x64xf32>
    %cst_161 = arith.constant 0.000000e+00 : f32
    %cst_162 = arith.constant 6.000000e+00 : f32
    %502 = vector.broadcast %cst_161 : f32 to vector<64x64xf32>
    %503 = arith.maximumf %502, %501 : vector<64x64xf32>
    %504 = vector.broadcast %cst_162 : f32 to vector<64x64xf32>
    %505 = arith.minimumf %504, %503 : vector<64x64xf32>
    %cst_163 = arith.constant dense<0.000000e+00> : vector<64xf32>
    %506 = vector.multi_reduction <add>, %505, %cst_163 [0] : vector<64x64xf32> to vector<64xf32>
    %507 = vector.shape_cast %506 : vector<64xf32> to vector<1x64xf32>
    %508 = arith.addf %452, %507 : vector<1x64xf32>
    %cst_164 = arith.constant 3.906250e-03 : f32
    %509 = vector.broadcast %cst_164 : f32 to vector<1x64xf32>
    %510 = arith.mulf %508, %509 : vector<1x64xf32>
    %511 = tpu.concatenate %283, %510 in 0 : vector<1x64xf32>, vector<1x64xf32> -> vector<2x64xf32>
    %512 = arith.truncf %511 : vector<2x64xf32> to vector<2x64xbf16>
    %c0_165 = arith.constant 0 : index
    %c0_166 = arith.constant 0 : index
    %513 = vector.load %arg7[%c0_165, %c0_166] : memref<64x10xbf16, #tpu.memory_space<vmem>>, vector<64x10xbf16>
    %cst_167 = arith.constant dense<0.000000e+00> : vector<2x10xf32>
    %514 = tpu.matmul %512, %513, %cst_167 {dimension_numbers = #tpu.dot_dimension_numbers<[1], [0], [0], [1], [0, 0, 1, 1], [], []>} : vector<2x64xbf16>, vector<64x10xbf16>, vector<2x10xf32> -> vector<2x10xf32>
    %c0_168 = arith.constant 0 : index
    %c0_169 = arith.constant 0 : index
    %515 = vector.load %arg8[%c0_168, %c0_169] : memref<1x10xf32, #tpu.memory_space<vmem>>, vector<1x10xf32>
    %516 = vector.broadcast %515 : vector<1x10xf32> to vector<2x10xf32>
    %517 = arith.addf %514, %516 : vector<2x10xf32>
    %c0_170 = arith.constant 0 : index
    %c0_171 = arith.constant 0 : index
    %518 = vector.load %arg9[%c0_170, %c0_171] : memref<2x10xf32, #tpu.memory_space<vmem>>, vector<2x10xf32>
    tpu.vector_store %arg9[%c0_170, %c0_171], %517 {strides = array<i32>} : memref<2x10xf32, #tpu.memory_space<vmem>>, vector<2x10xf32>,
    return
  }
}

</mosaic_0001>

<bundles_post_ra>
// kernel: tpu_custom_call.1
= control target key start
LH: loop header
LB: loop body
LE: loop exit
PB: predicated region body
PF: predicated region fallthrough
CT: control target
= control target key end

     0   :  { %vm360_vm0 = vcmask 1043456   ;;  %vm263_vm1 = vcmask 64512   ;;  %s7713_s0 = inlined_call_operand.vmem [shape: bf16[512,8], index: 0, kind: input, shape index: {}]   ;;  %s7714_s1 = inlined_call_operand.vmem [shape: bf16[8,48], index: 1, kind: input, shape index: {}]   ;;  %s7715_s2 = inlined_call_operand.vmem [shape: f32[1,48], index: 2, kind: input, shape index: {}]   ;;  %s7716_s3 = inlined_call_operand.vmem [shape: f32[9,48], index: 3, kind: input, shape index: {}]   ;;  %s7717_s4 = inlined_call_operand.vmem [shape: f32[1,48], index: 4, kind: input, shape index: {}]   ;;  %s7718_s5 = inlined_call_operand.vmem [shape: bf16[48,64], index: 5, kind: input, shape index: {}]   ;;  %s7719_s6 = inlined_call_operand.vmem [shape: f32[1,64], index: 6, kind: input, shape index: {}]   ;;  %s7720_s7 = inlined_call_operand.vmem [shape: bf16[64,10], index: 7, kind: input, shape index: {}]   ;;  %s7721_s8 = inlined_call_operand.vmem [shape: f32[1,10], index: 8, kind: input, shape index: {}]   ;;  %s7722_s9 = inlined_call_operand.hbm [shape: f32[2,10], index: 9, kind: output, shape index: {}]  }
   0x1   :  { %v98_v0 = vld [vmem:[%s7714_s1] sm:$0xf] }
   0x2   :  { %v3802_v1 = vld [vmem:[%s7713_s0] sm:$0xff]  ;;  %v362_v2 = vsel %vm360_vm0, %v98_v0, 0 }
   0x3   :  { %371 = vmatpush.bf16.msra.mxu0 %v362_v2  ;;  %3841 = vmatpush.bf16.msra.mxu1 %v362_v2 }
   0x4   :  { %3842 = vmatpush.bf16.msra.mxu3 %v362_v2 }
   0x6   :  { %3709 = vmatmul.msk.bf16.vlgmr.msra.gmra.mxu0 %vm263_vm1, %v3802_v1 }
   0x7   :  { %14 = vsyncpa [#allocation4], 0  ;;  %v3803_v3 = vld [vmem:[%s7713_s0 + $0x8] sm:$0xff]  ;;  %v3804_v4 = vld [vmem:[%s7713_s0 + $0x10] sm:$0xff]  ;;  %vm661_vm2 = vcmask 392192   ;;  %v7723_v13 = vmov 0.0   ;;  %v732_v33 = vlaneseq }
   0x8   :  { %v3805_v5 = vld [vmem:[%s7713_s0 + $0x18] sm:$0xff]  ;;  %v3806_v6 = vld [vmem:[%s7713_s0 + $0x20] sm:$0xff]  ;;  %v3819_v7 = vld [vmem:[%s7713_s0 + $0x88] sm:$0xff]  ;;  %663 = vst.msk [vmem:[#allocation2 + $0x8] sm:$0xff] %vm661_vm2, %v7723_v13  ;;  %vm1222_vm13 = vcmask 523264   ;;  %vm3508_vm14 = vcmask 1040384  }
   0x9   :  { %3726 = vmatmul.msk.bf16.vlgmr.msra.gmra.mxu1 %vm263_vm1, %v3819_v7  ;;  %v3807_v8 = vld [vmem:[%s7713_s0 + $0x28] sm:$0xff]  ;;  %v3820_v9 = vld [vmem:[%s7713_s0 + $0x90] sm:$0xff]  ;;  %v3826_v11 = vld [vmem:[%s7713_s0 + $0xc0] sm:$0xff]  ;;  %662 = vst.msk [vmem:[#allocation2] sm:$0xff] %vm661_vm2, %v7723_v13  ;;  %v4104_v38 = vshrl.u32 %v732_v33, 7  ;;  %s3948_s18 = smov [#allocation3]  }
   0xa   :  { %v3808_v10 = vld [vmem:[%s7713_s0 + $0x30] sm:$0xff]  ;;  %3733 = vmatmul.msk.bf16.vlgmr.msra.gmra.mxu3 %vm263_vm1, %v3826_v11  ;;  %v3821_v12 = vld [vmem:[%s7713_s0 + $0x98] sm:$0xff]  ;;  %664 = vst.msk [vmem:[#allocation2 + $0x110] sm:$0xff] %vm661_vm2, %v7723_v13  ;;  %v3827_v15 = vld [vmem:[%s7713_s0 + $0xc8] sm:$0xff]  ;;  %s3570_s19 = sshll.u32 %s3948_s18, 4  ;;  %s3572_s21 = sshll.u32 %s7722_s9, 4  ;;  %s3571_s19 = int_to_ptr.vmem [resolvable:$true] %s3570_s19  ;;  %s3573_s21 = int_to_ptr.hbm [resolvable:$true] %s3572_s21 }
   0xb   :  { %665 = vst.msk [vmem:[#allocation2 + $0x118] sm:$0xff] %vm661_vm2, %v7723_v13  ;;  %v3809_v14 = vld [vmem:[%s7713_s0 + $0x38] sm:$0xff]  ;;  %v3822_v16 = vld [vmem:[%s7713_s0 + $0xa0] sm:$0xff]  ;;  %v3828_v21 = vld [vmem:[%s7713_s0 + $0xd0] sm:$0xff]  ;;  %v735_v44 = vadd.s32 16, %v4104_v38  ;;  %v734_v51 = vadd.s32 8, %v4104_v38 }
   0xc   :  { %666 = vst.msk [vmem:[#allocation2 + $0x220] sm:$0xff] %vm661_vm2, %v7723_v13  ;;  %v4073_v17 = vld [vmem:[%s7715_s2] ss:$0 sm:$0xff]  ;;  %v3823_v23 = vld [vmem:[%s7713_s0 + $0xa8] sm:$0xff]  ;;  %v3829_v32 = vld [vmem:[%s7713_s0 + $0xd8] sm:$0xff]  ;;  %vm911_vm3 = vcmp.lt.s32.totalorder %v4104_v38, 7 }
   0xd   :  { %667 = vst.msk [vmem:[#allocation2 + $0x228] sm:$0xff] %vm661_vm2, %v7723_v13  ;;  %v3810_v18 = vld [vmem:[%s7713_s0 + $0x40] sm:$0xff]  ;;  %v3811_v29 = vld [vmem:[%s7713_s0 + $0x48] sm:$0xff]  ;;  %v3824_v35 = vld [vmem:[%s7713_s0 + $0xb0] sm:$0xff]  ;;  %vm937_vm4 = vcmp.lt.s32.totalorder %v4104_v38, 1  ;;  %v759_v58 = vand.u32 15, %v735_v44 }
   0xe   :  { %v4109_v40 = vld [vmem:[%s7716_s3 + $0x1] ss:$0 sm:$0xff]  ;;  %v4121_v47 = vld [vmem:[%s7716_s3 + $0x4] ss:$0 sm:$0xff]  ;;  %v4142_v59 = vld [vmem:[%s7716_s3 + $0x2] ss:$0 sm:$0xff] }
   0xf   :  { %v887_v37 = vld [vmem:[#allocation2 + $0x8] sm:$0xff]  ;;  %v4148_v61 = vld [vmem:[%s7716_s3] ss:$0 sm:$0xff]  ;;  %v752_v2 = vand.u32 15, %v734_v51  ;;  %v3812_v7 = vld [vmem:[%s7713_s0 + $0x50] sm:$0xff]  ;;  %vm839_vm5 = vcmp.gt.s32.totalorder %v759_v58, 0 }
  0x10   :  { %v4111_v41 = vld [vmem:[#allocation2] sm:$0xff]  ;;  %v930_v46 = vrot.slane %v887_v37, 7  ;;  %v904_v52 = vrot.slane %v887_v37, 1  ;;  %v3825_v33 = vld [vmem:[%s7713_s0 + $0xb8] sm:$0xff]  ;;  %v4252_v58 = vld [vmem:[%s7716_s3 + $0x8] ss:$0 sm:$0xff] }
  0x11   :  { %v903_v42 = vrot.slane %v4111_v41, 1  ;;  %v929_v48 = vrot.slane %v4111_v41, 7  ;;  %v895_v53 = vmul.f32 %v4109_v40, %v4111_v41  ;;  %vm4193_vm6 = vcmp.lt.s32.totalorder %v752_v2, 15 }
  0x12   :  { %vm3563_vm15 = vcmask 74752  }
  0x13   :  { %v918_v57 = vsel %vm911_vm3, %v903_v42, %v904_v52  ;;  %v944_v62 = vsel %vm937_vm4, %v929_v48, %v930_v46 }
  0x16   :  { %3710 = vmatmul.msk.bf16.gmra.mxu0 %vm263_vm1, %v3803_v3 }
  0x19   :  { %3727 = vmatmul.msk.bf16.gmra.mxu1 %vm263_vm1, %v3820_v9 }
  0x1a   :  { %3734 = vmatmul.msk.bf16.gmra.mxu3 %vm263_vm1, %v3827_v15 }
  0x26   :  { %3711 = vmatmul.msk.bf16.gmra.mxu0 %vm263_vm1, %v3804_v4  ;;  %v4161_v4 = vld [vmem:[%s7716_s3 + $0x5] ss:$0 sm:$0xff] }
  0x29   :  { %3728 = vmatmul.msk.bf16.gmra.mxu1 %vm263_vm1, %v3821_v12  ;;  %v948_v12 = vmul.f32 %v4148_v61, %v944_v62 }
  0x2a   :  { %3735 = vmatmul.msk.bf16.gmra.mxu3 %vm263_vm1, %v3828_v21 }
  0x36   :  { %3712 = vmatmul.msk.bf16.gmra.mxu0 %vm263_vm1, %v3805_v5  ;;  %v896_v5 = vmul.f32 %v4109_v40, %v887_v37  ;;  %v4229_v37 = vsel %vm4193_vm6, 1.0, %v7723_v13 }
  0x37   :  { %7920 = vst [vmem:[#allocation7_spill] sm:$0xff] %v4229_v37 }
  0x39   :  { %3729 = vmatmul.msk.bf16.gmra.mxu1 %vm263_vm1, %v3822_v16 }
  0x3a   :  { %3736 = vmatmul.msk.bf16.gmra.mxu3 %vm263_vm1, %v3829_v32 }
  0x46   :  { %3713 = vmatmul.msk.bf16.gmra.mxu0 %vm263_vm1, %v3806_v6  ;;  %v921_v6 = vmul.f32 %v4142_v59, %v918_v57 }
  0x49   :  { %3730 = vmatmul.msk.bf16.gmra.mxu1 %vm263_vm1, %v3823_v23  ;;  %v3830_v23 = vld [vmem:[%s7713_s0 + $0xe0] sm:$0xff] }
  0x4a   :  { %3737 = vmatmul.msk.bf16.gmra.mxu3 %vm263_vm1, %v3830_v23 }
  0x56   :  { %3714 = vmatmul.msk.bf16.gmra.mxu0 %vm263_vm1, %v3807_v8 }
  0x59   :  { %3731 = vmatmul.msk.bf16.gmra.mxu1 %vm263_vm1, %v3824_v35 }
  0x66   :  { %3715 = vmatmul.msk.bf16.gmra.mxu0 %vm263_vm1, %v3808_v10  ;;  %v4176_v10 = vld [vmem:[%s7716_s3 + $0x3] ss:$0 sm:$0xff] }
  0x69   :  { %3732 = vmatmul.msk.bf16.gmra.mxu1 %vm263_vm1, %v3825_v33 }
  0x76   :  { %3716 = vmatmul.msk.bf16.gmra.mxu0 %vm263_vm1, %v3809_v14 }
  0x83   :  { %v373_v19 = vpop.f32.mrf.mxu0 }
  0x84   :  { %v374_v20 = vadd.f32 %v4073_v17, %v373_v19 }
  0x86   :  { %v533_v22 = vmax.f32 %v374_v20, 0.0  ;;  %3717 = vmatmul.msk.bf16.gmra.mxu0 %vm263_vm1, %v3810_v18 }
  0x88   :  { %v597_v24 = vmin.f32 %v533_v22, 6.0 }
  0x8a   :  { %668 = vst.msk [vmem:[#allocation2 + $0x10] sm:$0xff] %vm661_vm2, %v597_v24  ;;  %v736_v24 = vadd.s32 24, %v4104_v38 }
  0x8b   :  { %v375_v25 = vpop.f32.mrf.mxu0 }
  0x8c   :  { %v376_v26 = vadd.f32 %v4073_v17, %v375_v25 }
  0x8e   :  { %v534_v27 = vmax.f32 %v376_v26, 0.0  ;;  %v737_v26 = vadd.s32 32, %v4104_v38 }
  0x90   :  { %v598_v28 = vmin.f32 %v534_v27, 6.0  ;;  %v773_v51 = vand.u32 15, %v737_v26 }
  0x91   :  { %v888_v39 = vld [vmem:[#allocation2 + $0x10] sm:$0xff] }
  0x92   :  { %669 = vst.msk [vmem:[#allocation2 + $0x18] sm:$0xff] %vm661_vm2, %v598_v28  ;;  %v4125_v50 = vrot.slane %v888_v39, 7  ;;  %v4132_v55 = vrot.slane %v888_v39, 1  ;;  %v958_v63 = vmul.f32 %v4121_v47, %v888_v39  ;;  %v897_v8 = vmul.f32 %v4109_v40, %v888_v39 }
  0x93   :  { %v378_v30 = vpop.f32.mrf.mxu0  ;;  %vm841_vm8 = vcmp.gt.s32.totalorder %v773_v51, 0 }
  0x94   :  { %v379_v31 = vadd.f32 %v4073_v17, %v378_v30  ;;  %v943_v1 = vsel %vm937_vm4, %v930_v46, %v4125_v50  ;;  %v917_v11 = vsel %vm911_vm3, %v904_v52, %v4132_v55  ;;  %v994_v18 = vadd.f32 %v958_v63, %v895_v53 }
  0x95   :  { %v4186_v16 = vmul.f32 %v4148_v61, %v943_v1  ;;  %v922_v32 = vmul.f32 %v4142_v59, %v917_v11  ;;  %v766_v46 = vand.u32 15, %v736_v24 }
  0x96   :  { %v535_v34 = vmax.f32 %v379_v31, 0.0  ;;  %3718 = vmatmul.msk.bf16.gmra.mxu0 %vm263_vm1, %v3811_v29  ;;  %v4207_v29 = vsel %vm839_vm5, 1.0, %v7723_v13  ;;  %v4213_v31 = vld [vmem:[%s7716_s3 + $0x7] ss:$0 sm:$0xff] }
  0x97   :  { %7919 = vst [vmem:[#allocation6_spill] sm:$0xff] %v4207_v29  ;;  %vm4273_vm7 = vcmp.lt.s32.totalorder %v766_v46, 15  ;;  %v3813_v46 = vld [vmem:[%s7713_s0 + $0x58] sm:$0xff] }
  0x98   :  { %v599_v36 = vmin.f32 %v535_v34, 6.0  ;;  %v4304_v33 = vsel %vm4273_vm7, 1.0, %v7723_v13 }
  0x99   :  { %v4116_v45 = vld [vmem:[#allocation2 + $0x18] sm:$0xff]  ;;  %7923 = vst [vmem:[#allocation8_spill] sm:$0xff] %v4304_v33 }
  0x9a   :  { %670 = vst.msk [vmem:[#allocation2 + $0x20] sm:$0xff] %vm661_vm2, %v599_v36  ;;  %v906_v56 = vrot.slane %v4116_v45, 1  ;;  %v932_v60 = vrot.slane %v4116_v45, 7  ;;  %v959_v27 = vmul.f32 %v4121_v47, %v4116_v45  ;;  %v898_v34 = vmul.f32 %v4109_v40, %v4116_v45 }
  0x9b   :  { %v380_v43 = vpop.f32.mrf.mxu0 }
  0x9c   :  { %v381_v49 = vadd.f32 %v4073_v17, %v380_v43  ;;  %v916_v9 = vsel %vm911_vm3, %v4132_v55, %v906_v56  ;;  %v942_v15 = vsel %vm937_vm4, %v4125_v50, %v932_v60  ;;  %v995_v52 = vadd.f32 %v959_v27, %v896_v5 }
  0x9d   :  { %v972_v25 = vmul.f32 %v4161_v4, %v916_v9  ;;  %v987_v30 = vmul.f32 %v4176_v10, %v942_v15  ;;  %v4223_v35 = vmul.f32 %v4142_v59, %v916_v9  ;;  %v950_v45 = vmul.f32 %v4148_v61, %v942_v15 }
  0x9e   :  { %v536_v54 = vmax.f32 %v381_v49, 0.0 }
  0x9f   :  { %v1002_v53 = vadd.f32 %v972_v25, %v921_v6 }
  0xa0   :  { %v600_v0 = vmin.f32 %v536_v54, 6.0  ;;  %v4245_v54 = vld [vmem:[%s7718_s5 + $0x10] sm:$0xff] }
  0xa1   :  { %v890_v3 = vld [vmem:[#allocation2 + $0x20] sm:$0xff]  ;;  %3843 = vmatpush.bf16.msra.mxu2 %v4245_v54  ;;  %1182 = vmatpush.bf16.msrb.mxu1 %v4245_v54 }
  0xa2   :  { %671 = vst.msk [vmem:[#allocation2 + $0x28] sm:$0xff] %vm661_vm2, %v600_v0  ;;  %v4189_v20 = vrot.slane %v890_v3, 1  ;;  %v4191_v21 = vrot.slane %v890_v3, 7  ;;  %v960_v36 = vmul.f32 %v4121_v47, %v890_v3  ;;  %v1021_v62 = vmul.f32 %v4213_v31, %v890_v3  ;;  %1829 = vmatpush.bf16.msrb.mxu3 %v4245_v54 }
  0xa3   :  { %v383_v14 = vpop.f32.mrf.mxu0  ;;  %v4260_v5 = vmul.f32 %v4109_v40, %v890_v3 }
  0xa4   :  { %v384_v19 = vadd.f32 %v4073_v17, %v383_v14  ;;  %v915_v43 = vsel %vm911_vm3, %v906_v56, %v4189_v20  ;;  %v941_v44 = vsel %vm937_vm4, %v932_v60, %v4191_v21  ;;  %v1011_v60 = vadd.f32 %v987_v30, %v948_v12  ;;  %v4282_v12 = vld [vmem:[%s7716_s3 + $0x6] ss:$0 sm:$0xff] }
  0xa5   :  { %v973_v0 = vmul.f32 %v4161_v4, %v915_v43  ;;  %v988_v1 = vmul.f32 %v4176_v10, %v941_v44  ;;  %v4257_v2 = vadd.f32 %v960_v36, %v897_v8  ;;  %v4268_v9 = vmul.f32 %v4142_v59, %v915_v43 }
  0xa6   :  { %v537_v28 = vmax.f32 %v384_v19, 0.0  ;;  %3719 = vmatmul.msk.bf16.gmra.mxu0 %vm263_vm1, %v3812_v7  ;;  %v4286_v14 = vmul.f32 %v4148_v61, %v941_v44  ;;  %v4291_v19 = vld [vmem:[%s7718_s5 + $0x8] sm:$0xff]  ;;  %v1057_v24 = vadd.f32 %v1021_v62, %v994_v18  ;;  %v4307_v36 = vsel %vm841_vm8, 1.0, %v7723_v13 }
  0xa7   :  { %v1012_v27 = vadd.f32 %v988_v1, %v4186_v16  ;;  %3844 = vmatpush.bf16.msra.mxu2 %v4291_v19  ;;  %7924 = vst [vmem:[#allocation9_spill] sm:$0xff] %v4307_v36  ;;  %1183 = vmatpush.bf16.msrb.mxu1 %v4291_v19 }
  0xa8   :  { %v601_v39 = vmin.f32 %v537_v28, 6.0  ;;  %v1003_v28 = vadd.f32 %v973_v0, %v922_v32  ;;  %1830 = vmatpush.bf16.msrb.mxu3 %v4291_v19 }
  0xa9   :  { %v4239_v49 = vld [vmem:[#allocation2 + $0x28] sm:$0xff] }
  0xaa   :  { %672 = vst.msk [vmem:[#allocation2 + $0x30] sm:$0xff] %vm661_vm2, %v601_v39  ;;  %v908_v56 = vrot.slane %v4239_v49, 1  ;;  %v934_v57 = vrot.slane %v4239_v49, 7  ;;  %v961_v3 = vmul.f32 %v4121_v47, %v4239_v49  ;;  %v1022_v22 = vmul.f32 %v4213_v31, %v4239_v49 }
  0xab   :  { %v385_v63 = vpop.f32.mrf.mxu0  ;;  %v4311_v18 = vmul.f32 %v4109_v40, %v4239_v49 }
  0xac   :  { %v386_v6 = vadd.f32 %v4073_v17, %v385_v63  ;;  %v914_v7 = vsel %vm911_vm3, %v4189_v20, %v908_v56  ;;  %v940_v11 = vsel %vm937_vm4, %v4191_v21, %v934_v57  ;;  %v4315_v43 = vadd.f32 %v961_v3, %v898_v34  ;;  %v4332_v34 = vld [vmem:[%s7718_s5] sm:$0xff] }
  0xad   :  { %v1035_v23 = vmul.f32 %v4252_v58, %v914_v7  ;;  %v974_v25 = vmul.f32 %v4161_v4, %v914_v7  ;;  %v989_v26 = vmul.f32 %v4176_v10, %v940_v11  ;;  %v4319_v16 = vmul.f32 %v4142_v59, %v914_v7  ;;  %3845 = vmatpush.bf16.msra.mxu2 %v4332_v34 }
  0xae   :  { %v538_v15 = vmax.f32 %v386_v6, 0.0  ;;  %v4322_v32 = vmul.f32 %v4148_v61, %v940_v11  ;;  %v1050_v44 = vmul.f32 %v4282_v12, %v940_v11  ;;  %v4336_v62 = vadd.f32 %v1022_v22, %v995_v52  ;;  %1184 = vmatpush.bf16.msrb.mxu1 %v4332_v34  ;;  %1831 = vmatpush.bf16.msrb.mxu3 %v4332_v34 }
  0xaf   :  { %v1065_v63 = vadd.f32 %v1035_v23, %v1002_v53  ;;  %v4340_v1 = vadd.f32 %v974_v25, %v4223_v35  ;;  %v4342_v6 = vadd.f32 %v989_v26, %v950_v45  ;;  %v738_v11 = vadd.s32 40, %v4104_v38  ;;  %v3831_v45 = vld [vmem:[%s7713_s0 + $0xe8] sm:$0xff] }
  0xb0   :  { %v602_v30 = vmin.f32 %v538_v15, 6.0  ;;  %v1074_v23 = vadd.f32 %v1050_v44, %v1011_v60  ;;  %3738 = vmatmul.msk.bf16.gmra.mxu3 %vm263_vm1, %v3831_v45 }
  0xb1   :  { %v4313_v39 = vld [vmem:[#allocation2 + $0x30] sm:$0xff]  ;;  %v780_v22 = vand.u32 15, %v738_v11  ;;  %1506 = vmatpush.bf16.msrb.mxu2 %v4245_v54  ;;  %v4365_v26 = vadd.f32 %v1065_v63, %v1057_v24 }
  0xb2   :  { %673 = vst.msk [vmem:[#allocation2 + $0x38] sm:$0xff] %vm661_vm2, %v602_v30  ;;  %v909_v49 = vrot.slane %v4313_v39, 1  ;;  %v935_v51 = vrot.slane %v4313_v39, 7  ;;  %v1023_v7 = vmul.f32 %v4213_v31, %v4313_v39  ;;  %v962_v35 = vmul.f32 %v4121_v47, %v4313_v39  ;;  %2152 = vmatpush.bf16.msra.mxu1 %v4245_v54  ;;  %2799 = vmatpush.bf16.msra.mxu3 %v4245_v54 }
  0xb3   :  { %v388_v0 = vpop.f32.mrf.mxu0  ;;  %vm858_vm9 = vcmp.lt.s32.totalorder %v780_v22, 15  ;;  %v4372_v60 = vmul.f32 %v4109_v40, %v4313_v39  ;;  %v739_v39 = vadd.s32 48, %v4104_v38 }
  0xb4   :  { %v389_v8 = vadd.f32 %v4073_v17, %v388_v0  ;;  %v913_v52 = vsel %vm911_vm3, %v908_v56, %v909_v49  ;;  %v939_v53 = vsel %vm937_vm4, %v934_v57, %v935_v51  ;;  %v1059_v30 = vadd.f32 %v1023_v7, %v4257_v2 }
  0xb5   :  { %v975_v3 = vmul.f32 %v4161_v4, %v913_v52  ;;  %v1051_v15 = vmul.f32 %v4282_v12, %v939_v53  ;;  %v990_v57 = vmul.f32 %v4176_v10, %v939_v53  ;;  %v1036_v25 = vmul.f32 %v4252_v58, %v913_v52  ;;  %1507 = vmatpush.bf16.msrb.mxu2 %v4291_v19 }
  0xb6   :  { %v539_v56 = vmax.f32 %v389_v8, 0.0  ;;  %3720 = vmatmul.msk.bf16.gmra.mxu0 %vm263_vm1, %v3813_v46  ;;  %v4376_v46 = vmul.f32 %v4142_v59, %v913_v52  ;;  %v4379_v24 = vadd.f32 %v962_v35, %v4260_v5  ;;  %v4390_v7 = vmul.f32 %v4148_v61, %v939_v53  ;;  %2153 = vmatpush.bf16.msra.mxu1 %v4291_v19 }
  0xb7   :  { %v1075_v0 = vadd.f32 %v1051_v15, %v1012_v27  ;;  %v1066_v63 = vadd.f32 %v1036_v25, %v1003_v28  ;;  %v4383_v2 = vadd.f32 %v975_v3, %v4268_v9  ;;  %v4386_v27 = vsel %vm858_vm9, 1.0, %v7723_v13  ;;  %2800 = vmatpush.bf16.msra.mxu3 %v4291_v19  ;;  %v4439_v13 = vld [vmem:[%s7717_s4] ss:$0 sm:$0xff] }
  0xb8   :  { %v603_v44 = vmin.f32 %v539_v56, 6.0  ;;  %7925 = vst [vmem:[#allocation10_spill] sm:$0xff] %v4386_v27  ;;  %v4396_v52 = vadd.f32 %v990_v57, %v4286_v14  ;;  %v787_v53 = vand.u32 15, %v739_v39 }
  0xb9   :  { %v893_v11 = vld [vmem:[#allocation2 + $0x38] sm:$0xff]  ;;  %v1099_v35 = vmul.f32 %v1075_v0, %v4207_v29  ;;  %v1082_v3 = vmul.f32 %v1066_v63, %v4229_v37  ;;  %1508 = vmatpush.bf16.msrb.mxu2 %v4332_v34 }
  0xba   :  { %674 = vst.msk [vmem:[#allocation2 + $0x40] sm:$0xff] %vm661_vm2, %v603_v44  ;;  %v910_v5 = vrot.slane %v893_v11, 1  ;;  %v936_v28 = vrot.slane %v893_v11, 7  ;;  %v1024_v8 = vmul.f32 %v4213_v31, %v893_v11  ;;  %v963_v45 = vmul.f32 %v4121_v47, %v893_v11  ;;  %2154 = vmatpush.bf16.msra.mxu1 %v4332_v34 }
  0xbb   :  { %v390_v9 = vpop.f32.mrf.mxu0  ;;  %v4412_v56 = vmul.f32 %v4109_v40, %v893_v11  ;;  %v1090_v11 = vadd.f32 %v1082_v3, %v4336_v62  ;;  %2801 = vmatpush.bf16.msra.mxu3 %v4332_v34  ;;  %vm4459_vm10 = vcmp.gt.s32.totalorder %v787_v53, 0 }
  0xbc   :  { %v391_v15 = vadd.f32 %v4073_v17, %v390_v9  ;;  %v4405_v22 = vsel %vm911_vm3, %v909_v49, %v910_v5  ;;  %v4409_v14 = vsel %vm937_vm4, %v935_v51, %v936_v28  ;;  %v4425_v44 = vadd.f32 %v1024_v8, %v4315_v43 }
  0xbd   :  { %v1037_v57 = vmul.f32 %v4252_v58, %v4405_v22  ;;  %v1052_v25 = vmul.f32 %v4282_v12, %v4409_v14  ;;  %v976_v0 = vmul.f32 %v4161_v4, %v4405_v22  ;;  %v991_v49 = vmul.f32 %v4176_v10, %v4409_v14 }
  0xbe   :  { %v540_v51 = vmax.f32 %v391_v15, 0.0  ;;  %v945_v63 = vsel %vm937_vm4, %v936_v28, %v929_v48  ;;  %v4442_v43 = vadd.f32 %v963_v45, %v4311_v18 }
  0xbf   :  { %v1067_v39 = vadd.f32 %v1037_v57, %v4340_v1  ;;  %v4434_v9 = vadd.f32 %v1052_v25, %v4342_v6  ;;  %v4445_v8 = vadd.f32 %v976_v0, %v4319_v16  ;;  %v4449_v62 = vadd.f32 %v991_v49, %v4322_v32  ;;  %v3814_v32 = vld [vmem:[%s7713_s0 + $0x60] sm:$0xff] }
  0xc0   :  { %v604_v48 = vmin.f32 %v540_v51, 6.0  ;;  %v745_v1 = vand.u32 15, %v4104_v38  ;;  %v1106_v6 = vadd.f32 %v1090_v11, %v1074_v23  ;;  %v4456_v18 = vmul.f32 %v4148_v61, %v945_v63 }
  0xc1   :  { %v4453_v3 = vld [vmem:[#allocation2 + $0x40] sm:$0xff]  ;;  %v1091_v15 = vadd.f32 %v1067_v39, %v1059_v30  ;;  %v740_v16 = vadd.s32 56, %v4104_v38  ;;  %v919_v51 = vsel %vm911_vm3, %v910_v5, %v903_v42  ;;  %v3832_v42 = vld [vmem:[%s7713_s0 + $0xf0] sm:$0xff] }
  0xc2   :  { %675 = vst.msk [vmem:[#allocation2 + $0x48] sm:$0xff] %vm661_vm2, %v604_v48  ;;  %v4468_v23 = vrot.slane %v4453_v3, 1  ;;  %v4471_v30 = vrot.slane %v4453_v3, 7  ;;  %v1025_v57 = vmul.f32 %v4213_v31, %v4453_v3  ;;  %vm837_vm11 = vcmp.gt.s32.totalorder %v745_v1, 0  ;;  %3739 = vmatmul.msk.bf16.gmra.mxu3 %vm263_vm1, %v3832_v42 }
  0xc3   :  { %v393_v53 = vpop.f32.mrf.mxu0  ;;  %v1107_v25 = vadd.f32 %v1099_v35, %v1091_v15  ;;  %v1117_v0 = vadd.f32 %v4439_v13, %v1106_v6  ;;  %v794_v49 = vand.u32 15, %v740_v16  ;;  %v7930_v48 = vmov 0.0  }
  0xc4   :  { %7928 = vst [vmem:[#allocation11_spill] sm:$0xff] %v4468_v23  ;;  %v394_v63 = vadd.f32 %v4073_v17, %v393_v53  ;;  %v969_v11 = vsel %vm911_vm3, %v910_v5, %v4468_v23  ;;  %v983_v39 = vsel %vm937_vm4, %v936_v28, %v4471_v30  ;;  %v4488_v35 = vsel %vm837_vm11, 1.0, %v7930_v48 }
  0xc5   :  { %7929 = vst [vmem:[#allocation12_spill] sm:$0xff] %v4471_v30  ;;  %v1038_v1 = vmul.f32 %v4252_v58, %v969_v11  ;;  %v1118_v41 = vadd.f32 %v4439_v13, %v1107_v25  ;;  %v977_v6 = vmul.f32 %v4161_v4, %v969_v11  ;;  %v1053_v15 = vmul.f32 %v4282_v12, %v983_v39 }
  0xc6   :  { %7931 = vst [vmem:[#allocation13_spill] sm:$0xff] %v4488_v35  ;;  %v541_v5 = vmax.f32 %v394_v63, 0.0  ;;  %3721 = vmatmul.msk.bf16.gmra.mxu0 %vm263_vm1, %v3814_v32  ;;  %v1061_v28 = vadd.f32 %v1025_v57, %v4379_v24  ;;  %v1125_v16 = vmax.f32 %v1117_v0, 0.0  ;;  %vm860_vm12 = vcmp.lt.s32.totalorder %v794_v49, 15  ;;  %v458_v63 = vpop.f32.mrf.mxu1 }
  0xc7   :  { %v1068_v53 = vadd.f32 %v1038_v1, %v4383_v2  ;;  %v1126_v29 = vmax.f32 %v1118_v41, 0.0  ;;  %v1077_v25 = vadd.f32 %v1053_v15, %v4396_v52  ;;  %v4505_v11 = vsel %vm4459_vm10, 1.0, %v7930_v48 }
  0xc8   :  { %7932 = vst [vmem:[#allocation14_spill] sm:$0xff] %v4505_v11  ;;  %v605_v37 = vmin.f32 %v541_v5, 6.0  ;;  %v4508_v32 = vadd.f32 %v977_v6, %v4376_v46  ;;  %v4510_v24 = vmin.f32 %v1125_v16, 6.0  ;;  %v4513_v57 = vsel %vm860_vm12, 1.0, %v7930_v48 }
  0xc9   :  { %7933 = vst [vmem:[#allocation15_spill] sm:$0xff] %v4513_v57  ;;  %v1084_v2 = vmul.f32 %v1068_v53, %v4304_v33  ;;  %v4516_v0 = vmin.f32 %v1126_v29, 6.0  ;;  %v4518_v52 = vld [vmem:[#allocation2 + $0x48] sm:$0xff]  ;;  %v1101_v45 = vmul.f32 %v1077_v25, %v4307_v36  ;;  %v927_v49 = vmul.f32 %v4142_v59, %v4405_v22 }
  0xca   :  { %676 = vst.msk [vmem:[#allocation2 + $0x50] sm:$0xff] %vm661_vm2, %v605_v37  ;;  %v459_v46 = vadd.f32 %v4073_v17, %v458_v63  ;;  %v967_v1 = vrot.slane %v4518_v52, 1  ;;  %v4527_v48 = vrot.slane %v4518_v52, 7  ;;  %v928_v41 = vmul.f32 %v4142_v59, %v919_v51 }
  0xcb   :  { %v395_v29 = vpop.f32.mrf.mxu0  ;;  %v1092_v42 = vadd.f32 %v1084_v2, %v4425_v44  ;;  %v1026_v6 = vmul.f32 %v4213_v31, %v4518_v52  ;;  %v954_v22 = vmul.f32 %v4148_v61, %v4409_v14  ;;  %v964_v37 = vmul.f32 %v4121_v47, %v4453_v3 }
  0xcc   :  { %v396_v15 = vadd.f32 %v4073_v17, %v395_v29  ;;  %v567_v5 = vmax.f32 %v459_v46, 0.0  ;;  %v4541_v16 = vsel %vm911_vm3, %v4468_v23, %v967_v1  ;;  %v4547_v44 = vsel %vm937_vm4, %v4471_v30, %v4527_v48 }
  0xcd   :  { %v1108_v51 = vadd.f32 %v1092_v42, %v4434_v9  ;;  %v1039_v14 = vmul.f32 %v4252_v58, %v4541_v16  ;;  %v1054_v53 = vmul.f32 %v4282_v12, %v4547_v44  ;;  %v965_v25 = vmul.f32 %v4121_v47, %v4518_v52 }
  0xce   :  { %v542_v63 = vmax.f32 %v396_v15, 0.0  ;;  %v631_v2 = vmin.f32 %v567_v5, 6.0  ;;  %v984_v46 = vsel %vm937_vm4, %v4527_v48, %v4125_v50  ;;  %v970_v9 = vsel %vm911_vm3, %v967_v1, %v4132_v55 }
  0xcf   :  { %v1119_v29 = vadd.f32 %v4439_v13, %v1108_v51  ;;  %v1062_v42 = vadd.f32 %v1026_v6, %v4442_v43  ;;  %v1069_v23 = vadd.f32 %v1039_v14, %v4445_v8  ;;  %v986_v36 = vmul.f32 %v4176_v10, %v984_v46  ;;  %v3815_v6 = vld [vmem:[%s7713_s0 + $0x68] sm:$0xff] }
  0xd0   :  { %v606_v33 = vmin.f32 %v542_v63, 6.0  ;;  %702 = vst.msk [vmem:[#allocation2 + $0x130] sm:$0xff] %vm661_vm2, %v631_v2  ;;  %v978_v15 = vmul.f32 %v4161_v4, %v4541_v16  ;;  %v979_v50 = vmul.f32 %v4161_v4, %v970_v9  ;;  %v992_v5 = vmul.f32 %v4176_v10, %v983_v39  ;;  %v460_v63 = vpop.f32.mrf.mxu1 }
  0xd1   :  { %v1127_v30 = vmax.f32 %v1119_v29, 0.0  ;;  %v4572_v55 = vld [vmem:[#allocation2 + $0x50] sm:$0xff]  ;;  %v1078_v51 = vadd.f32 %v1054_v53, %v4449_v62  ;;  %v1093_v43 = vadd.f32 %v1069_v23, %v1061_v28  ;;  %v4576_v8 = vadd.f32 %v986_v36, %v4456_v18 }
  0xd2   :  { %677 = vst.msk [vmem:[#allocation2 + $0x58] sm:$0xff] %vm661_vm2, %v606_v33  ;;  %v4583_v14 = vrot.slane %v4572_v55, 1  ;;  %v993_v39 = vmul.f32 %v4176_v10, %v4547_v44  ;;  %v1000_v2 = vadd.f32 %v964_v37, %v4372_v60  ;;  %v4589_v62 = vadd.f32 %v965_v25, %v4412_v56 }
  0xd3   :  { %v398_v36 = vpop.f32.mrf.mxu0  ;;  %v1135_v18 = vmin.f32 %v1127_v30, 6.0  ;;  %v1109_v23 = vadd.f32 %v1101_v45, %v1093_v43  ;;  %v461_v33 = vadd.f32 %v4073_v17, %v460_v63  ;;  %v1008_v28 = vadd.f32 %v978_v15, %v927_v49 }
  0xd4   :  { %v399_v53 = vadd.f32 %v4073_v17, %v398_v36  ;;  %v1032_v46 = vsel %vm911_vm3, %v967_v1, %v4583_v14  ;;  %v1009_v9 = vadd.f32 %v979_v50, %v928_v41  ;;  %v1016_v29 = vadd.f32 %v992_v5, %v4390_v7 }
  0xd5   :  { %v1141_v60 = vpack.c.bf16 %v1135_v18, %v4516_v0  ;;  %v1040_v56 = vmul.f32 %v4252_v58, %v1032_v46  ;;  %v1120_v37 = vadd.f32 %v4439_v13, %v1109_v23  ;;  %v568_v30 = vmax.f32 %v461_v33, 0.0 }
  0xd6   :  { %v543_v45 = vmax.f32 %v399_v53, 0.0  ;;  %3722 = vmatmul.msk.bf16.gmra.mxu0 %vm263_vm1, %v3815_v6  ;;  %v1017_v49 = vadd.f32 %v993_v39, %v954_v22  ;;  %v1027_v25 = vmul.f32 %v4213_v31, %v4572_v55  ;;  %v4604_v15 = vrot.slane %v4572_v55, 7 }
  0xd7   :  { %3754 = vmatmul.msk.bf16.vlgmr.msra.gmra.mxu2 %vm661_vm2, %v1141_v60  ;;  %v1070_v7 = vadd.f32 %v1040_v56, %v4508_v32  ;;  %v1128_v0 = vmax.f32 %v1120_v37, 0.0  ;;  %v632_v1 = vmin.f32 %v568_v30, 6.0  ;;  %v4610_v41 = vmul.f32 %v4109_v40, %v4453_v3 }
  0xd8   :  { %v607_v50 = vmin.f32 %v543_v45, 6.0  ;;  %v4616_v22 = vsel %vm937_vm4, %v4527_v48, %v4604_v15  ;;  %v1063_v5 = vadd.f32 %v1027_v25, %v1000_v2  ;;  %v4620_v43 = vmul.f32 %v4109_v40, %v4518_v52  ;;  %2476 = vmatpush.bf16.msra.mxu2 %v4245_v54  ;;  %v463_v39 = vpop.f32.mrf.mxu1  ;;  %v3833_v2 = vld [vmem:[%s7713_s0 + $0xf8] sm:$0xff] }
  0xd9   :  { %v1086_v32 = vmul.f32 %v1070_v7, %v4386_v27  ;;  %v4624_v6 = vmin.f32 %v1128_v0, 6.0  ;;  %v4626_v3 = vld [vmem:[#allocation2 + $0x58] sm:$0xff]  ;;  %703 = vst.msk [vmem:[#allocation2 + $0x138] sm:$0xff] %vm661_vm2, %v632_v1  ;;  %v1055_v63 = vmul.f32 %v4282_v12, %v4616_v22  ;;  %v4633_v48 = vmul.f32 %v4142_v59, %v4541_v16  ;;  %3740 = vmatmul.msk.bf16.gmra.mxu3 %vm263_vm1, %v3833_v2 }
  0xda   :  { %678 = vst.msk [vmem:[#allocation2 + $0x60] sm:$0xff] %vm661_vm2, %v607_v50  ;;  %v4637_v52 = vrot.slane %v4626_v3, 7  ;;  %v1028_v36 = vmul.f32 %v4213_v31, %v4626_v3  ;;  %v1030_v18 = vrot.slane %v4626_v3, 1  ;;  %v4646_v23 = vmul.f32 %v4142_v59, %v1032_v46 }
  0xdb   :  { %v400_v16 = vpop.f32.mrf.mxu0  ;;  %v1094_v33 = vadd.f32 %v1086_v32, %v1062_v42  ;;  %v464_v53 = vadd.f32 %v4073_v17, %v463_v39  ;;  %v1079_v60 = vadd.f32 %v1055_v63, %v1016_v29  ;;  %v4651_v56 = vmul.f32 %v4148_v61, %v4547_v44 }
  0xdc   :  { %v401_v37 = vadd.f32 %v4073_v17, %v400_v16  ;;  %v1047_v30 = vsel %vm937_vm4, %v4637_v52, %v4191_v21  ;;  %v4662_v42 = vsel %vm911_vm3, %v4583_v14, %v1030_v18  ;;  %v1033_v46 = vsel %vm911_vm3, %v1030_v18, %v4189_v20  ;;  %2477 = vmatpush.bf16.msra.mxu2 %v4291_v19 }
  0xdd   :  { %v1110_v44 = vadd.f32 %v1094_v33, %v1078_v51  ;;  %v1049_v29 = vmul.f32 %v4282_v12, %v1047_v30  ;;  %v569_v45 = vmax.f32 %v464_v53, 0.0  ;;  %v1041_v25 = vmul.f32 %v4252_v58, %v4662_v42 }
  0xde   :  { %v544_v21 = vmax.f32 %v401_v37, 0.0  ;;  %v1042_v7 = vmul.f32 %v4252_v58, %v1033_v46  ;;  %v4676_v0 = vsel %vm937_vm4, %v4604_v15, %v4637_v52  ;;  %v1311_v20 = vmul.f32 %v4121_v47, %v4572_v55 }
  0xdf   :  { %v1121_v51 = vadd.f32 %v4439_v13, %v1110_v44  ;;  %v1073_v1 = vadd.f32 %v1049_v29, %v4576_v8  ;;  %v633_v50 = vmin.f32 %v569_v45, 6.0  ;;  %v1056_v32 = vmul.f32 %v4282_v12, %v4676_v0  ;;  %v3816_v8 = vld [vmem:[%s7713_s0 + $0x70] sm:$0xff] }
  0xe0   :  { %v608_v63 = vmin.f32 %v544_v21, 6.0  ;;  %v1064_v39 = vadd.f32 %v1028_v36, %v4589_v62  ;;  %v1071_v2 = vadd.f32 %v1041_v25, %v1008_v28  ;;  %v1072_v16 = vadd.f32 %v1042_v7, %v1009_v9  ;;  %2478 = vmatpush.bf16.msra.mxu2 %v4332_v34  ;;  %v465_v9 = vpop.f32.mrf.mxu1 }
  0xe1   :  { %v1129_v33 = vmax.f32 %v1121_v51, 0.0  ;;  %v1097_v53 = vmul.f32 %v1073_v1, %v4488_v35  ;;  %704 = vst.msk [vmem:[#allocation2 + $0x140] sm:$0xff] %vm661_vm2, %v633_v50  ;;  %v1080_v37 = vadd.f32 %v1056_v32, %v1017_v49  ;;  %v1103_v30 = vmul.f32 %v1079_v60, %v4505_v11  ;;  %v4688_v46 = vld [vmem:[#allocation2 + $0x60] sm:$0xff] }
  0xe2   :  { %679 = vst.msk [vmem:[#allocation2 + $0x68] sm:$0xff] %vm661_vm2, %v608_v63  ;;  %v1088_v62 = vmul.f32 %v1072_v16, %v4513_v57  ;;  %v1095_v28 = vadd.f32 %v1071_v2, %v1063_v5  ;;  %v4697_v36 = vrot.slane %v4688_v46, 1  ;;  %v1312_v49 = vmul.f32 %v4121_v47, %v4626_v3 }
  0xe3   :  { %v403_v60 = vpop.f32.mrf.mxu0  ;;  %v1137_v44 = vmin.f32 %v1129_v33, 6.0  ;;  %v1105_v29 = vadd.f32 %v1097_v53, %v4365_v26  ;;  %v466_v45 = vadd.f32 %v4073_v17, %v465_v9  ;;  %v1324_v25 = vmul.f32 %v4161_v4, %v4662_v42 }
  0xe4   :  { %v404_v21 = vadd.f32 %v4073_v17, %v403_v60  ;;  %v1096_v7 = vadd.f32 %v1088_v62, %v1064_v39  ;;  %v1111_v5 = vadd.f32 %v1103_v30, %v1095_v28  ;;  %v4709_v51 = vsel %vm911_vm3, %v1030_v18, %v4697_v36 }
  0xe5   :  { %v1142_v1 = vpack.c.bf16 %v1137_v44, %v4624_v6  ;;  %v1116_v50 = vadd.f32 %v4439_v13, %v1105_v29  ;;  %v570_v32 = vmax.f32 %v466_v45, 0.0  ;;  %v1325_v26 = vmul.f32 %v4161_v4, %v4709_v51  ;;  %v493_v29 = vpop.f32.mrf.mxu3 }
  0xe6   :  { %v545_v63 = vmax.f32 %v404_v21, 0.0  ;;  %3723 = vmatmul.msk.bf16.gmra.mxu0 %vm263_vm1, %v3816_v8  ;;  %v1112_v2 = vadd.f32 %v1096_v7, %v1080_v37  ;;  %v1122_v39 = vadd.f32 %v4439_v13, %v1111_v5  ;;  %v4718_v16 = vrot.slane %v4688_v46, 7 }
  0xe7   :  { %3755 = vmatmul.msk.bf16.gmra.mxu2 %vm661_vm2, %v1142_v1  ;;  %v1124_v18 = vmax.f32 %v1116_v50, 0.0  ;;  %v634_v33 = vmin.f32 %v570_v32, 6.0  ;;  %v1345_v6 = vadd.f32 %v1311_v20, %v4610_v41  ;;  %v1346_v53 = vadd.f32 %v1312_v49, %v4620_v43 }
  0xe8   :  { %v609_v30 = vmin.f32 %v545_v63, 6.0  ;;  %v1123_v62 = vadd.f32 %v4439_v13, %v1112_v2  ;;  %v1130_v28 = vmax.f32 %v1122_v39, 0.0  ;;  %v1338_v37 = vmul.f32 %v4176_v10, %v4676_v0  ;;  %v468_v49 = vpop.f32.mrf.mxu1 }
  0xe9   :  { %v1132_v8 = vmin.f32 %v1124_v18, 6.0  ;;  %705 = vst.msk [vmem:[#allocation2 + $0x148] sm:$0xff] %vm661_vm2, %v634_v33  ;;  %v4727_v9 = vld [vmem:[#allocation2 + $0x68] sm:$0xff]  ;;  %v1353_v60 = vadd.f32 %v1324_v25, %v4633_v48  ;;  %v4731_v44 = vadd.f32 %v1325_v26, %v4646_v23  ;;  %v1371_v41 = vmul.f32 %v4213_v31, %v4688_v46 }
  0xea   :  { %680 = vst.msk [vmem:[#allocation2 + $0x70] sm:$0xff] %vm661_vm2, %v609_v30  ;;  %v1131_v43 = vmax.f32 %v1123_v62, 0.0  ;;  %v4736_v20 = vmin.f32 %v1130_v28, 6.0  ;;  %v1266_v45 = vrot.slane %v4727_v9, 1  ;;  %v1290_v21 = vrot.slane %v4727_v9, 7 }
  0xeb   :  { %v405_v7 = vpop.f32.mrf.mxu0  ;;  %v1140_v48 = vpack.c.bf16 %v4510_v24, %v1132_v8  ;;  %v469_v23 = vadd.f32 %v4073_v17, %v468_v49  ;;  %v494_v25 = vadd.f32 %v4073_v17, %v493_v29  ;;  %v1372_v5 = vmul.f32 %v4213_v31, %v4727_v9 }
  0xec   :  { %v406_v1 = vadd.f32 %v4073_v17, %v405_v7  ;;  %v1139_v50 = vmin.f32 %v1131_v43, 6.0  ;;  %v4749_v32 = vsel %vm911_vm3, %v4697_v36, %v1266_v45  ;;  %v4754_v26 = vsel %vm937_vm4, %v4718_v16, %v1290_v21 }
  0xed   :  { %3753 = vmatmul.msk.bf16.vlgmr.msrb.gmra.mxu1 %vm661_vm2, %v1140_v48  ;;  %v571_v24 = vmax.f32 %v469_v23, 0.0  ;;  %v581_v63 = vmax.f32 %v494_v25, 0.0  ;;  %v1384_v2 = vmul.f32 %v4252_v58, %v4749_v32  ;;  %v1398_v39 = vmul.f32 %v4282_v12, %v4754_v26 }
  0xee   :  { %v546_v18 = vmax.f32 %v406_v1, 0.0  ;;  %v1143_v33 = vpack.c.bf16 %v1139_v50, %v4736_v20  ;;  %v1362_v30 = vadd.f32 %v1338_v37, %v4651_v56  ;;  %v1405_v62 = vadd.f32 %v1371_v41, %v1345_v6  ;;  %3122 = vmatpush.bf16.msrb.mxu1 %v4245_v54 }
  0xef   :  { %v635_v28 = vmin.f32 %v571_v24, 6.0  ;;  %v645_v8 = vmin.f32 %v581_v63, 6.0  ;;  %v4764_v43 = vadd.f32 %v1372_v5, %v1346_v53  ;;  %v1413_v49 = vadd.f32 %v1384_v2, %v1353_v60  ;;  %v495_v60 = vpop.f32.mrf.mxu3 }
  0xf0   :  { %v610_v29 = vmin.f32 %v546_v18, 6.0  ;;  %v4766_v7 = vadd.f32 %v1398_v39, %v1362_v30  ;;  %v1255_v48 = vmul.f32 %v4109_v40, %v4572_v55  ;;  %v1256_v23 = vmul.f32 %v4109_v40, %v4626_v3  ;;  %v3817_v3 = vld [vmem:[%s7713_s0 + $0x78] sm:$0xff]  ;;  %v470_v37 = vpop.f32.mrf.mxu1 }
  0xf1   :  { %706 = vst.msk [vmem:[#allocation2 + $0x150] sm:$0xff] %vm661_vm2, %v635_v28  ;;  %v4773_v56 = vld [vmem:[#allocation2 + $0x70] sm:$0xff]  ;;  %v4775_v6 = vadd.f32 %v1413_v49, %v1405_v62  ;;  %v1279_v54 = vmul.f32 %v4142_v59, %v4662_v42  ;;  %v1280_v53 = vmul.f32 %v4142_v59, %v4709_v51  ;;  %v4785_v55 = vsel %vm937_vm4, %v4637_v52, %v4718_v16 }
  0xf2   :  { %681 = vst.msk [vmem:[#allocation2 + $0x78] sm:$0xff] %vm661_vm2, %v610_v29  ;;  %v1267_v41 = vrot.slane %v4773_v56, 1  ;;  %v1291_v42 = vrot.slane %v4773_v56, 7  ;;  %v1303_v51 = vmul.f32 %v4148_v61, %v4616_v22  ;;  %v1313_v20 = vmul.f32 %v4121_v47, %v4688_v46  ;;  %3123 = vmatpush.bf16.msrb.mxu1 %v4291_v19 }
  0xf3   :  { %v408_v52 = vpop.f32.mrf.mxu0  ;;  %716 = vst.msk [vmem:[#allocation2 + $0x1a0] sm:$0xff] %vm661_vm2, %v645_v8  ;;  %v471_v25 = vadd.f32 %v4073_v17, %v470_v37  ;;  %v496_v5 = vadd.f32 %v4073_v17, %v495_v60  ;;  %v1304_v1 = vmul.f32 %v4148_v61, %v4676_v0  ;;  %v1314_v50 = vmul.f32 %v4121_v47, %v4727_v9 }
  0xf4   :  { %v409_v22 = vadd.f32 %v4073_v17, %v408_v52  ;;  %v4808_v24 = vsel %vm911_vm3, %v1266_v45, %v1267_v41  ;;  %v1326_v19 = vmul.f32 %v4161_v4, %v4749_v32  ;;  %v1339_v63 = vmul.f32 %v4176_v10, %v4785_v55 }
  0xf5   :  { %v572_v2 = vmax.f32 %v471_v25, 0.0  ;;  %v582_v39 = vmax.f32 %v496_v5, 0.0  ;;  %v1385_v0 = vmul.f32 %v4252_v58, %v4808_v24  ;;  %v1327_v47 = vmul.f32 %v4161_v4, %v4808_v24  ;;  %v4855_v25 = vld [vmem:[%s7715_s2] ss:$0 sm:$0xff] }
  0xf6   :  { %v547_v18 = vmax.f32 %v409_v22, 0.0  ;;  %3724 = vmatmul.msk.bf16.gmra.mxu0 %vm263_vm1, %v3817_v3  ;;  %v4821_v17 = vsel %vm937_vm4, %v1290_v21, %v1291_v42  ;;  %v1340_v45 = vmul.f32 %v4176_v10, %v4754_v26  ;;  %v1347_v30 = vadd.f32 %v1313_v20, %v1255_v48  ;;  %3124 = vmatpush.bf16.msrb.mxu1 %v4332_v34  ;;  %v7934_v10 = vld [vmem:[#allocation7_spill] sm:$0xff]  ;;  %v7935_v22 = vld [vmem:[#allocation12_spill] sm:$0xff] }
  0xf7   :  { %3756 = vmatmul.msk.bf16.gmra.mxu2 %vm661_vm2, %v1143_v33  ;;  %v636_v62 = vmin.f32 %v572_v2, 6.0  ;;  %v646_v28 = vmin.f32 %v582_v39, 6.0  ;;  %v1414_v8 = vadd.f32 %v1385_v0, %v4731_v44  ;;  %v1348_v4 = vadd.f32 %v1314_v50, %v1256_v23  ;;  %v498_v23 = vpop.f32.mrf.mxu3 }
  0xf8   :  { %v611_v49 = vmin.f32 %v547_v18, 6.0  ;;  %v1355_v29 = vadd.f32 %v1326_v19, %v1279_v54  ;;  %v4828_v3 = vadd.f32 %v1327_v47, %v1280_v53  ;;  %v1363_v37 = vadd.f32 %v1339_v63, %v1303_v51  ;;  %v473_v44 = vpop.f32.mrf.mxu1 }
  0xf9   :  { %707 = vst.msk [vmem:[#allocation2 + $0x158] sm:$0xff] %vm661_vm2, %v636_v62  ;;  %v4831_v21 = vld [vmem:[#allocation2 + $0x78] sm:$0xff]  ;;  %v1430_v48 = vmul.f32 %v1414_v8, %v7934_v10  ;;  %v1364_v60 = vadd.f32 %v1340_v45, %v1304_v1  ;;  %v1373_v34 = vmul.f32 %v4213_v31, %v4773_v56  ;;  %v1399_v33 = vmul.f32 %v4282_v12, %v4821_v17 }
  0xfa   :  { %682 = vst.msk [vmem:[#allocation2 + $0x80] sm:$0xff] %vm661_vm2, %v611_v49  ;;  %v4840_v54 = vrot.slane %v4831_v21, 7  ;;  %v4843_v53 = vrot.slane %v4831_v21, 1  ;;  %v1374_v51 = vmul.f32 %v4213_v31, %v4831_v21  ;;  %v4849_v20 = vmul.f32 %v4109_v40, %v4688_v46 }
  0xfb   :  { %v410_v52 = vpop.f32.mrf.mxu0  ;;  %717 = vst.msk [vmem:[#allocation2 + $0x1a8] sm:$0xff] %vm661_vm2, %v646_v28  ;;  %v474_v5 = vadd.f32 %v4855_v25, %v473_v44  ;;  %v499_v1 = vadd.f32 %v4855_v25, %v498_v23  ;;  %v1438_v50 = vadd.f32 %v1430_v48, %v4764_v43  ;;  %v4862_v31 = vmul.f32 %v4109_v40, %v4727_v9 }
  0xfc   :  { %v411_v46 = vadd.f32 %v4855_v25, %v410_v52  ;;  %v1300_v19 = vsel %vm937_vm4, %v4840_v54, %v7935_v22  ;;  %v4872_v63 = vsel %vm911_vm3, %v1267_v41, %v4843_v53  ;;  %v4877_v43 = vsel %vm937_vm4, %v1291_v42, %v4840_v54 }
  0xfd   :  { %v573_v2 = vmax.f32 %v474_v5, 0.0  ;;  %v583_v40 = vmax.f32 %v499_v1, 0.0  ;;  %v1454_v9 = vadd.f32 %v1438_v50, %v4766_v7  ;;  %v1407_v39 = vadd.f32 %v1373_v34, %v1347_v30  ;;  %v7936_v34 = vld [vmem:[#allocation6_spill] sm:$0xff] }
  0xfe   :  { %v548_v0 = vmax.f32 %v411_v46, 0.0  ;;  %v4881_v47 = vmul.f32 %v4148_v61, %v1300_v19  ;;  %v1386_v18 = vmul.f32 %v4252_v58, %v4872_v63  ;;  %v1400_v41 = vmul.f32 %v4282_v12, %v4877_v43  ;;  %v4926_v46 = vld [vmem:[%s7716_s3 + $0x4] ss:$0 sm:$0xff] }
  0xff   :  { %v637_v45 = vmin.f32 %v573_v2, 6.0  ;;  %v647_v62 = vmin.f32 %v583_v40, 6.0  ;;  %v1462_v42 = vadd.f32 %v4439_v13, %v1454_v9  ;;  %v1423_v28 = vadd.f32 %v1399_v33, %v1363_v37  ;;  %v500_v37 = vpop.f32.mrf.mxu3 }
 0x100   :  { %v612_v8 = vmin.f32 %v548_v0, 6.0  ;;  %v4888_v49 = vadd.f32 %v1374_v51, %v1348_v4  ;;  %v1415_v7 = vadd.f32 %v1386_v18, %v1355_v29  ;;  %v4890_v30 = vadd.f32 %v1400_v41, %v1364_v60  ;;  %v3818_v4 = vld [vmem:[%s7713_s0 + $0x80] sm:$0xff]  ;;  %v475_v29 = vpop.f32.mrf.mxu1 }
 0x101   :  { %708 = vst.msk [vmem:[#allocation2 + $0x160] sm:$0xff] %vm661_vm2, %v637_v45  ;;  %v1470_v61 = vmax.f32 %v1462_v42, 0.0  ;;  %v4893_v48 = vld [vmem:[#allocation2 + $0x80] sm:$0xff]  ;;  %v1447_v44 = vmul.f32 %v1423_v28, %v7936_v34  ;;  %v1281_v23 = vmul.f32 %v4142_v59, %v4749_v32  ;;  %v1282_v52 = vmul.f32 %v4142_v59, %v4808_v24 }
 0x102   :  { %683 = vst.msk [vmem:[#allocation2 + $0x88] sm:$0xff] %vm661_vm2, %v612_v8  ;;  %v4905_v60 = vrot.slane %v4893_v48, 1  ;;  %v1439_v33 = vadd.f32 %v1415_v7, %v1407_v39  ;;  %v4910_v51 = vld [vmem:[%s7716_s3] ss:$0 sm:$0xff]  ;;  %v476_v5 = vadd.f32 %v4855_v25, %v475_v29  ;;  %v501_v1 = vadd.f32 %v4855_v25, %v500_v37  ;;  %v4941_v0 = vld [vmem:[%s7716_s3 + $0x5] ss:$0 sm:$0xff] }
 0x103   :  { %v1305_v59 = vmul.f32 %v4910_v51, %v4785_v55  ;;  %v4916_v32 = vmul.f32 %v4910_v51, %v4754_v26  ;;  %v413_v24 = vpop.f32.mrf.mxu0  ;;  %718 = vst.msk [vmem:[#allocation2 + $0x1b0] sm:$0xff] %vm661_vm2, %v647_v62  ;;  %v4921_v50 = vmin.f32 %v1470_v61, 6.0  ;;  %v1315_v55 = vmul.f32 %v4926_v46, %v4773_v56  ;;  %v4955_v7 = vld [vmem:[%s7716_s3 + $0x3] ss:$0 sm:$0xff] }
 0x104   :  { %7937 = vst [vmem:[#allocation12_spill] sm:$0xff] %v4905_v60  ;;  %v414_v26 = vadd.f32 %v4855_v25, %v413_v24  ;;  %v1322_v22 = vsel %vm911_vm3, %v4843_v53, %v4905_v60  ;;  %v1455_v19 = vadd.f32 %v1447_v44, %v1439_v33  ;;  %v1316_v2 = vmul.f32 %v4926_v46, %v4831_v21  ;;  %v7939_v33 = vld [vmem:[#allocation8_spill] sm:$0xff] }
 0x105   :  { %v574_v40 = vmax.f32 %v476_v5, 0.0  ;;  %v584_v9 = vmax.f32 %v501_v1, 0.0  ;;  %v1387_v39 = vmul.f32 %v4252_v58, %v1322_v22  ;;  %v1328_v18 = vmul.f32 %v4941_v0, %v4872_v63 }
 0x106   :  { %v549_v41 = vmax.f32 %v414_v26, 0.0  ;;  %3725 = vmatmul.msk.bf16.gmra.mxu0 %vm263_vm1, %v3818_v4  ;;  %v1463_v45 = vadd.f32 %v4439_v13, %v1455_v19  ;;  %v1329_v62 = vmul.f32 %v4941_v0, %v1322_v22  ;;  %v4949_v42 = vrot.slane %v4893_v48, 7 }
 0x107   :  { %v638_v28 = vmin.f32 %v574_v40, 6.0  ;;  %v648_v58 = vmin.f32 %v584_v9, 6.0  ;;  %v1416_v8 = vadd.f32 %v1387_v39, %v4828_v3  ;;  %v1341_v61 = vmul.f32 %v4955_v7, %v4821_v17  ;;  %v503_v19 = vpop.f32.mrf.mxu3 }
 0x108   :  { %7938 = vst [vmem:[#allocation16_spill] sm:$0xff] %v4949_v42  ;;  %v613_v44 = vmin.f32 %v549_v41, 6.0  ;;  %v1471_v4 = vmax.f32 %v1463_v45, 0.0  ;;  %v4963_v29 = vsel %vm937_vm4, %v4840_v54, %v4949_v42  ;;  %v1342_v37 = vmul.f32 %v4955_v7, %v4877_v43  ;;  %v478_v22 = vpop.f32.mrf.mxu1 }
 0x109   :  { %709 = vst.msk [vmem:[#allocation2 + $0x168] sm:$0xff] %vm661_vm2, %v638_v28  ;;  %v4968_v3 = vld [vmem:[#allocation2 + $0x88] sm:$0xff]  ;;  %v1432_v24 = vmul.f32 %v1416_v8, %v7939_v33  ;;  %v1349_v5 = vadd.f32 %v1315_v55, %v4849_v20  ;;  %v1350_v1 = vadd.f32 %v1316_v2, %v4862_v31  ;;  %v1357_v26 = vadd.f32 %v1328_v18, %v1281_v23 }
 0x10a   :  { %684 = vst.msk [vmem:[#allocation2 + $0x90] sm:$0xff] %vm661_vm2, %v613_v44  ;;  %v4975_v54 = vrot.slane %v4968_v3, 7  ;;  %v4977_v40 = vmin.f32 %v1471_v4, 6.0  ;;  %v4980_v9 = vrot.slane %v4968_v3, 1  ;;  %v4982_v39 = vadd.f32 %v1329_v62, %v1282_v52  ;;  %v5019_v44 = vld [vmem:[%s7716_s3 + $0x8] ss:$0 sm:$0xff] }
 0x10b   :  { %v415_v41 = vpop.f32.mrf.mxu0  ;;  %719 = vst.msk [vmem:[#allocation2 + $0x1b8] sm:$0xff] %vm661_vm2, %v648_v58  ;;  %v479_v20 = vadd.f32 %v4855_v25, %v478_v22  ;;  %v504_v31 = vadd.f32 %v4855_v25, %v503_v19  ;;  %v1440_v23 = vadd.f32 %v1432_v24, %v4888_v49  ;;  %v1365_v55 = vadd.f32 %v1341_v61, %v1305_v59 }
 0x10c   :  { %7940 = vst [vmem:[#allocation17_spill] sm:$0xff] %v4977_v40  ;;  %v416_v2 = vadd.f32 %v4855_v25, %v415_v41  ;;  %v1336_v18 = vsel %vm937_vm4, %v4975_v54, %v4604_v15  ;;  %v4997_v52 = vsel %vm911_vm3, %v4905_v60, %v4980_v9  ;;  %v5003_v45 = vsel %vm937_vm4, %v4949_v42, %v4975_v54  ;;  %v5010_v15 = vld [vmem:[%s7716_s3 + $0x7] ss:$0 sm:$0xff] }
 0x10d   :  { %v575_v49 = vmax.f32 %v479_v20, 0.0  ;;  %v585_v59 = vmax.f32 %v504_v31, 0.0  ;;  %v1337_v62 = vmul.f32 %v4955_v7, %v1336_v18  ;;  %v1456_v28 = vadd.f32 %v1440_v23, %v4890_v30 }
 0x10e   :  { %v550_v58 = vmax.f32 %v416_v2, 0.0  ;;  %v1375_v8 = vmul.f32 %v5010_v15, %v4893_v48  ;;  %v1376_v61 = vmul.f32 %v5010_v15, %v4968_v3  ;;  %v1388_v30 = vmul.f32 %v5019_v44, %v4997_v52 }
 0x10f   :  { %v639_v4 = vmin.f32 %v575_v49, 6.0  ;;  %v649_v24 = vmin.f32 %v585_v59, 6.0  ;;  %v1464_v22 = vadd.f32 %v4439_v13, %v1456_v28  ;;  %v1366_v19 = vadd.f32 %v1342_v37, %v4916_v32  ;;  %v505_v37 = vpop.f32.mrf.mxu3 }
 0x110   :  { %v614_v41 = vmin.f32 %v550_v58, 6.0  ;;  %v5026_v20 = vadd.f32 %v1337_v62, %v4881_v47  ;;  %v1401_v31 = vmul.f32 %v4282_v12, %v4963_v29  ;;  %v1402_v23 = vmul.f32 %v4282_v12, %v5003_v45  ;;  %v480_v32 = vpop.f32.mrf.mxu1  ;;  %v5042_v12 = vld [vmem:[%s7716_s3 + $0x1] ss:$0 sm:$0xff] }
 0x111   :  { %710 = vst.msk [vmem:[#allocation2 + $0x170] sm:$0xff] %vm661_vm2, %v639_v4  ;;  %v1472_v2 = vmax.f32 %v1464_v22, 0.0  ;;  %v5033_v18 = vld [vmem:[#allocation2 + $0x90] sm:$0xff]  ;;  %v1409_v49 = vadd.f32 %v1375_v8, %v1349_v5  ;;  %v1410_v59 = vadd.f32 %v1376_v61, %v1350_v1  ;;  %v1417_v28 = vadd.f32 %v1388_v30, %v1357_v26 }
 0x112   :  { %685 = vst.msk [vmem:[#allocation2 + $0x98] sm:$0xff] %vm661_vm2, %v614_v41  ;;  %v5037_v47 = vrot.slane %v5033_v18, 1  ;;  %v1425_v62 = vadd.f32 %v1401_v31, %v1365_v55  ;;  %v1426_v58 = vadd.f32 %v1402_v23, %v1366_v19  ;;  %v1259_v4 = vmul.f32 %v5042_v12, %v4773_v56  ;;  %v7942_v22 = vld [vmem:[#allocation9_spill] sm:$0xff]  ;;  %v7943_v19 = vld [vmem:[#allocation11_spill] sm:$0xff] }
 0x113   :  { %v418_v5 = vpop.f32.mrf.mxu0  ;;  %720 = vst.msk [vmem:[#allocation2 + $0x1c0] sm:$0xff] %vm661_vm2, %v649_v24  ;;  %v481_v1 = vadd.f32 %v4855_v25, %v480_v32  ;;  %v506_v26 = vadd.f32 %v4855_v25, %v505_v37  ;;  %v5049_v8 = vmin.f32 %v1472_v2, 6.0  ;;  %v1441_v61 = vadd.f32 %v1417_v28, %v1409_v49  ;;  %v5072_v37 = vld [vmem:[%s7716_s3 + $0x2] ss:$0 sm:$0xff] }
 0x114   :  { %v419_v55 = vadd.f32 %v4855_v25, %v418_v5  ;;  %v5056_v30 = vsel %vm911_vm3, %v4980_v9, %v5037_v47  ;;  %v1449_v56 = vmul.f32 %v1425_v62, %v7942_v22  ;;  %v1276_v24 = vsel %vm911_vm3, %v4843_v53, %v7943_v19 }
 0x115   :  { %7941 = vst [vmem:[#allocation18_spill] sm:$0xff] %v5049_v8  ;;  %v576_v41 = vmax.f32 %v481_v1, 0.0  ;;  %v586_v31 = vmax.f32 %v506_v26, 0.0  ;;  %v1389_v2 = vmul.f32 %v5019_v44, %v5056_v30  ;;  %v1260_v32 = vmul.f32 %v5042_v12, %v4831_v21 }
 0x116   :  { %v551_v49 = vmax.f32 %v419_v55, 0.0  ;;  %v1457_v28 = vadd.f32 %v1449_v56, %v1441_v61  ;;  %v1283_v53 = vmul.f32 %v5072_v37, %v4872_v63  ;;  %v1284_v26 = vmul.f32 %v5072_v37, %v1276_v24 }
 0x117   :  { %v640_v62 = vmin.f32 %v576_v41, 6.0  ;;  %v650_v5 = vmin.f32 %v586_v31, 6.0  ;;  %v1418_v1 = vadd.f32 %v1389_v2, %v4982_v39  ;;  %v1307_v21 = vmul.f32 %v4910_v51, %v4821_v17  ;;  %v508_v31 = vpop.f32.mrf.mxu3 }
 0x118   :  { %v615_v19 = vmin.f32 %v551_v49, 6.0  ;;  %v1465_v61 = vadd.f32 %v4439_v13, %v1457_v28  ;;  %v1308_v55 = vmul.f32 %v4910_v51, %v4877_v43  ;;  %v1317_v39 = vmul.f32 %v4926_v46, %v4893_v48  ;;  %v483_v41 = vpop.f32.mrf.mxu1 }
 0x119   :  { %v5083_v56 = vld [vmem:[#allocation2 + $0x98] sm:$0xff]  ;;  %711 = vst.msk [vmem:[#allocation2 + $0x178] sm:$0xff] %vm661_vm2, %v640_v62  ;;  %v1434_v63 = vmul.f32 %v1418_v1, %v4386_v27  ;;  %v1318_v24 = vmul.f32 %v4926_v46, %v4968_v3  ;;  %v1323_v17 = vsel %vm911_vm3, %v4980_v9, %v4583_v14  ;;  %v1330_v49 = vmul.f32 %v4941_v0, %v4997_v52 }
 0x11a   :  { %686 = vst.msk [vmem:[#allocation2 + $0xa0] sm:$0xff] %vm661_vm2, %v615_v19  ;;  %v5097_v43 = vrot.slane %v5083_v56, 7  ;;  %v1473_v2 = vmax.f32 %v1465_v61, 0.0  ;;  %v1331_v28 = vmul.f32 %v4941_v0, %v1323_v17  ;;  %v484_v1 = vadd.f32 %v4855_v25, %v483_v41  ;;  %v5119_v17 = vld [vmem:[%s7716_s3 + $0x6] ss:$0 sm:$0xff] }
 0x11b   :  { %v420_v62 = vpop.f32.mrf.mxu0  ;;  %721 = vst.msk [vmem:[#allocation2 + $0x1c8] sm:$0xff] %vm661_vm2, %v650_v5  ;;  %v509_v14 = vadd.f32 %v4855_v25, %v508_v31  ;;  %v1442_v9 = vadd.f32 %v1434_v63, %v1410_v59  ;;  %v1343_v19 = vmul.f32 %v4955_v7, %v4963_v29  ;;  %v1344_v5 = vmul.f32 %v4955_v7, %v5003_v45 }
 0x11c   :  { %v421_v23 = vadd.f32 %v4855_v25, %v420_v62  ;;  %v1396_v61 = vsel %vm937_vm4, %v5097_v43, %v4718_v16  ;;  %v5112_v27 = vmin.f32 %v1473_v2, 6.0  ;;  %v577_v29 = vmax.f32 %v484_v1, 0.0 }
 0x11d   :  { %v1397_v59 = vmul.f32 %v5119_v17, %v1396_v61  ;;  %v587_v63 = vmax.f32 %v509_v14, 0.0  ;;  %v1458_v41 = vadd.f32 %v1442_v9, %v1426_v58  ;;  %v1351_v62 = vadd.f32 %v1317_v39, %v1259_v4 }
 0x11e   :  { %v552_v31 = vmax.f32 %v421_v23, 0.0  ;;  %v1352_v60 = vadd.f32 %v1318_v24, %v1260_v32  ;;  %v1359_v22 = vadd.f32 %v1330_v49, %v1283_v53  ;;  %v641_v2 = vmin.f32 %v577_v29, 6.0 }
 0x11f   :  { %v1421_v16 = vadd.f32 %v1397_v59, %v5026_v20  ;;  %v651_v33 = vmin.f32 %v587_v63, 6.0  ;;  %v1466_v34 = vadd.f32 %v4439_v13, %v1458_v41  ;;  %v1360_v40 = vadd.f32 %v1331_v28, %v1284_v26  ;;  %v510_v32 = vpop.f32.mrf.mxu3 }
 0x120   :  { %v616_v42 = vmin.f32 %v552_v31, 6.0  ;;  %v1367_v8 = vadd.f32 %v1343_v19, %v1307_v21  ;;  %v1377_v10 = vmul.f32 %v5010_v15, %v5033_v18  ;;  %712 = vst.msk [vmem:[#allocation2 + $0x180] sm:$0xff] %vm661_vm2, %v641_v2  ;;  %v1368_v4 = vadd.f32 %v1344_v5, %v1308_v55  ;;  %v485_v20 = vpop.f32.mrf.mxu1 }
 0x121   :  { %v1445_v1 = vmul.f32 %v1421_v16, %v4488_v35  ;;  %v1474_v58 = vmax.f32 %v1466_v34, 0.0  ;;  %v5129_v23 = vrot.slane %v5083_v56, 1  ;;  %v1378_v53 = vmul.f32 %v5010_v15, %v5083_v56  ;;  %722 = vst.msk [vmem:[#allocation2 + $0x1d0] sm:$0xff] %vm661_vm2, %v651_v33 }
 0x122   :  { %687 = vst.msk [vmem:[#allocation2 + $0xa8] sm:$0xff] %vm661_vm2, %v616_v42  ;;  %v5135_v26 = vrot.slane %v5033_v18, 7  ;;  %v1411_v21 = vadd.f32 %v1377_v10, %v1351_v62  ;;  %v5139_v39 = vmul.f32 %v5042_v12, %v4893_v48  ;;  %v486_v42 = vadd.f32 %v4855_v25, %v485_v20 }
 0x123   :  { %v423_v34 = vpop.f32.mrf.mxu0  ;;  %v1453_v55 = vadd.f32 %v1445_v1, %v4775_v6  ;;  %v511_v24 = vadd.f32 %v4855_v25, %v510_v32  ;;  %v5147_v49 = vmul.f32 %v5042_v12, %v4968_v3  ;;  %v5150_v10 = vmin.f32 %v1474_v58, 6.0 }
 0x124   :  { %v424_v28 = vadd.f32 %v4855_v25, %v423_v34  ;;  %v5156_v48 = vsel %vm911_vm3, %v5037_v47, %v5129_v23  ;;  %v1383_v6 = vsel %vm911_vm3, %v5129_v23, %v4697_v36  ;;  %v578_v14 = vmax.f32 %v486_v42, 0.0 }
 0x125   :  { %v1461_v33 = vadd.f32 %v4439_v13, %v1453_v55  ;;  %v588_v3 = vmax.f32 %v511_v24, 0.0  ;;  %v5167_v9 = vsel %vm937_vm4, %v5135_v26, %v5097_v43  ;;  %v1390_v61 = vmul.f32 %v5019_v44, %v5156_v48  ;;  %v5178_v13 = vld [vmem:[#allocation2 + $0xa0] sm:$0xff] }
 0x126   :  { %v553_v19 = vmax.f32 %v424_v28, 0.0  ;;  %v1391_v5 = vmul.f32 %v5019_v44, %v1383_v6  ;;  %v5176_v36 = vsel %vm937_vm4, %v4975_v54, %v5135_v26  ;;  %v642_v29 = vmin.f32 %v578_v14, 6.0 }
 0x127   :  { %v1469_v59 = vmax.f32 %v1461_v33, 0.0  ;;  %v652_v63 = vmin.f32 %v588_v3, 6.0  ;;  %v1403_v41 = vmul.f32 %v5119_v17, %v5176_v36  ;;  %v1404_v16 = vmul.f32 %v5119_v17, %v5167_v9  ;;  %v513_v34 = vpop.f32.mrf.mxu3 }
 0x128   :  { %v617_v31 = vmin.f32 %v553_v19, 6.0  ;;  %v1419_v2 = vadd.f32 %v1390_v61, %v1359_v22  ;;  %713 = vst.msk [vmem:[#allocation2 + $0x188] sm:$0xff] %vm661_vm2, %v642_v29  ;;  %v1420_v54 = vadd.f32 %v1391_v5, %v1360_v40  ;;  %v5188_v20 = vrot.slane %v5178_v13, 1  ;;  %v488_v32 = vpop.f32.mrf.mxu1 }
 0x129   :  { %v1477_v1 = vmin.f32 %v1469_v59, 6.0  ;;  %v1427_v58 = vadd.f32 %v1403_v41, %v1367_v8  ;;  %v1412_v55 = vadd.f32 %v1378_v53, %v1352_v60  ;;  %v1428_v42 = vadd.f32 %v1404_v16, %v1368_v4  ;;  %723 = vst.msk [vmem:[#allocation2 + $0x1d8] sm:$0xff] %vm661_vm2, %v652_v63  ;;  %v5198_v14 = vld [vmem:[#allocation2 + $0xa8] sm:$0xff] }
 0x12a   :  { %7944 = vst [vmem:[#allocation11_spill] sm:$0xff] %v5188_v20  ;;  %v1443_v24 = vadd.f32 %v1419_v2, %v1411_v21  ;;  %v1600_v28 = vmul.f32 %v5072_v37, %v4997_v52  ;;  %v489_v40 = vadd.f32 %v4855_v25, %v488_v32  ;;  %v514_v8 = vadd.f32 %v4855_v25, %v513_v34  ;;  %v5227_v2 = vld [vmem:[%s7717_s4] ss:$0 sm:$0xff] }
 0x12b   :  { %688 = vst.msk [vmem:[#allocation2 + $0xb0] sm:$0xff] %vm661_vm2, %v617_v31  ;;  %v425_v6 = vpop.f32.mrf.mxu0  ;;  %v1485_v22 = vpack.c.bf16 %v4921_v50, %v1477_v1  ;;  %v1436_v33 = vmul.f32 %v1420_v54, %v4513_v57  ;;  %v1451_v4 = vmul.f32 %v1427_v58, %v4505_v11  ;;  %v1589_v53 = vrot.slane %v5198_v14, 1 }
 0x12c   :  { %v426_v60 = vadd.f32 %v4855_v25, %v425_v6  ;;  %v1601_v52 = vmul.f32 %v5072_v37, %v5056_v30  ;;  %v579_v50 = vmax.f32 %v489_v40, 0.0  ;;  %v589_v21 = vmax.f32 %v514_v8, 0.0  ;;  %v3871_v30 = vld [vmem:[%s7718_s5 + $0x10] sm:$0xff] }
 0x12d   :  { %3757 = vmatmul.msk.bf16.vlgmr.msrb.gmra.mxu2 %vm661_vm2, %v1485_v22  ;;  %v1444_v3 = vadd.f32 %v1436_v33, %v1412_v55  ;;  %v5210_v19 = vsel %vm911_vm3, %v5129_v23, %v5188_v20  ;;  %v1459_v5 = vadd.f32 %v1451_v4, %v1443_v24  ;;  %v5213_v59 = vrot.slane %v5178_v13, 7  ;;  %v3873_v33 = vld [vmem:[%s7718_s5 + $0x8] sm:$0xff] }
 0x12e   :  { %v554_v61 = vmax.f32 %v426_v60, 0.0  ;;  %v1613_v29 = vrot.slane %v5198_v14, 7  ;;  %3445 = vmatpush.bf16.msrb.mxu2 %v3871_v30  ;;  %v643_v63 = vmin.f32 %v579_v50, 6.0  ;;  %v653_v41 = vmin.f32 %v589_v21, 6.0 }
 0x12f   :  { %v1460_v31 = vadd.f32 %v1444_v3, %v1428_v42  ;;  %v5222_v23 = vsel %vm911_vm3, %v5188_v20, %v1589_v53  ;;  %v1467_v1 = vadd.f32 %v5227_v2, %v1459_v5  ;;  %v1625_v54 = vmul.f32 %v4910_v51, %v5003_v45  ;;  %v515_v24 = vpop.f32.mrf.mxu3 }
 0x130   :  { %v618_v16 = vmin.f32 %v554_v61, 6.0  ;;  %v1634_v58 = vmul.f32 %v4926_v46, %v5033_v18  ;;  %714 = vst.msk [vmem:[#allocation2 + $0x190] sm:$0xff] %vm661_vm2, %v643_v63  ;;  %v5241_v34 = vsel %vm937_vm4, %v5213_v59, %v1613_v29  ;;  %v1635_v55 = vmul.f32 %v4926_v46, %v5083_v56  ;;  %v490_v42 = vpop.f32.mrf.mxu1 }
 0x131   :  { %v1468_v32 = vadd.f32 %v5227_v2, %v1460_v31  ;;  %v1647_v45 = vmul.f32 %v4941_v0, %v5156_v48  ;;  %v1475_v6 = vmax.f32 %v1467_v1, 0.0  ;;  %v1648_v22 = vmul.f32 %v4941_v0, %v5210_v19  ;;  %724 = vst.msk [vmem:[#allocation2 + $0x1e0] sm:$0xff] %vm661_vm2, %v653_v41 }
 0x132   :  { %689 = vst.msk [vmem:[#allocation2 + $0xb8] sm:$0xff] %vm661_vm2, %v618_v16  ;;  %v1661_v40 = vmul.f32 %v4955_v7, %v5167_v9  ;;  %v1668_v8 = vadd.f32 %v1634_v58, %v5139_v39  ;;  %3446 = vmatpush.bf16.msrb.mxu2 %v3873_v33  ;;  %v491_v4 = vadd.f32 %v4855_v25, %v490_v42  ;;  %v5259_v3 = vld [vmem:[#allocation2 + $0xb0] sm:$0xff]  ;;  %v3874_v42 = vld [vmem:[%s7718_s5] sm:$0xff] }
 0x133   :  { %v428_v60 = vpop.f32.mrf.mxu0  ;;  %v516_v50 = vadd.f32 %v4855_v25, %v515_v24  ;;  %v1476_v21 = vmax.f32 %v1468_v32, 0.0  ;;  %v1669_v61 = vadd.f32 %v1635_v55, %v5147_v49  ;;  %v5263_v39 = vmin.f32 %v1475_v6, 6.0 }
 0x134   :  { %v429_v5 = vadd.f32 %v4855_v25, %v428_v60  ;;  %v1590_v30 = vrot.slane %v5259_v3, 1  ;;  %v1694_v63 = vmul.f32 %v5010_v15, %v5178_v13  ;;  %v580_v31 = vmax.f32 %v491_v4, 0.0 }
 0x135   :  { %v590_v41 = vmax.f32 %v516_v50, 0.0  ;;  %v5268_v16 = vmin.f32 %v1476_v21, 6.0  ;;  %v1676_v1 = vadd.f32 %v1647_v45, %v1600_v28  ;;  %v1677_v32 = vadd.f32 %v1648_v22, %v1601_v52 }
 0x136   :  { %v555_v58 = vmax.f32 %v429_v5, 0.0  ;;  %v5274_v49 = vsel %vm911_vm3, %v1589_v53, %v1590_v30  ;;  %v1695_v55 = vmul.f32 %v5010_v15, %v5198_v14  ;;  %3447 = vmatpush.bf16.msrb.mxu2 %v3874_v42  ;;  %v644_v24 = vmin.f32 %v580_v31, 6.0 }
 0x137   :  { %v654_v6 = vmin.f32 %v590_v41, 6.0  ;;  %v1685_v33 = vadd.f32 %v1661_v40, %v1625_v54  ;;  %v1707_v28 = vmul.f32 %v5019_v44, %v5222_v23  ;;  %v1708_v52 = vmul.f32 %v5019_v44, %v5274_v49  ;;  %v518_v40 = vpop.f32.mrf.mxu3 }
 0x138   :  { %v619_v45 = vmin.f32 %v555_v58, 6.0  ;;  %v1721_v22 = vmul.f32 %v5119_v17, %v5241_v34  ;;  %715 = vst.msk [vmem:[#allocation2 + $0x198] sm:$0xff] %vm661_vm2, %v644_v24  ;;  %v1728_v60 = vadd.f32 %v1694_v63, %v1668_v8  ;;  %v1729_v4 = vadd.f32 %v1695_v55, %v1669_v61  ;;  %v7947_v24 = vld [vmem:[#allocation18_spill] sm:$0xff] }
 0x139   :  { %v1736_v50 = vadd.f32 %v1707_v28, %v1676_v1  ;;  %v1578_v54 = vmul.f32 %v5042_v12, %v5033_v18  ;;  %v1737_v21 = vadd.f32 %v1708_v52, %v1677_v32  ;;  %v1579_v31 = vmul.f32 %v5042_v12, %v5083_v56  ;;  %725 = vst.msk [vmem:[#allocation2 + $0x1e8] sm:$0xff] %vm661_vm2, %v654_v6  ;;  %v5299_v61 = vld [vmem:[#allocation2 + $0xb8] sm:$0xff]  ;;  %v7948_v6 = vld [vmem:[#allocation17_spill] sm:$0xff] }
 0x13a   :  { %690 = vst.msk [vmem:[#allocation2 + $0xc0] sm:$0xff] %vm661_vm2, %v619_v45  ;;  %v1745_v5 = vadd.f32 %v1721_v22, %v1685_v33  ;;  %v1602_v41 = vmul.f32 %v5072_v37, %v5156_v48  ;;  %v519_v8 = vadd.f32 %v4855_v25, %v518_v40  ;;  %v1603_v18 = vmul.f32 %v5072_v37, %v5210_v19  ;;  %v7946_v48 = vld [vmem:[#allocation7_spill] sm:$0xff] }
 0x13b   :  { %v430_v58 = vpop.f32.mrf.mxu0  ;;  %v5301_v63 = vadd.f32 %v1736_v50, %v1728_v60  ;;  %v1614_v1 = vrot.slane %v5259_v3, 7  ;;  %v5308_v56 = vrot.slane %v5299_v61, 7  ;;  %v1753_v55 = vmul.f32 %v1737_v21, %v7946_v48 }
 0x13c   :  { %v431_v32 = vadd.f32 %v4855_v25, %v430_v58  ;;  %v1619_v42 = vsel %vm937_vm4, %v5097_v43, %v5213_v59  ;;  %v7949_v33 = vpack.c.bf16 %v7947_v24, %v7948_v6  ;;  %v591_v19 = vmax.f32 %v519_v8, 0.0  ;;  %v7950_v43 = vld [vmem:[#allocation16_spill] sm:$0xff] }
 0x13d   :  { %7945 = vst [vmem:[#allocation19_spill] sm:$0xff] %v5301_v63  ;;  %v5323_v28 = vsel %vm937_vm4, %v1613_v29, %v1614_v1  ;;  %v1626_v45 = vmul.f32 %v4910_v51, %v5176_v36  ;;  %v1636_v52 = vmul.f32 %v4926_v46, %v5178_v13  ;;  %v1623_v60 = vsel %vm937_vm4, %v5308_v56, %v7950_v43 }
 0x13e   :  { %3758 = vmatmul.msk.bf16.gmra.mxu2 %vm661_vm2, %v7949_v33  ;;  %v556_v22 = vmax.f32 %v431_v32, 0.0  ;;  %v1761_v50 = vadd.f32 %v1753_v55, %v1729_v4  ;;  %v1637_v40 = vmul.f32 %v4926_v46, %v5198_v14  ;;  %v655_v21 = vmin.f32 %v591_v19, 6.0 }
 0x13f   :  { %v5336_v29 = vmul.f32 %v4910_v51, %v1623_v60  ;;  %v1627_v36 = vmul.f32 %v4910_v51, %v5167_v9  ;;  %v1649_v58 = vmul.f32 %v4941_v0, %v5222_v23  ;;  %v1650_v24 = vmul.f32 %v4941_v0, %v5274_v49  ;;  %v520_v19 = vpop.f32.mrf.mxu3 }
 0x140   :  { %v620_v8 = vmin.f32 %v556_v22, 6.0  ;;  %v1777_v32 = vadd.f32 %v1761_v50, %v1745_v5  ;;  %v1662_v4 = vmul.f32 %v4955_v7, %v1619_v42  ;;  %726 = vst.msk [vmem:[#allocation2 + $0x1f0] sm:$0xff] %vm661_vm2, %v655_v21  ;;  %v5347_v55 = vrot.slane %v5299_v61, 1 }
 0x141   :  { %v1663_v6 = vmul.f32 %v4955_v7, %v5241_v34  ;;  %v1670_v33 = vadd.f32 %v1636_v52, %v1578_v54  ;;  %v1671_v9 = vadd.f32 %v1637_v40, %v1579_v31  ;;  %v1678_v22 = vadd.f32 %v1649_v58, %v1602_v41 }
 0x142   :  { %691 = vst.msk [vmem:[#allocation2 + $0xc8] sm:$0xff] %vm661_vm2, %v620_v8  ;;  %v1785_v5 = vadd.f32 %v5227_v2, %v1777_v32  ;;  %v1679_v43 = vadd.f32 %v1650_v24, %v1603_v18  ;;  %v1686_v60 = vadd.f32 %v1662_v4, %v1626_v45  ;;  %v521_v53 = vadd.f32 %v4855_v25, %v520_v19 }
 0x143   :  { %v433_v50 = vpop.f32.mrf.mxu0  ;;  %v5359_v21 = vsel %vm911_vm3, %v1590_v30, %v5347_v55  ;;  %v5364_v54 = vsel %vm937_vm4, %v1614_v1, %v5308_v56  ;;  %v1687_v31 = vadd.f32 %v1663_v6, %v1627_v36  ;;  %v1696_v45 = vmul.f32 %v5010_v15, %v5259_v3 }
 0x144   :  { %v434_v41 = vadd.f32 %v4855_v25, %v433_v50  ;;  %v1793_v18 = vmax.f32 %v1785_v5, 0.0  ;;  %v1697_v52 = vmul.f32 %v5010_v15, %v5299_v61  ;;  %v592_v40 = vmax.f32 %v521_v53, 0.0  ;;  %v5379_v53 = vld [vmem:[#allocation2 + $0xc0] sm:$0xff] }
 0x145   :  { %v1709_v30 = vmul.f32 %v5019_v44, %v5359_v21  ;;  %v1722_v58 = vmul.f32 %v5119_v17, %v5323_v28  ;;  %v1723_v1 = vmul.f32 %v5119_v17, %v5364_v54  ;;  %v1730_v32 = vadd.f32 %v1696_v45, %v1670_v33 }
 0x146   :  { %v557_v36 = vmax.f32 %v434_v41, 0.0  ;;  %v5377_v8 = vmin.f32 %v1793_v18, 6.0  ;;  %v1731_v24 = vadd.f32 %v1697_v52, %v1671_v9  ;;  %v656_v4 = vmin.f32 %v592_v40, 6.0 }
 0x147   :  { %v1738_v6 = vadd.f32 %v1709_v30, %v1678_v22  ;;  %v1746_v19 = vadd.f32 %v1722_v58, %v1686_v60  ;;  %v1747_v5 = vadd.f32 %v1723_v1, %v1687_v31  ;;  %v1580_v62 = vmul.f32 %v5042_v12, %v5178_v13  ;;  %v7953_v22 = vld [vmem:[#allocation6_spill] sm:$0xff]  ;;  %v523_v20 = vpop.f32.mrf.mxu3 }
 0x148   :  { %7951 = vst [vmem:[#allocation18_spill] sm:$0xff] %v5377_v8  ;;  %v621_v50 = vmin.f32 %v557_v36, 6.0  ;;  %v1581_v48 = vmul.f32 %v5042_v12, %v5198_v14  ;;  %v1604_v41 = vmul.f32 %v5072_v37, %v5222_v23  ;;  %v5389_v33 = vrot.slane %v5379_v53, 1 }
 0x149   :  { %727 = vst.msk [vmem:[#allocation2 + $0x1f8] sm:$0xff] %vm661_vm2, %v656_v4  ;;  %v1762_v9 = vadd.f32 %v1738_v6, %v1730_v32  ;;  %v1770_v60 = vmul.f32 %v1746_v19, %v7953_v22  ;;  %v1605_v31 = vmul.f32 %v5072_v37, %v5274_v49  ;;  %v1628_v13 = vmul.f32 %v4910_v51, %v1619_v42  ;;  %v5402_v52 = vld [vmem:[#allocation2 + $0xc8] sm:$0xff] }
 0x14a   :  { %7952 = vst [vmem:[#allocation17_spill] sm:$0xff] %v5389_v33  ;;  %v1629_v14 = vmul.f32 %v4910_v51, %v5241_v34  ;;  %v1638_v23 = vmul.f32 %v4926_v46, %v5259_v3  ;;  %v1639_v18 = vmul.f32 %v4926_v46, %v5299_v61  ;;  %v1645_v49 = vsel %vm911_vm3, %v5347_v55, %v5389_v33  ;;  %v7955_v22 = vld [vmem:[#allocation8_spill] sm:$0xff] }
 0x14b   :  { %692 = vst.msk [vmem:[#allocation2 + $0xd0] sm:$0xff] %vm661_vm2, %v621_v50  ;;  %v435_v45 = vpop.f32.mrf.mxu0  ;;  %v1778_v40 = vadd.f32 %v1770_v60, %v1762_v9  ;;  %v1651_v42 = vmul.f32 %v4941_v0, %v5359_v21  ;;  %v5411_v34 = vrot.slane %v5379_v53, 7  ;;  %v5415_v58 = vrot.slane %v5402_v52, 7 }
 0x14c   :  { %v436_v30 = vadd.f32 %v4855_v25, %v435_v45  ;;  %v1710_v1 = vmul.f32 %v5019_v44, %v1645_v49  ;;  %v1652_v36 = vmul.f32 %v4941_v0, %v1645_v49  ;;  %v7954_v32 = vpack.c.bf16 %v5150_v10, %v5112_v27 }
 0x14d   :  { %v1786_v4 = vadd.f32 %v5227_v2, %v1778_v40  ;;  %v5428_v6 = vsel %vm937_vm4, %v5308_v56, %v5411_v34  ;;  %v1664_v19 = vmul.f32 %v4955_v7, %v5323_v28  ;;  %v1665_v50 = vmul.f32 %v4955_v7, %v5364_v54 }
 0x14e   :  { %3759 = vmatmul.msk.bf16.gmra.mxu2 %vm661_vm2, %v7954_v32  ;;  %v558_v9 = vmax.f32 %v436_v30, 0.0  ;;  %v1659_v27 = vsel %vm937_vm4, %v5415_v58, %v5135_v26  ;;  %v1739_v10 = vadd.f32 %v1710_v1, %v1679_v43  ;;  %v1672_v60 = vadd.f32 %v1638_v23, %v1580_v62 }
 0x14f   :  { %v1660_v45 = vmul.f32 %v4955_v7, %v1659_v27  ;;  %v1794_v49 = vmax.f32 %v1786_v4, 0.0  ;;  %v1673_v40 = vadd.f32 %v1639_v18, %v1581_v48  ;;  %v1680_v56 = vadd.f32 %v1651_v42, %v1604_v41 }
 0x150   :  { %v622_v32 = vmin.f32 %v558_v9, 6.0  ;;  %v1755_v11 = vmul.f32 %v1739_v10, %v7955_v22  ;;  %v5440_v57 = vadd.f32 %v1652_v36, %v1605_v31  ;;  %v1688_v8 = vadd.f32 %v1664_v19, %v1628_v13 }
 0x151   :  { %v5443_v30 = vadd.f32 %v1660_v45, %v5336_v29  ;;  %v5445_v63 = vmin.f32 %v1794_v49, 6.0  ;;  %v5448_v26 = vrot.slane %v5402_v52, 1  ;;  %v1689_v62 = vadd.f32 %v1665_v50, %v1629_v14  ;;  %v7957_v45 = vld [vmem:[#allocation9_spill] sm:$0xff] }
 0x152   :  { %693 = vst.msk [vmem:[#allocation2 + $0xd8] sm:$0xff] %vm661_vm2, %v622_v32  ;;  %v524_v48 = vadd.f32 %v4855_v25, %v523_v20  ;;  %v1763_v43 = vadd.f32 %v1755_v11, %v1731_v24  ;;  %v1698_v41 = vmul.f32 %v5010_v15, %v5379_v53  ;;  %v1699_v31 = vmul.f32 %v5010_v15, %v5402_v52 }
 0x153   :  { %v438_v13 = vpop.f32.mrf.mxu0  ;;  %v5460_v29 = vsel %vm911_vm3, %v5389_v33, %v5448_v26  ;;  %v5466_v14 = vsel %vm937_vm4, %v5411_v34, %v5415_v58  ;;  %v1724_v11 = vmul.f32 %v5119_v17, %v5428_v6  ;;  %v5472_v20 = vmul.f32 %v5042_v12, %v5259_v3 }
 0x154   :  { %v439_v24 = vadd.f32 %v4855_v25, %v438_v13  ;;  %v593_v23 = vmax.f32 %v524_v48, 0.0  ;;  %v1779_v18 = vadd.f32 %v1763_v43, %v1747_v5  ;;  %v1711_v42 = vmul.f32 %v5019_v44, %v5460_v29  ;;  %v5485_v5 = vld [vmem:[%s7719_s6] ss:$0 sm:$0xff]  ;;  %v5497_v48 = vld [vmem:[#allocation2 + $0xd0] sm:$0xff] }
 0x155   :  { %v1725_v1 = vmul.f32 %v5119_v17, %v5466_v14  ;;  %v1732_v36 = vadd.f32 %v1698_v41, %v1672_v60  ;;  %v5479_v4 = vadd.f32 %v1699_v31, %v1673_v40  ;;  %v1748_v19 = vadd.f32 %v1724_v11, %v1688_v8  ;;  %7956 = vst [vmem:[#allocation16_spill] sm:$0xff] %v5485_v5  ;;  %v7958_v40 = vld [vmem:[#allocation12_spill] sm:$0xff]  ;;  %v525_v31 = vpop.f32.mrf.mxu3 }
 0x156   :  { %v559_v50 = vmax.f32 %v439_v24, 0.0  ;;  %v657_v9 = vmin.f32 %v593_v23, 6.0  ;;  %v1787_v3 = vadd.f32 %v5227_v2, %v1779_v18  ;;  %v1740_v27 = vadd.f32 %v1711_v42, %v1680_v56 }
 0x157   :  { %v5487_v10 = vadd.f32 %v1725_v1, %v1689_v62  ;;  %v1772_v49 = vmul.f32 %v1748_v19, %v7957_v45  ;;  %v1583_v60 = vmul.f32 %v5042_v12, %v5299_v61  ;;  %v1599_v8 = vsel %vm911_vm3, %v5347_v55, %v7958_v40  ;;  %v2539_v45 = vld [vmem:[#allocation2 + $0x158] sm:$0xff] }
 0x158   :  { %v623_v32 = vmin.f32 %v559_v50, 6.0  ;;  %728 = vst.msk [vmem:[#allocation2 + $0x200] sm:$0xff] %vm661_vm2, %v657_v9  ;;  %v1795_v56 = vmax.f32 %v1787_v3, 0.0  ;;  %v1764_v43 = vadd.f32 %v1740_v27, %v1732_v36  ;;  %v1606_v62 = vmul.f32 %v5072_v37, %v5359_v21 }
 0x159   :  { %v5501_v41 = vld [vmem:[#allocation2 + $0xd8] sm:$0xff]  ;;  %v5504_v61 = vrot.slane %v5497_v48, 1  ;;  %v1607_v13 = vmul.f32 %v5072_v37, %v1599_v8  ;;  %v1630_v55 = vmul.f32 %v4910_v51, %v5323_v28  ;;  %v1631_v11 = vmul.f32 %v4910_v51, %v5364_v54 }
 0x15a   :  { %694 = vst.msk [vmem:[#allocation2 + $0xe0] sm:$0xff] %vm661_vm2, %v623_v32  ;;  %v1191_v24 = vpop.f32.mrf.mxu2  ;;  %v5513_v23 = vrot.slane %v5501_v41, 7  ;;  %v526_v21 = vadd.f32 %v4855_v25, %v525_v31  ;;  %v5516_v18 = vmin.f32 %v1795_v56, 6.0  ;;  %v1780_v42 = vadd.f32 %v1772_v49, %v1764_v43 }
 0x15b   :  { %7959 = vst [vmem:[#allocation12_spill] sm:$0xff] %v5504_v61  ;;  %v1192_v1 = vadd.f32 %v5485_v5, %v1191_v24  ;;  %v440_v36 = vpop.f32.mrf.mxu0  ;;  %v5523_v28 = vsel %vm911_vm3, %v5448_v26, %v5504_v61  ;;  %v1640_v51 = vmul.f32 %v4926_v46, %v5379_v53  ;;  %v1641_v54 = vmul.f32 %v4926_v46, %v5402_v52 }
 0x15c   :  { %v441_v19 = vadd.f32 %v4855_v25, %v440_v36  ;;  %v1719_v50 = vsel %vm937_vm4, %v5513_v23, %v5213_v59  ;;  %v594_v9 = vmax.f32 %v526_v21, 0.0  ;;  %v7960_v49 = vpack.c.bf16 %v5268_v16, %v5263_v39 }
 0x15d   :  { %v1208_v27 = vmax.f32 %v1192_v1, 0.0  ;;  %v1720_v40 = vmul.f32 %v5119_v17, %v1719_v50  ;;  %v1712_v46 = vmul.f32 %v5019_v44, %v5523_v28  ;;  %v1788_v8 = vadd.f32 %v5227_v2, %v1780_v42 }
 0x15e   :  { %3760 = vmatmul.msk.bf16.gmra.mxu2 %vm661_vm2, %v7960_v49  ;;  %v560_v32 = vmax.f32 %v441_v19, 0.0  ;;  %v658_v56 = vmin.f32 %v594_v9, 6.0  ;;  %v1646_v59 = vsel %vm911_vm3, %v5448_v26, %v5037_v47  ;;  %v1653_v43 = vmul.f32 %v4941_v0, %v5460_v29  ;;  %v528_v9 = vpop.f32.mrf.mxu3 }
 0x15f   :  { %v1216_v39 = vmin.f32 %v1208_v27, 6.0  ;;  %v1744_v16 = vadd.f32 %v1720_v40, %v5443_v30  ;;  %v1741_v31 = vadd.f32 %v1712_v46, %v5440_v57  ;;  %v1796_v24 = vmax.f32 %v1788_v8, 0.0  ;;  %v7961_v30 = vld [vmem:[#allocation10_spill] sm:$0xff]  ;;  %v7962_v46 = vld [vmem:[#allocation19_spill] sm:$0xff] }
 0x160   :  { %v624_v21 = vmin.f32 %v560_v32, 6.0  ;;  %729 = vst.msk [vmem:[#allocation2 + $0x208] sm:$0xff] %vm661_vm2, %v658_v56  ;;  %v1654_v42 = vmul.f32 %v4941_v0, %v1646_v59  ;;  %v1666_v1 = vmul.f32 %v4955_v7, %v5428_v6  ;;  %v1667_v47 = vmul.f32 %v4955_v7, %v5466_v14 }
 0x161   :  { %v5559_v26 = vsel %vm1222_vm13, %v1216_v39, 0.0  ;;  %v1768_v36 = vmul.f32 %v1744_v16, %v4488_v35  ;;  %v1757_v19 = vmul.f32 %v1741_v31, %v7961_v30  ;;  %v5563_v57 = vmin.f32 %v1796_v24, 6.0  ;;  %v5788_v30 = vld [vmem:[#allocation2 + $0x160] sm:$0xff] }
 0x162   :  { %695 = vst.msk [vmem:[#allocation2 + $0xe8] sm:$0xff] %vm661_vm2, %v624_v21  ;;  %v1193_v50 = vpop.f32.mrf.mxu2  ;;  %v1674_v0 = vadd.f32 %v1640_v51, %v5472_v20  ;;  %v1675_v27 = vadd.f32 %v1641_v54, %v1583_v60  ;;  %v1682_v6 = vadd.f32 %v1653_v43, %v1606_v62  ;;  %v1683_v49 = vadd.f32 %v1654_v42, %v1607_v13  ;;  %v7963_v42 = vld [vmem:[#allocation11_spill] sm:$0xff] }
 0x163   :  { %v1194_v7 = vadd.f32 %v5485_v5, %v1193_v50  ;;  %v443_v40 = vpop.f32.mrf.mxu0  ;;  %v1776_v8 = vadd.f32 %v1768_v36, %v7962_v46  ;;  %v529_v32 = vadd.f32 %v4855_v25, %v528_v9  ;;  %v1765_v56 = vadd.f32 %v1757_v19, %v5479_v4  ;;  %7975 = vst [vmem:[#allocation24_spill] sm:$0xff] %v5788_v30 }
 0x164   :  { %v444_v59 = vadd.f32 %v4855_v25, %v443_v40  ;;  %v1690_v39 = vadd.f32 %v1666_v1, %v1630_v55  ;;  %v1691_v16 = vadd.f32 %v1667_v47, %v1631_v11  ;;  %v1700_v31 = vmul.f32 %v5010_v15, %v5497_v48 }
 0x165   :  { %v1209_v20 = vmax.f32 %v1194_v7, 0.0  ;;  %v1784_v60 = vadd.f32 %v5227_v2, %v1776_v8  ;;  %v595_v62 = vmax.f32 %v529_v32, 0.0  ;;  %v1781_v13 = vadd.f32 %v1765_v56, %v5487_v10 }
 0x166   :  { %v561_v51 = vmax.f32 %v444_v59, 0.0  ;;  %v1701_v54 = vmul.f32 %v5010_v15, %v5501_v41  ;;  %v5579_v43 = vrot.slane %v5501_v41, 1  ;;  %v5582_v25 = vrot.slane %v5497_v48, 7 }
 0x167   :  { %v1217_v4 = vmin.f32 %v1209_v20, 6.0  ;;  %v1792_v55 = vmax.f32 %v1784_v60, 0.0  ;;  %v659_v11 = vmin.f32 %v595_v62, 6.0  ;;  %v1789_v24 = vadd.f32 %v5227_v2, %v1781_v13  ;;  %v7964_v60 = vld [vmem:[#allocation18_spill] sm:$0xff]  ;;  %v530_v13 = vpop.f32.mrf.mxu3 }
 0x168   :  { %v625_v21 = vmin.f32 %v561_v51, 6.0  ;;  %v5589_v10 = vsel %vm911_vm3, %v5504_v61, %v5579_v43  ;;  %v1706_v15 = vsel %vm911_vm3, %v5579_v43, %v7963_v42  ;;  %v5599_v1 = vsel %vm937_vm4, %v5582_v25, %v5513_v23 }
 0x169   :  { %v5602_v47 = vsel %vm1222_vm13, %v1217_v4, 0.0  ;;  %v1800_v36 = vmin.f32 %v1792_v55, 6.0  ;;  %730 = vst.msk [vmem:[#allocation2 + $0x210] sm:$0xff] %vm661_vm2, %v659_v11  ;;  %v1797_v19 = vmax.f32 %v1789_v24, 0.0  ;;  %v1713_v50 = vmul.f32 %v5019_v44, %v5589_v10 }
 0x16a   :  { %696 = vst.msk [vmem:[#allocation2 + $0xf0] sm:$0xff] %vm661_vm2, %v625_v21  ;;  %v1186_v9 = vpop.f32.mrf.mxu1  ;;  %v1196_v7 = vpop.f32.mrf.mxu2  ;;  %v1714_v40 = vmul.f32 %v5019_v44, %v1706_v15  ;;  %v5613_v46 = vsel %vm937_vm4, %v5415_v58, %v5582_v25  ;;  %v1727_v8 = vmul.f32 %v5119_v17, %v5599_v1  ;;  %v1734_v32 = vadd.f32 %v1700_v31, %v1674_v0  ;;  %v5625_v44 = vld [vmem:[%s7715_s2] ss:$0 sm:$0xff] }
 0x16b   :  { %v1187_v56 = vadd.f32 %v5485_v5, %v1186_v9  ;;  %v1197_v59 = vadd.f32 %v5485_v5, %v1196_v7  ;;  %v445_v20 = vpop.f32.mrf.mxu0  ;;  %v1808_v62 = vpack.c.bf16 %v7964_v60, %v1800_v36  ;;  %v5620_v51 = vmin.f32 %v1797_v19, 6.0 }
 0x16c   :  { %v446_v58 = vadd.f32 %v5625_v44, %v445_v20  ;;  %v531_v4 = vadd.f32 %v5625_v44, %v530_v13  ;;  %v1726_v0 = vmul.f32 %v5119_v17, %v5613_v46  ;;  %v1735_v31 = vadd.f32 %v1701_v54, %v1675_v27  ;;  %v5634_v13 = vld [vmem:[#allocation2 + $0xe0] sm:$0xff] }
 0x16d   :  { %v1206_v55 = vmax.f32 %v1187_v56, 0.0  ;;  %v1210_v11 = vmax.f32 %v1197_v59, 0.0  ;;  %3761 = vmatmul.msk.bf16.vlgmr.msrb.gmra.mxu3 %vm661_vm2, %v1808_v62  ;;  %v1742_v21 = vadd.f32 %v1713_v50, %v1682_v6  ;;  %v1743_v36 = vadd.f32 %v1714_v40, %v1683_v49  ;;  %v7965_v54 = vld [vmem:[#allocation15_spill] sm:$0xff]  ;;  %v7966_v59 = vld [vmem:[#allocation14_spill] sm:$0xff] }
 0x16e   :  { %v562_v42 = vmax.f32 %v446_v58, 0.0  ;;  %v596_v15 = vmax.f32 %v531_v4, 0.0  ;;  %v1750_v19 = vadd.f32 %v1726_v0, %v1690_v39  ;;  %v1751_v20 = vadd.f32 %v1727_v8, %v1691_v16 }
 0x16f   :  { %v1214_v9 = vmin.f32 %v1206_v55, 6.0  ;;  %v1218_v7 = vmin.f32 %v1210_v11, 6.0  ;;  %v1766_v60 = vadd.f32 %v1742_v21, %v1734_v32  ;;  %v1759_v56 = vmul.f32 %v1743_v36, %v7965_v54 }
 0x170   :  { %v626_v3 = vmin.f32 %v562_v42, 6.0  ;;  %v660_v27 = vmin.f32 %v596_v15, 6.0  ;;  %v1774_v62 = vmul.f32 %v1750_v19, %v7966_v59  ;;  %v1899_v49 = vmul.f32 %v5042_v12, %v5379_v53  ;;  %v5678_v42 = vld [vmem:[%s7716_s3 + $0x4] ss:$0 sm:$0xff]  ;;  %v2538_v59 = vld [vmem:[#allocation2 + $0x150] sm:$0xff] }
 0x171   :  { %v1223_v61 = vsel %vm1222_vm13, %v1214_v9, 0.0  ;;  %v5640_v6 = vsel %vm1222_vm13, %v1218_v7, 0.0  ;;  %v1900_v39 = vmul.f32 %v5042_v12, %v5402_v52  ;;  %v1767_v40 = vadd.f32 %v1759_v56, %v1735_v31  ;;  %v5683_v9 = vld [vmem:[#allocation2 + $0xe8] sm:$0xff] }
 0x172   :  { %697 = vst.msk [vmem:[#allocation2 + $0xf8] sm:$0xff] %vm661_vm2, %v626_v3  ;;  %v1188_v16 = vpop.f32.mrf.mxu1  ;;  %v1198_v50 = vpop.f32.mrf.mxu2  ;;  %v1782_v8 = vadd.f32 %v1774_v62, %v1766_v60  ;;  %v5648_v32 = vrot.slane %v5634_v13, 1  ;;  %v1923_v58 = vmul.f32 %v5072_v37, %v5460_v29  ;;  %v1924_v12 = vmul.f32 %v5072_v37, %v5523_v28  ;;  %v5671_v37 = vld [vmem:[%s7716_s3] ss:$0 sm:$0xff] }
 0x173   :  { %v1189_v4 = vadd.f32 %v5485_v5, %v1188_v16  ;;  %v1199_v0 = vadd.f32 %v5485_v5, %v1198_v50  ;;  %v448_v53 = vpop.f32.mrf.mxu0  ;;  %731 = vst.msk [vmem:[#allocation2 + $0x218] sm:$0xff] %vm661_vm2, %v660_v27  ;;  %v5658_v52 = vrot.slane %v5634_v13, 7  ;;  %v1783_v31 = vadd.f32 %v1767_v40, %v1751_v20  ;;  %v5701_v40 = vld [vmem:[%s7716_s3 + $0x3] ss:$0 sm:$0xff] }
 0x174   :  { %7967 = vst [vmem:[#allocation19_spill] sm:$0xff] %v5648_v32  ;;  %v449_v3 = vadd.f32 %v5625_v44, %v448_v53  ;;  %v1790_v55 = vadd.f32 %v5227_v2, %v1782_v8  ;;  %v5666_v29 = vsel %vm911_vm3, %v5579_v43, %v5648_v32  ;;  %v1948_v28 = vmul.f32 %v5671_v37, %v5466_v14  ;;  %v5690_v14 = vld [vmem:[%s7716_s3 + $0x5] ss:$0 sm:$0xff] }
 0x175   :  { %v1207_v11 = vmax.f32 %v1189_v4, 0.0  ;;  %v1211_v21 = vmax.f32 %v1199_v0, 0.0  ;;  %v1957_v15 = vmul.f32 %v5678_v42, %v5497_v48  ;;  %v1791_v36 = vadd.f32 %v5227_v2, %v1783_v31  ;;  %v5709_v31 = vld [vmem:[#allocation2 + $0xf0] sm:$0xff] }
 0x176   :  { %v563_v43 = vmax.f32 %v449_v3, 0.0  ;;  %v1798_v19 = vmax.f32 %v1790_v55, 0.0  ;;  %v1958_v7 = vmul.f32 %v5678_v42, %v5501_v41  ;;  %v1970_v27 = vmul.f32 %v5690_v14, %v5589_v10  ;;  %7968 = vst [vmem:[#allocation11_spill] sm:$0xff] %v5709_v31 }
 0x177   :  { %v1215_v20 = vmin.f32 %v1207_v11, 6.0  ;;  %v1219_v60 = vmin.f32 %v1211_v21, 6.0  ;;  %v1971_v56 = vmul.f32 %v5690_v14, %v5666_v29  ;;  %v1799_v16 = vmax.f32 %v1791_v36, 0.0 }
 0x178   :  { %v627_v62 = vmin.f32 %v563_v43, 6.0  ;;  %v5696_v50 = vmin.f32 %v1798_v19, 6.0  ;;  %v1984_v8 = vmul.f32 %v5701_v40, %v5599_v1  ;;  %v1912_v53 = vrot.slane %v5683_v9, 1 }
 0x179   :  { %v1224_v4 = vsel %vm1222_vm13, %v1215_v20, 0.0  ;;  %v1232_v0 = vsel %vm1222_vm13, %v1219_v60, 0.0  ;;  %v7747_v3 = vrot.slane %v5683_v9, 7  ;;  %v5711_v55 = vld [vmem:[#allocation2 + $0xf8] sm:$0xff]  ;;  %v5714_v43 = vmin.f32 %v1799_v16, 6.0 }
 0x17a   :  { %7969 = vst [vmem:[#allocation18_spill] sm:$0xff] %v5711_v55  ;;  %v1225_v11 = vadd.f32 %v1224_v4, %v1223_v61  ;;  %v1201_v21 = vpop.f32.mrf.mxu2  ;;  %v1991_v36 = vadd.f32 %v1957_v15, %v1899_v49  ;;  %v1992_v19 = vadd.f32 %v1958_v7, %v1900_v39  ;;  %v5720_v60 = vsel %vm911_vm3, %v5648_v32, %v1912_v53 }
 0x17b   :  { %698 = vst.msk [vmem:[#allocation2 + $0x100] sm:$0xff] %vm661_vm2, %v627_v62  ;;  %v1202_v20 = vadd.f32 %v5485_v5, %v1201_v21  ;;  %v450_v24 = vpop.f32.mrf.mxu0  ;;  %v5727_v61 = vsel %vm937_vm4, %v5658_v52, %v7747_v3  ;;  %v1999_v62 = vadd.f32 %v1970_v27, %v1923_v58  ;;  %v2000_v15 = vadd.f32 %v1971_v56, %v1924_v12  ;;  %v5747_v12 = vld [vmem:[%s7716_s3 + $0x7] ss:$0 sm:$0xff] }
 0x17c   :  { %7970 = vst [vmem:[#allocation20_spill] sm:$0xff] %v5727_v61  ;;  %v1227_v16 = vadd.f32 %v5559_v26, %v1225_v11  ;;  %v451_v49 = vadd.f32 %v5625_v44, %v450_v24  ;;  %v7971_v4 = vpack.c.bf16 %v5516_v18, %v5445_v63  ;;  %v7748_v21 = vrot.slane %v5709_v31, 1  ;;  %v5742_v24 = vld [vmem:[#allocation2 + $0x118] sm:$0xff] }
 0x17d   :  { %v1212_v7 = vmax.f32 %v1202_v20, 0.0  ;;  %v5739_v3 = vrot.slane %v5711_v55, 7  ;;  %v2008_v58 = vadd.f32 %v1984_v8, %v1948_v28  ;;  %7973 = vst [vmem:[#allocation22_spill] sm:$0xff] %v5742_v24  ;;  %v2017_v63 = vmul.f32 %v5747_v12, %v5634_v13  ;;  %v5766_v8 = vld [vmem:[%s7716_s3 + $0x8] ss:$0 sm:$0xff] }
 0x17e   :  { %3762 = vmatmul.msk.bf16.gmra.mxu3 %vm661_vm2, %v7971_v4  ;;  %v1229_v26 = vadd.f32 %v5602_v47, %v1227_v16  ;;  %v564_v27 = vmax.f32 %v451_v49, 0.0  ;;  %v2018_v18 = vmul.f32 %v5747_v12, %v5683_v9  ;;  %v5757_v47 = vsel %vm911_vm3, %v1912_v53, %v7748_v21 }
 0x17f   :  { %7972 = vst [vmem:[#allocation21_spill] sm:$0xff] %v5739_v3  ;;  %v1220_v56 = vmin.f32 %v1212_v7, 6.0  ;;  %v1946_v28 = vsel %vm937_vm4, %v5739_v3, %v5411_v34  ;;  %v2030_v11 = vmul.f32 %v5766_v8, %v5720_v60  ;;  %v2031_v53 = vmul.f32 %v5766_v8, %v5757_v47 }
 0x180   :  { %v1231_v20 = vadd.f32 %v5640_v6, %v1229_v26  ;;  %v628_v16 = vmin.f32 %v564_v27, 6.0  ;;  %v5772_v49 = vmul.f32 %v5671_v37, %v1946_v28  ;;  %v5778_v34 = vrot.slane %v5742_v24, 7 }
 0x181   :  { %v1234_v7 = vsel %vm1222_vm13, %v1220_v56, 0.0  ;;  %v2044_v4 = vmul.f32 %v5119_v17, %v5727_v61  ;;  %v2051_v21 = vadd.f32 %v2017_v63, %v1991_v36  ;;  %v2052_v26 = vadd.f32 %v2018_v18, %v1992_v19  ;;  %v7976_v63 = vld [vmem:[#allocation7_spill] sm:$0xff] }
 0x182   :  { %7974 = vst [vmem:[#allocation23_spill] sm:$0xff] %v5778_v34  ;;  %v1233_v39 = vadd.f32 %v1232_v0, %v1231_v20  ;;  %v1203_v6 = vpop.f32.mrf.mxu2  ;;  %v2059_v27 = vadd.f32 %v2030_v11, %v1999_v62  ;;  %v2060_v28 = vadd.f32 %v2031_v53, %v2000_v15  ;;  %v2042_v56 = vsel %vm937_vm4, %v5778_v34, %v5658_v52  ;;  %v5793_v0 = vld [vmem:[%s7716_s3 + $0x1] ss:$0 sm:$0xff]  ;;  %v5801_v11 = vld [vmem:[#allocation2 + $0x168] sm:$0xff] }
 0x183   :  { %699 = vst.msk [vmem:[#allocation2 + $0x108] sm:$0xff] %vm661_vm2, %v628_v16  ;;  %v1204_v54 = vadd.f32 %v5485_v5, %v1203_v6  ;;  %v453_v32 = vpop.f32.mrf.mxu0  ;;  %v2068_v33 = vadd.f32 %v2044_v4, %v2008_v58  ;;  %v5796_v36 = vmul.f32 %v5793_v0, %v2538_v59  ;;  %v2043_v15 = vmul.f32 %v5119_v17, %v2042_v56  ;;  %v5803_v58 = vld [vmem:[#allocation2 + $0x170] sm:$0xff]  ;;  %v5805_v20 = vld [vmem:[#allocation2 + $0x180] sm:$0xff] }
 0x184   :  { %v1235_v19 = vadd.f32 %v1234_v7, %v1233_v39  ;;  %v454_v62 = vadd.f32 %v5625_v44, %v453_v32  ;;  %v2076_v18 = vmul.f32 %v2060_v28, %v7976_v63  ;;  %7977 = vst [vmem:[#allocation25_spill] sm:$0xff] %v5801_v11  ;;  %v5807_v53 = vadd.f32 %v2059_v27, %v2051_v21  ;;  %v5814_v7 = vld [vmem:[#allocation2 + $0x178] sm:$0xff] }
 0x185   :  { %7978 = vst [vmem:[#allocation26_spill] sm:$0xff] %v5805_v20  ;;  %v1213_v16 = vmax.f32 %v1204_v54, 0.0  ;;  %v5810_v4 = vmul.f32 %v5793_v0, %v2539_v45  ;;  %v5812_v6 = vrot.slane %v2538_v59, 1  ;;  %v5816_v17 = vrot.slane %v2539_v45, 1 }
 0x186   :  { %v565_v39 = vmax.f32 %v454_v62, 0.0  ;;  %v2084_v32 = vadd.f32 %v2076_v18, %v2052_v26  ;;  %v5819_v28 = vrot.slane %v5788_v30, 1  ;;  %v2557_v5 = vrot.slane %v5801_v11, 1 }
 0x187   :  { %7979 = vst [vmem:[#allocation27_spill] sm:$0xff] %v5812_v6  ;;  %v1221_v56 = vmin.f32 %v1213_v16, 6.0  ;;  %v5823_v54 = vrot.slane %v5803_v58, 1  ;;  %v2559_v21 = vrot.slane %v5814_v7, 1  ;;  %v7987_v24 = vrot.slane %v5805_v20, 1  ;;  %v5933_v20 = vld [vmem:[#allocation2 + $0x198] sm:$0xff] }
 0x188   :  { %7980 = vst [vmem:[#allocation28_spill] sm:$0xff] %v5816_v17  ;;  %v629_v27 = vmin.f32 %v565_v39, 6.0  ;;  %v2100_v34 = vadd.f32 %v2084_v32, %v2068_v33  ;;  %v2567_v26 = vsel %vm911_vm3, %v5816_v17, %v5819_v28  ;;  %v5847_v39 = vsel %vm911_vm3, %v5819_v28, %v2557_v5 }
 0x189   :  { %7981 = vst [vmem:[#allocation29_spill] sm:$0xff] %v5819_v28  ;;  %v1236_v18 = vsel %vm1222_vm13, %v1221_v56, 0.0  ;;  %v5837_v16 = vsel %vm911_vm3, %v5823_v54, %v2559_v21  ;;  %v5842_v33 = vsel %vm911_vm3, %v2557_v5, %v5823_v54  ;;  %v5858_v61 = vsel %vm911_vm3, %v2559_v21, %v7987_v24 }
 0x18a   :  { %7982 = vst [vmem:[#allocation30_spill] sm:$0xff] %v5823_v54  ;;  %v5832_v22 = vld [vmem:[#allocation2 + $0x108] sm:$0xff]  ;;  %v1237_v32 = vadd.f32 %v1236_v18, %v1235_v19  ;;  %v2108_v62 = vadd.f32 %v5227_v2, %v2100_v34  ;;  %v5864_v5 = vsel %vm911_vm3, %v5812_v6, %v5816_v17  ;;  %v5869_v19 = vld [vmem:[%s7716_s3 + $0x2] ss:$0 sm:$0xff]  ;;  %v5874_v18 = vrot.slane %v2539_v45, 7 }
 0x18b   :  { %7983 = vst [vmem:[#allocation31_spill] sm:$0xff] %v5832_v22  ;;  %v5851_v56 = vrot.slane %v5832_v22, 7  ;;  %v455_v54 = vpop.f32.mrf.mxu0  ;;  %v2571_v34 = vmul.f32 %v5869_v19, %v2567_v26  ;;  %v7991_v6 = vpack.c.bf16 %v5620_v51, %v5563_v57  ;;  %v2570_v45 = vmul.f32 %v5869_v19, %v5864_v5 }
 0x18c   :  { %7984 = vst [vmem:[#allocation32_spill] sm:$0xff] %v5842_v33  ;;  %v1238_v24 = vrot.slane %v1237_v32, 4  ;;  %v456_v21 = vadd.f32 %v5625_v44, %v455_v54  ;;  %v2116_v17 = vmax.f32 %v2108_v62, 0.0  ;;  %v5892_v44 = vrot.slane %v5801_v11, 7  ;;  %v5894_v54 = vld [vmem:[#allocation2 + $0x188] sm:$0xff] }
 0x18d   :  { %7985 = vst [vmem:[#allocation33_spill] sm:$0xff] %v5847_v39  ;;  %v1982_v28 = vsel %vm937_vm4, %v5851_v56, %v5582_v25  ;;  %v5899_v57 = vrot.slane %v5803_v58, 7 }
 0x18e   :  { %700 = vst.msk [vmem:[#allocation2 + $0x120] sm:$0xff] %vm661_vm2, %v629_v27  ;;  %v5872_v27 = vrot.slane %v2538_v59, 7  ;;  %3763 = vmatmul.msk.bf16.gmra.mxu3 %vm661_vm2, %v7991_v6  ;;  %v1983_v26 = vmul.f32 %v5701_v40, %v1982_v28  ;;  %v5889_v59 = vrot.slane %v5788_v30, 7  ;;  %v1239_v25 = vadd.f32 %v1238_v24, %v1237_v32 }
 0x18f   :  { %7986 = vst [vmem:[#allocation34_spill] sm:$0xff] %v5851_v56  ;;  %v566_v62 = vmax.f32 %v456_v21, 0.0  ;;  %v5896_v56 = vmin.f32 %v2116_v17, 6.0  ;;  %v7775_v6 = vrot.slane %v5814_v7, 7  ;;  %v5904_v28 = vrot.slane %v5894_v54, 7 }
 0x190   :  { %7988 = vst [vmem:[#allocation35_spill] sm:$0xff] %v5864_v5  ;;  %v2007_v51 = vadd.f32 %v1983_v26, %v5772_v49  ;;  %v5910_v5 = vsel %vm937_vm4, %v5889_v59, %v5892_v44  ;;  %v1240_v32 = vrot.slane %v1239_v25, 2  ;;  %v5916_v17 = vsel %vm937_vm4, %v5872_v27, %v5874_v18 }
 0x191   :  { %7989 = vst [vmem:[#allocation36_spill] sm:$0xff] %v5872_v27  ;;  %v630_v24 = vmin.f32 %v566_v62, 6.0  ;;  %v2604_v49 = vmul.f32 %v5678_v42, %v5788_v30  ;;  %v5925_v26 = vsel %vm937_vm4, %v5899_v57, %v7775_v6  ;;  %v2593_v62 = vsel %vm937_vm4, %v5904_v28, %v5872_v27 }
 0x192   :  { %7990 = vst [vmem:[#allocation37_spill] sm:$0xff] %v5874_v18  ;;  %v2067_v21 = vadd.f32 %v2043_v15, %v2007_v51  ;;  %v2595_v22 = vmul.f32 %v5671_v37, %v5916_v17  ;;  %v2594_v15 = vmul.f32 %v5671_v37, %v2593_v62  ;;  %v2605_v51 = vmul.f32 %v5678_v42, %v5801_v11 }
 0x193   :  { %7992 = vst [vmem:[#allocation38_spill] sm:$0xff] %v5892_v44  ;;  %v2617_v6 = vmul.f32 %v5690_v14, %v5847_v39  ;;  %v2618_v27 = vmul.f32 %v5690_v14, %v5842_v33 }
 0x194   :  { %7993 = vst [vmem:[#allocation39_spill] sm:$0xff] %v5894_v54  ;;  %v1241_v54 = vadd.f32 %v1240_v32, %v1239_v25  ;;  %v2091_v30 = vmul.f32 %v2067_v21, %v4488_v35  ;;  %v2631_v25 = vmul.f32 %v5701_v40, %v5910_v5  ;;  %v2639_v62 = vadd.f32 %v2605_v51, %v5810_v4 }
 0x195   :  { %7994 = vst [vmem:[#allocation40_spill] sm:$0xff] %v5904_v28  ;;  %v2646_v28 = vadd.f32 %v2617_v6, %v2570_v45  ;;  %v2647_v33 = vadd.f32 %v2618_v27, %v2571_v34  ;;  %v2665_v4 = vmul.f32 %v5747_v12, %v5814_v7  ;;  %v5974_v45 = vld [vmem:[%s7716_s3 + $0x6] ss:$0 sm:$0xff] }
 0x196   :  { %7995 = vst [vmem:[#allocation41_spill] sm:$0xff] %v5910_v5  ;;  %v1242_v32 = vrot.slane %v1241_v54, 1  ;;  %v2099_v11 = vadd.f32 %v2091_v30, %v5807_v53  ;;  %v2655_v39 = vadd.f32 %v2631_v25, %v2595_v22  ;;  %v5959_v5 = vld [vmem:[#allocation2 + $0x1a8] sm:$0xff]  ;;  %v2677_v53 = vmul.f32 %v5766_v8, %v5837_v16 }
 0x197   :  { %7996 = vst [vmem:[#allocation42_spill] sm:$0xff] %v5916_v17  ;;  %v5945_v17 = vrot.slane %v5933_v20, 7  ;;  %v2678_v22 = vmul.f32 %v5766_v8, %v5858_v61  ;;  %v7790_v34 = vrot.slane %v5959_v5, 7 }
 0x198   :  { %7997 = vst [vmem:[#allocation43_spill] sm:$0xff] %v5933_v20  ;;  %v5956_v20 = vadd.f32 %v1242_v32, %v1241_v54  ;;  %v2107_v30 = vadd.f32 %v5227_v2, %v2099_v11  ;;  %v2691_v54 = vmul.f32 %v5974_v45, %v5925_v26  ;;  %v2706_v51 = vadd.f32 %v2677_v53, %v2646_v28 }
 0x199   :  { %701 = vst.msk [vmem:[#allocation2 + $0x128] sm:$0xff] %vm661_vm2, %v630_v24  ;;  %v2638_v24 = vadd.f32 %v2604_v49, %v5796_v36  ;;  %v2629_v21 = vsel %vm937_vm4, %v5945_v17, %v5889_v59  ;;  %v2664_v36 = vmul.f32 %v5747_v12, %v5803_v58  ;;  %v2699_v49 = vadd.f32 %v2665_v4, %v2639_v62 }
 0x19a   :  { %7998 = vst [vmem:[#allocation44_spill] sm:$0xff] %v5945_v17  ;;  %v2630_v44 = vmul.f32 %v5701_v40, %v2629_v21  ;;  %v2115_v2 = vmax.f32 %v2107_v30, 0.0  ;;  %v2689_v11 = vsel %vm937_vm4, %v7790_v34, %v5899_v57  ;;  %v2707_v25 = vadd.f32 %v2678_v22, %v2647_v33 }
 0x19b   :  { %7999 = vst [vmem:[#allocation45_spill] sm:$0xff] %v5956_v20  ;;  %v2698_v6 = vadd.f32 %v2664_v36, %v2638_v24  ;;  %v1901_v32 = vmul.f32 %v5793_v0, %v5497_v48  ;;  %v1902_v21 = vmul.f32 %v5793_v0, %v5501_v41  ;;  %v5990_v4 = vrot.slane %v5711_v55, 1  ;;  %v6081_v20 = vld [vmem:[#allocation2 + $0x130] sm:$0xff] }
 0x19c   :  { %8000 = vst [vmem:[#allocation46_spill] sm:$0xff] %v5959_v5  ;;  %v2654_v27 = vadd.f32 %v2630_v44, %v2594_v15  ;;  %v2690_v44 = vmul.f32 %v5974_v45, %v2689_v11  ;;  %v2715_v15 = vadd.f32 %v2691_v54, %v2655_v39  ;;  %v2123_v24 = vmin.f32 %v2115_v2, 6.0  ;;  %v6083_v5 = vld [vmem:[#allocation2 + $0x138] sm:$0xff] }
 0x19d   :  { %v2723_v62 = vmul.f32 %v2707_v25, %v7976_v63  ;;  %v2730_v36 = vadd.f32 %v2706_v51, %v2698_v6  ;;  %8001 = vst [vmem:[#allocation47_spill] sm:$0xff] %v5990_v4  ;;  %v1925_v33 = vmul.f32 %v5869_v19, %v5589_v10  ;;  %v1926_v39 = vmul.f32 %v5869_v19, %v5666_v29  ;;  %v6015_v29 = vld [vmem:[#allocation2 + $0x100] sm:$0xff] }
 0x19e   :  { %v2714_v30 = vadd.f32 %v2690_v44, %v2654_v27  ;;  %v1937_v28 = vrot.slane %v5709_v31, 7  ;;  %v8002_v48 = vpack.c.bf16 %v5714_v43, %v5696_v50  ;;  %v2131_v41 = vpack.c.bf16 %v5896_v56, %v2123_v24  ;;  %8005 = vst [vmem:[#allocation49_spill] sm:$0xff] %v6015_v29  ;;  %v6046_v44 = vld [vmem:[%s7717_s4] ss:$0 sm:$0xff]  ;;  %v8009_v24 = vld [vmem:[#allocation20_spill] sm:$0xff] }
 0x19f   :  { %v2731_v53 = vadd.f32 %v2723_v62, %v2699_v49  ;;  %v8003_v22 = vrot.slane %v5709_v31, 1  ;;  %v6013_v10 = vsel %vm937_vm4, %v5513_v23, %v5658_v52  ;;  %v8007_v56 = vrot.slane %v5683_v9, 7  ;;  %8015 = vst [vmem:[#allocation56_spill] sm:$0xff] %v6081_v20 }
 0x1a0   :  { %3764 = vmatmul.msk.bf16.gmra.mxu3 %vm661_vm2, %v8002_v48  ;;  %v2738_v50 = vmul.f32 %v2714_v30, %v4488_v35  ;;  %v6021_v43 = vsel %vm937_vm4, %v1937_v28, %v5739_v3  ;;  %v1949_v6 = vmul.f32 %v5671_v37, %v5613_v46  ;;  %3765 = vmatmul.msk.bf16.vlgmr.msra.gmra.mxu1 %vm661_vm2, %v2131_v41  ;;  %v7791_v51 = vrot.slane %v6015_v29, 1 }
 0x1a1   :  { %v6007_v27 = vsel %vm911_vm3, %v8003_v22, %v5990_v4  ;;  %8006 = vst [vmem:[#allocation50_spill] sm:$0xff] %v6021_v43  ;;  %v6027_v54 = vsel %vm937_vm4, %v8007_v56, %v1937_v28  ;;  %v2747_v23 = vadd.f32 %v2731_v53, %v2715_v15  ;;  %v1950_v52 = vmul.f32 %v5671_v37, %v5599_v1 }
 0x1a2   :  { %8004 = vst [vmem:[#allocation48_spill] sm:$0xff] %v6007_v27  ;;  %v1959_v49 = vmul.f32 %v5678_v42, %v5634_v13  ;;  %v1960_v2 = vmul.f32 %v5678_v42, %v5683_v9  ;;  %v2746_v11 = vadd.f32 %v2738_v50, %v2730_v36  ;;  %v1972_v25 = vmul.f32 %v5690_v14, %v5720_v60 }
 0x1a3   :  { %8008 = vst [vmem:[#allocation51_spill] sm:$0xff] %v6027_v54  ;;  %v1973_v46 = vmul.f32 %v5690_v14, %v5757_v47  ;;  %v2755_v1 = vadd.f32 %v6046_v44, %v2747_v23  ;;  %v1985_v15 = vmul.f32 %v5701_v40, %v6013_v10  ;;  %v1986_v62 = vmul.f32 %v5701_v40, %v8009_v24 }
 0x1a4   :  { %v1993_v36 = vadd.f32 %v1959_v49, %v1901_v32  ;;  %v2754_v30 = vadd.f32 %v6046_v44, %v2746_v11  ;;  %v6059_v28 = vsel %vm911_vm3, %v5990_v4, %v7791_v51  ;;  %v1994_v48 = vadd.f32 %v1960_v2, %v1902_v21  ;;  %8016 = vst [vmem:[#allocation57_spill] sm:$0xff] %v6083_v5 }
 0x1a5   :  { %8010 = vst [vmem:[#allocation20_spill] sm:$0xff] %v6059_v28  ;;  %v2001_v41 = vadd.f32 %v1972_v25, %v1925_v33  ;;  %v2763_v53 = vmax.f32 %v2755_v1, 0.0  ;;  %v2002_v22 = vadd.f32 %v1973_v46, %v1926_v39  ;;  %v2009_v50 = vadd.f32 %v1985_v15, %v1949_v6  ;;  %v6073_v39 = vld [vmem:[#allocation2 + $0x110] sm:$0xff]  ;;  %v6075_v6 = vld [vmem:[#allocation2 + $0x140] sm:$0xff] }
 0x1a6   :  { %v2010_v56 = vadd.f32 %v1986_v62, %v1950_v52  ;;  %v2762_v23 = vmax.f32 %v2754_v30, 0.0  ;;  %v2019_v34 = vmul.f32 %v5747_v12, %v5709_v31  ;;  %v2020_v32 = vmul.f32 %v5747_v12, %v5711_v55  ;;  %8011 = vst [vmem:[#allocation52_spill] sm:$0xff] %v6073_v39  ;;  %v6077_v1 = vld [vmem:[#allocation2 + $0x120] sm:$0xff] }
 0x1a7   :  { %v2032_v49 = vmul.f32 %v5766_v8, %v6007_v27  ;;  %v2771_v11 = vmin.f32 %v2763_v53, 6.0  ;;  %v2033_v51 = vmul.f32 %v5766_v8, %v6059_v28  ;;  %v2045_v21 = vmul.f32 %v5974_v45, %v6027_v54  ;;  %8012 = vst [vmem:[#allocation53_spill] sm:$0xff] %v6075_v6  ;;  %v6079_v53 = vld [vmem:[#allocation2 + $0x128] sm:$0xff] }
 0x1a8   :  { %v2046_v33 = vmul.f32 %v5974_v45, %v6021_v43  ;;  %v2770_v52 = vmin.f32 %v2762_v23, 6.0  ;;  %v2053_v2 = vadd.f32 %v2019_v34, %v1993_v36  ;;  %v2054_v25 = vadd.f32 %v2020_v32, %v1994_v48  ;;  %8013 = vst [vmem:[#allocation54_spill] sm:$0xff] %v6077_v1  ;;  %v8017_v23 = vld [vmem:[#allocation22_spill] sm:$0xff] }
 0x1a9   :  { %v2061_v46 = vadd.f32 %v2032_v49, %v2001_v41  ;;  %v2062_v15 = vadd.f32 %v2033_v51, %v2002_v22  ;;  %v2069_v62 = vadd.f32 %v2045_v21, %v2009_v50  ;;  %8014 = vst [vmem:[#allocation55_spill] sm:$0xff] %v6079_v53  ;;  %v2223_v4 = vmul.f32 %v5793_v0, %v6073_v39  ;;  %v8019_v51 = vld [vmem:[#allocation8_spill] sm:$0xff]  ;;  %v8020_v41 = vld [vmem:[#allocation6_spill] sm:$0xff] }
 0x1aa   :  { %v2070_v30 = vadd.f32 %v2046_v33, %v2010_v56  ;;  %v2778_v17 = vpack.c.bf16 %v2771_v11, %v2770_v52  ;;  %v2224_v34 = vmul.f32 %v5793_v0, %v8017_v23  ;;  %v6090_v36 = vrot.slane %v6073_v39, 1 }
 0x1ab   :  { %v2085_v3 = vadd.f32 %v2061_v46, %v2053_v2  ;;  %v2078_v48 = vmul.f32 %v2062_v15, %v8019_v51  ;;  %v2093_v22 = vmul.f32 %v2069_v62, %v8020_v41  ;;  %v6095_v50 = vrot.slane %v8017_v23, 1 }
 0x1ac   :  { %8018 = vst [vmem:[#allocation22_spill] sm:$0xff] %v6090_v36  ;;  %v6098_v56 = vrot.slane %v6077_v1, 1  ;;  %v2234_v32 = vrot.slane %v6079_v53, 1  ;;  %v6102_v49 = vrot.slane %v6081_v20, 1  ;;  %v2236_v11 = vrot.slane %v6083_v5, 1 }
 0x1ad   :  { %8021 = vst [vmem:[#allocation58_spill] sm:$0xff] %v6095_v50  ;;  %v7797_v21 = vrot.slane %v6075_v6, 1  ;;  %v2086_v33 = vadd.f32 %v2078_v48, %v2054_v25  ;;  %v2101_v52 = vadd.f32 %v2093_v22, %v2085_v3  ;;  %v6114_v46 = vsel %vm911_vm3, %v6090_v36, %v6095_v50  ;;  %v8034_v36 = vld [vmem:[#allocation16_spill] sm:$0xff] }
 0x1ae   :  { %8022 = vst [vmem:[#allocation59_spill] sm:$0xff] %v6098_v56  ;;  %v2244_v2 = vsel %vm911_vm3, %v6095_v50, %v6098_v56  ;;  %v6125_v3 = vsel %vm911_vm3, %v6102_v49, %v2236_v11  ;;  %v6130_v25 = vsel %vm911_vm3, %v2234_v32, %v6102_v49  ;;  %v6135_v62 = vsel %vm911_vm3, %v6098_v56, %v2234_v32 }
 0x1af   :  { %8023 = vst [vmem:[#allocation60_spill] sm:$0xff] %v6102_v49  ;;  %v6120_v15 = vsel %vm911_vm3, %v2236_v11, %v7797_v21  ;;  %v2102_v23 = vadd.f32 %v2086_v33, %v2070_v30  ;;  %v2109_v48 = vadd.f32 %v6046_v44, %v2101_v52  ;;  %v2247_v22 = vmul.f32 %v5869_v19, %v6114_v46  ;;  %v6142_v21 = vld [vmem:[#allocation2 + $0x148] sm:$0xff] }
 0x1b0   :  { %8024 = vst [vmem:[#allocation61_spill] sm:$0xff] %v6114_v46  ;;  %3773 = vmatmul.msk.bf16.vlgmr.msra.gmra.mxu3 %vm661_vm2, %v2778_v17  ;;  %v2248_v11 = vmul.f32 %v5869_v19, %v2244_v2  ;;  %v6145_v49 = vrot.slane %v6073_v39, 7  ;;  %v6148_v50 = vrot.slane %v6077_v1, 7  ;;  %v7813_v32 = vrot.slane %v6079_v53, 7  ;;  %v1510_v56 = vpop.f32.mrf.mxu2  ;;  %v8032_v39 = vld [vmem:[#allocation23_spill] sm:$0xff] }
 0x1b1   :  { %8025 = vst [vmem:[#allocation62_spill] sm:$0xff] %v6120_v15  ;;  %v6152_v17 = vrot.slane %v6081_v20, 7  ;;  %v2110_v30 = vadd.f32 %v6046_v44, %v2102_v23  ;;  %v2117_v33 = vmax.f32 %v2109_v48, 0.0  ;;  %v6157_v2 = vrot.slane %v6142_v21, 7 }
 0x1b2   :  { %8026 = vst [vmem:[#allocation63_spill] sm:$0xff] %v6125_v3  ;;  %v6164_v46 = vsel %vm937_vm4, %v6148_v50, %v7813_v32  ;;  %v6170_v6 = vsel %vm937_vm4, %v6145_v49, %v8032_v39  ;;  %v2281_v23 = vmul.f32 %v5678_v42, %v6077_v1  ;;  %v2282_v48 = vmul.f32 %v5678_v42, %v6079_v53 }
 0x1b3   :  { %8027 = vst [vmem:[#allocation64_spill] sm:$0xff] %v6130_v25  ;;  %v2118_v52 = vmax.f32 %v2110_v30, 0.0  ;;  %v1511_v43 = vadd.f32 %v8034_v36, %v1510_v56  ;;  %v8035_v54 = vrot.slane %v6083_v5, 7  ;;  %v2270_v39 = vsel %vm937_vm4, %v6157_v2, %v6145_v49 }
 0x1b4   :  { %8028 = vst [vmem:[#allocation65_spill] sm:$0xff] %v6135_v62  ;;  %v2272_v1 = vmul.f32 %v5671_v37, %v6170_v6  ;;  %v2294_v30 = vmul.f32 %v5690_v14, %v6135_v62  ;;  %v2295_v56 = vmul.f32 %v5690_v14, %v6130_v25  ;;  %v2271_v29 = vmul.f32 %v5671_v37, %v2270_v39 }
 0x1b5   :  { %8029 = vst [vmem:[#allocation66_spill] sm:$0xff] %v6142_v21  ;;  %v2125_v21 = vmin.f32 %v2117_v33, 6.0  ;;  %v6182_v32 = vsel %vm937_vm4, %v6152_v17, %v8035_v54  ;;  %v2126_v33 = vmin.f32 %v2118_v52, 6.0  ;;  %v1530_v53 = vmax.f32 %v1511_v43, 0.0 }
 0x1b6   :  { %8030 = vst [vmem:[#allocation67_spill] sm:$0xff] %v6145_v49  ;;  %v2306_v54 = vsel %vm937_vm4, %v5874_v18, %v6148_v50  ;;  %v2316_v28 = vadd.f32 %v2282_v48, %v2224_v34  ;;  %v2323_v55 = vadd.f32 %v2294_v30, %v2247_v22  ;;  %v2324_v25 = vadd.f32 %v2295_v56, %v2248_v11  ;;  %v8037_v34 = vld [vmem:[#allocation38_spill] sm:$0xff] }
 0x1b7   :  { %8031 = vst [vmem:[#allocation68_spill] sm:$0xff] %v6157_v2  ;;  %v2307_v49 = vmul.f32 %v5701_v40, %v2306_v54  ;;  %v2315_v2 = vadd.f32 %v2281_v23, %v2223_v4  ;;  %v2132_v62 = vpack.c.bf16 %v2126_v33, %v2125_v21  ;;  %v1538_v27 = vmin.f32 %v1530_v53, 6.0  ;;  %v8038_v23 = vld [vmem:[#allocation24_spill] sm:$0xff]  ;;  %v8039_v33 = vld [vmem:[#allocation25_spill] sm:$0xff] }
 0x1b8   :  { %8033 = vst [vmem:[#allocation69_spill] sm:$0xff] %v6170_v6  ;;  %v2308_v6 = vmul.f32 %v5701_v40, %v6164_v46  ;;  %v2341_v39 = vmul.f32 %v5747_v12, %v6081_v20  ;;  %v2342_v31 = vmul.f32 %v5747_v12, %v6083_v5  ;;  %v2354_v4 = vmul.f32 %v5766_v8, %v6125_v3  ;;  %v8040_v3 = vld [vmem:[#allocation39_spill] sm:$0xff] }
 0x1b9   :  { %8036 = vst [vmem:[#allocation16_spill] sm:$0xff] %v6182_v32  ;;  %v2331_v52 = vadd.f32 %v2307_v49, %v2271_v29  ;;  %3766 = vmatmul.msk.bf16.gmra.mxu1 %vm661_vm2, %v2132_v62  ;;  %v1546_v54 = vsel %vm1222_vm13, %v1538_v27, 0.0  ;;  %v2355_v53 = vmul.f32 %v5766_v8, %v6120_v15  ;;  %v2366_v29 = vsel %vm937_vm4, %v8037_v34, %v6152_v17  ;;  %v1512_v62 = vpop.f32.mrf.mxu2 }
 0x1ba   :  { %v2332_v43 = vadd.f32 %v2308_v6, %v2272_v1  ;;  %v2367_v6 = vmul.f32 %v5974_v45, %v2366_v29  ;;  %v2368_v1 = vmul.f32 %v5974_v45, %v6182_v32  ;;  %v2375_v49 = vadd.f32 %v2341_v39, %v2315_v2 }
 0x1bb   :  { %v2376_v21 = vadd.f32 %v2342_v31, %v2316_v28  ;;  %v2383_v27 = vadd.f32 %v2354_v4, %v2323_v55  ;;  %v2384_v22 = vadd.f32 %v2355_v53, %v2324_v25  ;;  %v1513_v11 = vadd.f32 %v8034_v36, %v1512_v62  ;;  %v8042_v28 = vld [vmem:[#allocation33_spill] sm:$0xff]  ;;  %v8043_v25 = vld [vmem:[#allocation26_spill] sm:$0xff] }
 0x1bc   :  { %v2548_v48 = vmul.f32 %v5793_v0, %v8038_v23  ;;  %v2391_v30 = vadd.f32 %v2367_v6, %v2331_v52  ;;  %v2392_v56 = vadd.f32 %v2368_v1, %v2332_v43  ;;  %v2549_v15 = vmul.f32 %v5793_v0, %v8039_v33  ;;  %v8045_v43 = vld [vmem:[#allocation32_spill] sm:$0xff] }
 0x1bd   :  { %v6225_v29 = vrot.slane %v8040_v3, 1  ;;  %v2400_v32 = vmul.f32 %v2384_v22, %v7976_v63  ;;  %v2407_v2 = vadd.f32 %v2383_v27, %v2375_v49  ;;  %v1531_v31 = vmax.f32 %v1513_v11, 0.0  ;;  %v6251_v27 = vld [vmem:[#allocation2 + $0x190] sm:$0xff]  ;;  %v8047_v11 = vld [vmem:[#allocation40_spill] sm:$0xff] }
 0x1be   :  { %v2572_v55 = vmul.f32 %v5869_v19, %v8042_v28  ;;  %v2415_v36 = vmul.f32 %v2391_v30, %v4488_v35  ;;  %v8044_v39 = vrot.slane %v8043_v25, 1  ;;  %v2573_v4 = vmul.f32 %v5869_v19, %v8045_v43  ;;  %8046 = vst [vmem:[#allocation25_spill] sm:$0xff] %v6251_v27 }
 0x1bf   :  { %8041 = vst [vmem:[#allocation24_spill] sm:$0xff] %v6225_v29  ;;  %v2584_v53 = vrot.slane %v8043_v25, 7  ;;  %v2408_v6 = vadd.f32 %v2400_v32, %v2376_v21  ;;  %v1539_v1 = vmin.f32 %v1531_v31, 6.0  ;;  %v6245_v49 = vsel %vm937_vm4, %v8037_v34, %v5899_v57 }
 0x1c0   :  { %v6236_v52 = vsel %vm911_vm3, %v8044_v39, %v6225_v29  ;;  %v2591_v62 = vsel %vm937_vm4, %v5874_v18, %v5889_v59  ;;  %v2423_v22 = vadd.f32 %v2415_v36, %v2407_v2  ;;  %v8048_v32 = vrot.slane %v5814_v7, 7  ;;  %v8049_v59 = vld [vmem:[#allocation41_spill] sm:$0xff] }
 0x1c1   :  { %v6256_v23 = vsel %vm937_vm4, %v2584_v53, %v8047_v11  ;;  %v2596_v57 = vmul.f32 %v5671_v37, %v2591_v62  ;;  %v2424_v30 = vadd.f32 %v2408_v6, %v2392_v56  ;;  %v1547_v33 = vsel %vm1222_vm13, %v1539_v1, 0.0 }
 0x1c2   :  { %v6262_v21 = vsel %vm937_vm4, %v8048_v32, %v2584_v53  ;;  %v2597_v31 = vmul.f32 %v5671_v37, %v8049_v59  ;;  %v2606_v2 = vmul.f32 %v5678_v42, %v5803_v58  ;;  %v2431_v28 = vadd.f32 %v6046_v44, %v2423_v22 }
 0x1c3   :  { %v6271_v36 = vadd.f32 %v1547_v33, %v1546_v54  ;;  %v2607_v39 = vmul.f32 %v5678_v42, %v5814_v7  ;;  %v6276_v43 = vrot.slane %v6251_v27, 1  ;;  %v2432_v56 = vadd.f32 %v6046_v44, %v2424_v30 }
 0x1c4   :  { %v2619_v53 = vmul.f32 %v5690_v14, %v5837_v16  ;;  %v2620_v6 = vmul.f32 %v5690_v14, %v5858_v61  ;;  %v2632_v1 = vmul.f32 %v5701_v40, %v6245_v49  ;;  %v2439_v62 = vmax.f32 %v2431_v28, 0.0 }
 0x1c5   :  { %8050 = vst [vmem:[#allocation39_spill] sm:$0xff] %v6276_v43  ;;  %v6289_v54 = vsel %vm911_vm3, %v6225_v29, %v6276_v43  ;;  %v2633_v22 = vmul.f32 %v5701_v40, %v5925_v26  ;;  %v2640_v32 = vadd.f32 %v2606_v2, %v2548_v48  ;;  %v2440_v30 = vmax.f32 %v2432_v56, 0.0 }
 0x1c6   :  { %v2641_v33 = vadd.f32 %v2607_v39, %v2549_v15  ;;  %v2648_v59 = vadd.f32 %v2619_v53, %v2572_v55  ;;  %v2649_v18 = vadd.f32 %v2620_v6, %v2573_v4  ;;  %v2447_v34 = vmin.f32 %v2439_v62, 6.0 }
 0x1c7   :  { %v2656_v35 = vadd.f32 %v2632_v1, %v2596_v57  ;;  %v2657_v63 = vadd.f32 %v2633_v22, %v2597_v31  ;;  %v2666_v28 = vmul.f32 %v5747_v12, %v8043_v25  ;;  %v2448_v11 = vmin.f32 %v2440_v30, 6.0 }
 0x1c8   :  { %v2667_v27 = vmul.f32 %v5747_v12, %v8040_v3  ;;  %v2679_v29 = vmul.f32 %v5766_v8, %v6236_v52  ;;  %v2680_v48 = vmul.f32 %v5766_v8, %v6289_v54  ;;  %v2692_v15 = vmul.f32 %v5974_v45, %v6262_v21 }
 0x1c9   :  { %v2693_v55 = vmul.f32 %v5974_v45, %v6256_v23  ;;  %v2700_v4 = vadd.f32 %v2666_v28, %v2640_v32  ;;  %v1903_v57 = vmul.f32 %v5793_v0, %v5634_v13  ;;  %v2455_v31 = vpack.c.bf16 %v2448_v11, %v2447_v34  ;;  %v8053_v11 = vld [vmem:[#allocation31_spill] sm:$0xff] }
 0x1ca   :  { %v2701_v2 = vadd.f32 %v2667_v27, %v2641_v33  ;;  %v2708_v39 = vadd.f32 %v2679_v29, %v2648_v59  ;;  %v2709_v56 = vadd.f32 %v2680_v48, %v2649_v18  ;;  %v2716_v53 = vadd.f32 %v2692_v15, %v2656_v35  ;;  %v8055_v33 = vld [vmem:[#allocation48_spill] sm:$0xff]  ;;  %v8057_v48 = vld [vmem:[#allocation49_spill] sm:$0xff] }
 0x1cb   :  { %v2717_v6 = vadd.f32 %v2693_v55, %v2657_v63  ;;  %v1904_v1 = vmul.f32 %v5793_v0, %v5683_v9  ;;  %v1927_v62 = vmul.f32 %v5869_v19, %v5720_v60  ;;  %3769 = vmatmul.msk.bf16.vlgmr.msra.gmra.mxu2 %vm661_vm2, %v2455_v31  ;;  %v1928_v13 = vmul.f32 %v5869_v19, %v5757_v47  ;;  %v8051_v9 = vld [vmem:[#allocation11_spill] sm:$0xff]  ;;  %v8052_v60 = vld [vmem:[#allocation18_spill] sm:$0xff]  ;;  %v8056_v59 = vld [vmem:[#allocation20_spill] sm:$0xff] }
 0x1cc   :  { %v2725_v22 = vmul.f32 %v2709_v56, %v8019_v51  ;;  %v2732_v32 = vadd.f32 %v2708_v39, %v2700_v4  ;;  %v1951_v34 = vmul.f32 %v5671_v37, %v6013_v10  ;;  %v2740_v35 = vmul.f32 %v2716_v53, %v8020_v41  ;;  %v8059_v4 = vld [vmem:[#allocation50_spill] sm:$0xff] }
 0x1cd   :  { %v1952_v63 = vmul.f32 %v5671_v37, %v8009_v24  ;;  %v1961_v18 = vmul.f32 %v5678_v42, %v8051_v9  ;;  %v1962_v29 = vmul.f32 %v5678_v42, %v8052_v60  ;;  %v6325_v30 = vrot.slane %v8053_v11, 1  ;;  %v8058_v24 = vld [vmem:[#allocation51_spill] sm:$0xff]  ;;  %v8064_v60 = vld [vmem:[#allocation21_spill] sm:$0xff] }
 0x1ce   :  { %v2733_v27 = vadd.f32 %v2725_v22, %v2701_v2  ;;  %v1974_v47 = vmul.f32 %v5690_v14, %v8055_v33  ;;  %v1975_v10 = vmul.f32 %v5690_v14, %v8056_v59  ;;  %v2748_v28 = vadd.f32 %v2740_v35, %v2732_v32  ;;  %v8062_v35 = vld [vmem:[#allocation34_spill] sm:$0xff] }
 0x1cf   :  { %8054 = vst [vmem:[#allocation33_spill] sm:$0xff] %v6325_v30  ;;  %v1978_v15 = vrot.slane %v8057_v48, 7  ;;  %v1987_v55 = vmul.f32 %v5701_v40, %v8058_v24  ;;  %v1988_v31 = vmul.f32 %v5701_v40, %v8059_v4  ;;  %v8060_v2 = vrot.slane %v8057_v48, 1 }
 0x1d0   :  { %v2749_v39 = vadd.f32 %v2733_v27, %v2717_v6  ;;  %v1995_v53 = vadd.f32 %v1961_v18, %v1903_v57  ;;  %v1996_v22 = vadd.f32 %v1962_v29, %v1904_v1  ;;  %v2756_v32 = vadd.f32 %v6046_v44, %v2748_v28  ;;  %v8066_v29 = vld [vmem:[#allocation22_spill] sm:$0xff] }
 0x1d1   :  { %v6341_v56 = vsel %vm911_vm3, %v8060_v2, %v6325_v30  ;;  %v6347_v9 = vsel %vm937_vm4, %v1978_v15, %v8062_v35  ;;  %v6352_v6 = vsel %vm937_vm4, %v8064_v60, %v1978_v15  ;;  %v2003_v27 = vadd.f32 %v1974_v47, %v1927_v62  ;;  %v6373_v35 = vld [vmem:[%s7719_s6] ss:$0 sm:$0xff] }
 0x1d2   :  { %8061 = vst [vmem:[#allocation26_spill] sm:$0xff] %v6341_v56  ;;  %v2757_v59 = vadd.f32 %v6046_v44, %v2749_v39  ;;  %v2004_v4 = vadd.f32 %v1975_v10, %v1928_v13  ;;  %v2011_v2 = vadd.f32 %v1987_v55, %v1951_v34  ;;  %v2012_v24 = vadd.f32 %v1988_v31, %v1952_v63  ;;  %v1515_v63 = vpop.f32.mrf.mxu2 }
 0x1d3   :  { %8063 = vst [vmem:[#allocation32_spill] sm:$0xff] %v6347_v9  ;;  %v2764_v57 = vmax.f32 %v2756_v32, 0.0  ;;  %v2021_v1 = vmul.f32 %v5747_v12, %v8057_v48  ;;  %v2022_v18 = vmul.f32 %v5747_v12, %v8053_v11  ;;  %v2028_v28 = vsel %vm911_vm3, %v6325_v30, %v8066_v29 }
 0x1d4   :  { %8065 = vst [vmem:[#allocation41_spill] sm:$0xff] %v6352_v6  ;;  %v2765_v15 = vmax.f32 %v2757_v59, 0.0  ;;  %v2034_v62 = vmul.f32 %v5766_v8, %v6341_v56  ;;  %v2035_v13 = vmul.f32 %v5766_v8, %v2028_v28  ;;  %v2047_v34 = vmul.f32 %v5974_v45, %v6352_v6  ;;  %v8067_v6 = vld [vmem:[#allocation54_spill] sm:$0xff]  ;;  %v8068_v56 = vld [vmem:[#allocation55_spill] sm:$0xff] }
 0x1d5   :  { %v2772_v47 = vmin.f32 %v2764_v57, 6.0  ;;  %v2048_v10 = vmul.f32 %v5974_v45, %v6347_v9  ;;  %v2055_v55 = vadd.f32 %v2021_v1, %v1995_v53  ;;  %v2056_v31 = vadd.f32 %v2022_v18, %v1996_v22  ;;  %v8069_v22 = vld [vmem:[#allocation10_spill] sm:$0xff] }
 0x1d6   :  { %v2773_v39 = vmin.f32 %v2765_v15, 6.0  ;;  %v2063_v32 = vadd.f32 %v2034_v62, %v2003_v27  ;;  %v2064_v60 = vadd.f32 %v2035_v13, %v2004_v4  ;;  %v2071_v29 = vadd.f32 %v2047_v34, %v2011_v2  ;;  %v8070_v4 = vld [vmem:[#allocation9_spill] sm:$0xff]  ;;  %v8071_v18 = vld [vmem:[#allocation66_spill] sm:$0xff]  ;;  %v8074_v34 = vld [vmem:[#allocation64_spill] sm:$0xff] }
 0x1d7   :  { %v2072_v59 = vadd.f32 %v2048_v10, %v2012_v24  ;;  %v1516_v28 = vadd.f32 %v6373_v35, %v1515_v63  ;;  %v2225_v57 = vmul.f32 %v5793_v0, %v8067_v6  ;;  %v2226_v9 = vmul.f32 %v5793_v0, %v8068_v56  ;;  %v8073_v62 = vld [vmem:[#allocation65_spill] sm:$0xff] }
 0x1d8   :  { %v2779_v53 = vpack.c.bf16 %v2773_v39, %v2772_v47  ;;  %v2080_v1 = vmul.f32 %v2064_v60, %v8069_v22  ;;  %v2087_v27 = vadd.f32 %v2063_v32, %v2055_v55  ;;  %v2095_v2 = vmul.f32 %v2071_v29, %v8070_v4  ;;  %v8075_v47 = vld [vmem:[#allocation53_spill] sm:$0xff] }
 0x1d9   :  { %v1532_v24 = vmax.f32 %v1516_v28, 0.0  ;;  %v6383_v15 = vrot.slane %v8071_v18, 1  ;;  %v2249_v13 = vmul.f32 %v5869_v19, %v8073_v62  ;;  %v2250_v63 = vmul.f32 %v5869_v19, %v8074_v34 }
 0x1da   :  { %3774 = vmatmul.msk.bf16.gmra.mxu3 %vm661_vm2, %v2779_v53  ;;  %v2088_v6 = vadd.f32 %v2080_v1, %v2056_v31  ;;  %v2103_v10 = vadd.f32 %v2095_v2, %v2087_v27  ;;  %v2261_v39 = vrot.slane %v8075_v47, 7  ;;  %v8076_v55 = vrot.slane %v8068_v56, 7  ;;  %v8079_v31 = vld [vmem:[#allocation23_spill] sm:$0xff]  ;;  %v8080_v27 = vld [vmem:[#allocation68_spill] sm:$0xff]  ;;  %v1517_v30 = vpop.f32.mrf.mxu2 }
 0x1db   :  { %8072 = vst [vmem:[#allocation11_spill] sm:$0xff] %v6383_v15  ;;  %v1540_v32 = vmin.f32 %v1532_v24, 6.0  ;;  %v8078_v60 = vrot.slane %v8075_v47, 1  ;;  %v2268_v53 = vsel %vm937_vm4, %v8079_v31, %v6148_v50  ;;  %v2274_v56 = vmul.f32 %v5671_v37, %v6164_v46 }
 0x1dc   :  { %v6396_v29 = vsel %vm937_vm4, %v8076_v55, %v6152_v17  ;;  %v2104_v1 = vadd.f32 %v2088_v6, %v2072_v59  ;;  %v2111_v17 = vadd.f32 %v6046_v44, %v2103_v10  ;;  %v6415_v2 = vsel %vm937_vm4, %v2261_v39, %v8080_v27 }
 0x1dd   :  { %8077 = vst [vmem:[#allocation18_spill] sm:$0xff] %v6396_v29  ;;  %v6403_v28 = vsel %vm911_vm3, %v8078_v60, %v6383_v15  ;;  %v8081_v24 = vrot.slane %v6083_v5, 7  ;;  %v1549_v34 = vsel %vm1222_vm13, %v1540_v32, 0.0  ;;  %v2273_v50 = vmul.f32 %v5671_v37, %v2268_v53  ;;  %v8082_v60 = vld [vmem:[#allocation27_spill] sm:$0xff]  ;;  %v8084_v53 = vld [vmem:[#allocation62_spill] sm:$0xff] }
 0x1de   :  { %v2283_v46 = vmul.f32 %v5678_v42, %v6081_v20  ;;  %v2284_v59 = vmul.f32 %v5678_v42, %v6083_v5  ;;  %v2112_v6 = vadd.f32 %v6046_v44, %v2104_v1  ;;  %v2119_v10 = vmax.f32 %v2111_v17, 0.0  ;;  %v8083_v32 = vld [vmem:[#allocation63_spill] sm:$0xff]  ;;  %v8085_v5 = vld [vmem:[#allocation16_spill] sm:$0xff] }
 0x1df   :  { %v6421_v62 = vsel %vm937_vm4, %v8081_v24, %v2261_v39  ;;  %v1550_v55 = vadd.f32 %v1549_v34, %v6271_v36  ;;  %v6435_v39 = vsel %vm911_vm3, %v6383_v15, %v8082_v60  ;;  %v2296_v31 = vmul.f32 %v5690_v14, %v8083_v32 }
 0x1e0   :  { %v2297_v24 = vmul.f32 %v5690_v14, %v8084_v53  ;;  %v2309_v27 = vmul.f32 %v5701_v40, %v6396_v29  ;;  %v2310_v1 = vmul.f32 %v5701_v40, %v8085_v5  ;;  %v2120_v17 = vmax.f32 %v2112_v6, 0.0 }
 0x1e1   :  { %v2127_v36 = vmin.f32 %v2119_v10, 6.0  ;;  %v2317_v34 = vadd.f32 %v2283_v46, %v2225_v57  ;;  %v2318_v20 = vadd.f32 %v2284_v59, %v2226_v9  ;;  %v2325_v22 = vadd.f32 %v2296_v31, %v2249_v13 }
 0x1e2   :  { %v2326_v15 = vadd.f32 %v2297_v24, %v2250_v63  ;;  %v2333_v60 = vadd.f32 %v2309_v27, %v2273_v50  ;;  %v2334_v11 = vadd.f32 %v2310_v1, %v2274_v56  ;;  %v2128_v48 = vmin.f32 %v2120_v17, 6.0 }
 0x1e3   :  { %v2343_v32 = vmul.f32 %v5747_v12, %v8075_v47  ;;  %v2344_v53 = vmul.f32 %v5747_v12, %v8071_v18  ;;  %v2356_v29 = vmul.f32 %v5766_v8, %v6403_v28  ;;  %v2357_v6 = vmul.f32 %v5766_v8, %v6435_v39 }
 0x1e4   :  { %v2369_v9 = vmul.f32 %v5974_v45, %v6421_v62  ;;  %v2370_v57 = vmul.f32 %v5974_v45, %v6415_v2  ;;  %v1518_v13 = vadd.f32 %v6373_v35, %v1517_v30  ;;  %v2133_v63 = vpack.c.bf16 %v2128_v48, %v2127_v36 }
 0x1e5   :  { %v2377_v56 = vadd.f32 %v2343_v32, %v2317_v34  ;;  %v2378_v27 = vadd.f32 %v2344_v53, %v2318_v20  ;;  %v2385_v50 = vadd.f32 %v2356_v29, %v2325_v22  ;;  %v2386_v46 = vadd.f32 %v2357_v6, %v2326_v15  ;;  %v8086_v53 = vld [vmem:[#allocation43_spill] sm:$0xff]  ;;  %v8088_v6 = vld [vmem:[#allocation44_spill] sm:$0xff] }
 0x1e6   :  { %v2393_v59 = vadd.f32 %v2369_v9, %v2333_v60  ;;  %v2394_v10 = vadd.f32 %v2370_v57, %v2334_v11  ;;  %v1533_v31 = vmax.f32 %v1518_v13, 0.0  ;;  %3767 = vmatmul.msk.bf16.gmra.mxu1 %vm661_vm2, %v2133_v63  ;;  %v2550_v1 = vmul.f32 %v5793_v0, %v5803_v58  ;;  %v6513_v63 = vld [vmem:[#allocation2 + $0x1a0] sm:$0xff] }
 0x1e7   :  { %v2409_v24 = vadd.f32 %v2385_v50, %v2377_v56  ;;  %v2551_v17 = vmul.f32 %v5793_v0, %v5814_v7  ;;  %v2574_v30 = vmul.f32 %v5869_v19, %v5837_v16  ;;  %v2402_v48 = vmul.f32 %v2386_v46, %v8019_v51 }
 0x1e8   :  { %v2417_v20 = vmul.f32 %v2393_v59, %v8020_v41  ;;  %v1541_v22 = vmin.f32 %v1533_v31, 6.0  ;;  %v2575_v11 = vmul.f32 %v5869_v19, %v5858_v61  ;;  %v2598_v15 = vmul.f32 %v5671_v37, %v6245_v49 }
 0x1e9   :  { %v2599_v58 = vmul.f32 %v5671_v37, %v5925_v26  ;;  %v2608_v7 = vmul.f32 %v5678_v42, %v8043_v25  ;;  %v2609_v16 = vmul.f32 %v5678_v42, %v8040_v3  ;;  %v2410_v29 = vadd.f32 %v2402_v48, %v2378_v27  ;;  %v8087_v26 = vld [vmem:[#allocation25_spill] sm:$0xff] }
 0x1ea   :  { %v2425_v60 = vadd.f32 %v2417_v20, %v2409_v24  ;;  %v1551_v32 = vsel %vm1222_vm13, %v1541_v22, 0.0  ;;  %v6479_v36 = vrot.slane %v8086_v53, 1  ;;  %v2621_v49 = vmul.f32 %v5690_v14, %v6236_v52 }
 0x1eb   :  { %v6481_v61 = vadd.f32 %v1551_v32, %v1550_v55  ;;  %v2622_v37 = vmul.f32 %v5690_v14, %v6289_v54  ;;  %v6488_v25 = vrot.slane %v8087_v26, 7  ;;  %v2426_v34 = vadd.f32 %v2410_v29, %v2394_v10  ;;  %v8089_v54 = vld [vmem:[#allocation40_spill] sm:$0xff] }
 0x1ec   :  { %v2433_v42 = vadd.f32 %v6046_v44, %v2425_v60  ;;  %v6495_v3 = vsel %vm911_vm3, %v6276_v43, %v6479_v36  ;;  %v2634_v55 = vmul.f32 %v5701_v40, %v6262_v21  ;;  %v2635_v57 = vmul.f32 %v5701_v40, %v6256_v23 }
 0x1ed   :  { %v6503_v14 = vsel %vm937_vm4, %v6488_v25, %v8088_v6  ;;  %v6509_v9 = vsel %vm937_vm4, %v8089_v54, %v6488_v25  ;;  %v2642_v13 = vadd.f32 %v2608_v7, %v2550_v1  ;;  %v2434_v56 = vadd.f32 %v6046_v44, %v2426_v34  ;;  %v3887_v7 = vld [vmem:[#allocation2 + $0xf0] sm:$0xff] }
 0x1ee   :  { %v2441_v27 = vmax.f32 %v2433_v42, 0.0  ;;  %v2643_v50 = vadd.f32 %v2609_v16, %v2551_v17  ;;  %v2650_v46 = vadd.f32 %v2621_v49, %v2574_v30  ;;  %v2651_v59 = vadd.f32 %v2622_v37, %v2575_v11  ;;  %v3888_v37 = vld [vmem:[#allocation2 + $0xf8] sm:$0xff]  ;;  %v8091_v42 = vld [vmem:[#allocation17_spill] sm:$0xff] }
 0x1ef   :  { %v2658_v10 = vadd.f32 %v2634_v55, %v2598_v15  ;;  %v2659_v31 = vadd.f32 %v2635_v57, %v2599_v58  ;;  %v2668_v24 = vmul.f32 %v5747_v12, %v8087_v26  ;;  %v2442_v48 = vmax.f32 %v2434_v56, 0.0  ;;  %v8092_v55 = vld [vmem:[#allocation47_spill] sm:$0xff] }
 0x1f0   :  { %v2449_v20 = vmin.f32 %v2441_v27, 6.0  ;;  %v2669_v22 = vmul.f32 %v5747_v12, %v8086_v53  ;;  %v6521_v40 = vrot.slane %v6513_v63, 1  ;;  %v2681_v1 = vmul.f32 %v5766_v8, %v6495_v3 }
 0x1f1   :  { %v2694_v17 = vmul.f32 %v5974_v45, %v6509_v9  ;;  %v2695_v30 = vmul.f32 %v5974_v45, %v6503_v14  ;;  %v2702_v11 = vadd.f32 %v2668_v24, %v2642_v13  ;;  %v2450_v15 = vmin.f32 %v2442_v48, 6.0  ;;  %v8096_v48 = vld [vmem:[#allocation31_spill] sm:$0xff] }
 0x1f2   :  { %8090 = vst [vmem:[#allocation48_spill] sm:$0xff] %v6521_v40  ;;  %v2675_v58 = vsel %vm911_vm3, %v6479_v36, %v6521_v40  ;;  %v2703_v12 = vadd.f32 %v2669_v22, %v2643_v50  ;;  %v1905_v16 = vmul.f32 %v3887_v7, %v5793_v0  ;;  %v2710_v60 = vadd.f32 %v2681_v1, %v2650_v46  ;;  %v8093_v50 = vld [vmem:[#allocation51_spill] sm:$0xff]  ;;  %v8097_v22 = vld [vmem:[#allocation10_spill] sm:$0xff] }
 0x1f3   :  { %v2682_v29 = vmul.f32 %v5766_v8, %v2675_v58  ;;  %v2718_v32 = vadd.f32 %v2694_v17, %v2658_v10  ;;  %v2719_v53 = vadd.f32 %v2695_v30, %v2659_v31  ;;  %v2456_v49 = vpack.c.bf16 %v2450_v15, %v2449_v20  ;;  %v8094_v10 = vld [vmem:[#allocation50_spill] sm:$0xff]  ;;  %v8098_v30 = vld [vmem:[#allocation12_spill] sm:$0xff] }
 0x1f4   :  { %v1906_v34 = vmul.f32 %v3888_v37, %v5793_v0  ;;  %v1922_v54 = vsel %vm911_vm3, %v8092_v55, %v8091_v42  ;;  %v1929_v57 = vmul.f32 %v5869_v19, %v8055_v33  ;;  %v2734_v56 = vadd.f32 %v2710_v60, %v2702_v11  ;;  %v6548_v0 = vld [vmem:[%s7716_s3] ss:$0 sm:$0xff]  ;;  %v6557_v33 = vld [vmem:[%s7716_s3 + $0x4] ss:$0 sm:$0xff]  ;;  %v8099_v11 = vld [vmem:[#allocation33_spill] sm:$0xff] }
 0x1f5   :  { %v2711_v13 = vadd.f32 %v2682_v29, %v2651_v59  ;;  %v2742_v27 = vmul.f32 %v2718_v32, %v8070_v4  ;;  %v1930_v8 = vmul.f32 %v5869_v19, %v1922_v54  ;;  %3770 = vmatmul.msk.bf16.gmra.mxu2 %vm661_vm2, %v2456_v49  ;;  %v1953_v46 = vmul.f32 %v6548_v0, %v8093_v50  ;;  %v8095_v59 = vld [vmem:[#allocation49_spill] sm:$0xff]  ;;  %v6571_v58 = vld [vmem:[%s7716_s3 + $0x5] ss:$0 sm:$0xff]  ;;  %v8100_v7 = vld [vmem:[#allocation26_spill] sm:$0xff] }
 0x1f6   :  { %v1954_v31 = vmul.f32 %v6548_v0, %v8094_v10  ;;  %v1963_v24 = vmul.f32 %v6557_v33, %v8095_v59  ;;  %v1964_v20 = vmul.f32 %v6557_v33, %v8096_v48  ;;  %v1969_v15 = vsel %vm911_vm3, %v8099_v11, %v8098_v30  ;;  %v6579_v32 = vld [vmem:[%s7716_s3 + $0x3] ss:$0 sm:$0xff]  ;;  %v8101_v49 = vld [vmem:[#allocation41_spill] sm:$0xff]  ;;  %v6589_v30 = vld [vmem:[%s7716_s3 + $0x7] ss:$0 sm:$0xff] }
 0x1f7   :  { %v2727_v1 = vmul.f32 %v2711_v13, %v8097_v22  ;;  %v2750_v17 = vadd.f32 %v2742_v27, %v2734_v56  ;;  %v1976_v29 = vmul.f32 %v6571_v58, %v8100_v7  ;;  %v1977_v60 = vmul.f32 %v6571_v58, %v1969_v15  ;;  %v8102_v42 = vld [vmem:[#allocation32_spill] sm:$0xff] }
 0x1f8   :  { %v1989_v37 = vmul.f32 %v6579_v32, %v8101_v49  ;;  %v1990_v55 = vmul.f32 %v6579_v32, %v8102_v42  ;;  %v1997_v54 = vadd.f32 %v1963_v24, %v1905_v16  ;;  %v1998_v27 = vadd.f32 %v1964_v20, %v1906_v34  ;;  %v8103_v11 = vld [vmem:[#allocation52_spill] sm:$0xff]  ;;  %v3894_v42 = vld [vmem:[#allocation2 + $0x118] sm:$0xff] }
 0x1f9   :  { %v2735_v13 = vadd.f32 %v2727_v1, %v2703_v12  ;;  %v2758_v56 = vadd.f32 %v6046_v44, %v2750_v17  ;;  %v2005_v50 = vadd.f32 %v1976_v29, %v1929_v57  ;;  %v2006_v10 = vadd.f32 %v1977_v60, %v1930_v8  ;;  %v8104_v16 = vld [vmem:[#allocation19_spill] sm:$0xff]  ;;  %v8105_v24 = vld [vmem:[#allocation58_spill] sm:$0xff]  ;;  %v6601_v57 = vld [vmem:[%s7716_s3 + $0x8] ss:$0 sm:$0xff]  ;;  %v1520_v60 = vpop.f32.mrf.mxu2 }
 0x1fa   :  { %v2013_v59 = vadd.f32 %v1989_v37, %v1953_v46  ;;  %v2014_v48 = vadd.f32 %v1990_v55, %v1954_v31  ;;  %v2023_v15 = vmul.f32 %v6589_v30, %v8103_v11  ;;  %v2024_v12 = vmul.f32 %v3894_v42, %v6589_v30  ;;  %v8106_v8 = vld [vmem:[#allocation61_spill] sm:$0xff]  ;;  %v8108_v20 = vld [vmem:[#allocation34_spill] sm:$0xff] }
 0x1fb   :  { %v2751_v7 = vadd.f32 %v2735_v13, %v2719_v53  ;;  %v2766_v49 = vmax.f32 %v2758_v56, 0.0  ;;  %v2029_v34 = vsel %vm911_vm3, %v8105_v24, %v8104_v16  ;;  %v2036_v46 = vmul.f32 %v6601_v57, %v8106_v8  ;;  %v8107_v53 = vld [vmem:[#allocation67_spill] sm:$0xff]  ;;  %v8109_v17 = vld [vmem:[#allocation69_spill] sm:$0xff] }
 0x1fc   :  { %v2037_v31 = vmul.f32 %v6601_v57, %v2029_v34  ;;  %v2041_v1 = vsel %vm937_vm4, %v8108_v20, %v8107_v53  ;;  %v2050_v29 = vmul.f32 %v5974_v45, %v8109_v17  ;;  %v2057_v56 = vadd.f32 %v2023_v15, %v1997_v54  ;;  %v6618_v53 = vld [vmem:[%s7716_s3 + $0x1] ss:$0 sm:$0xff]  ;;  %v8110_v20 = vld [vmem:[#allocation56_spill] sm:$0xff]  ;;  %v8112_v54 = vld [vmem:[#allocation57_spill] sm:$0xff] }
 0x1fd   :  { %v2759_v37 = vadd.f32 %v6046_v44, %v2751_v7  ;;  %v2774_v55 = vmin.f32 %v2766_v49, 6.0  ;;  %v2049_v13 = vmul.f32 %v5974_v45, %v2041_v1  ;;  %v2058_v11 = vadd.f32 %v2024_v12, %v1998_v27  ;;  %v8111_v49 = vld [vmem:[#allocation15_spill] sm:$0xff] }
 0x1fe   :  { %v2065_v42 = vadd.f32 %v2036_v46, %v2005_v50  ;;  %v2066_v16 = vadd.f32 %v2037_v31, %v2006_v10  ;;  %v2074_v24 = vadd.f32 %v2050_v29, %v2014_v48  ;;  %v1521_v41 = vadd.f32 %v6373_v35, %v1520_v60  ;;  %v8113_v50 = vld [vmem:[#allocation63_spill] sm:$0xff]  ;;  %v8114_v48 = vld [vmem:[#allocation14_spill] sm:$0xff] }
 0x1ff   :  { %v2767_v34 = vmax.f32 %v2759_v37, 0.0  ;;  %v2073_v8 = vadd.f32 %v2049_v13, %v2013_v59  ;;  %v2227_v7 = vmul.f32 %v6618_v53, %v8110_v20  ;;  %v2228_v27 = vmul.f32 %v6618_v53, %v8112_v54  ;;  %v8115_v46 = vld [vmem:[#allocation62_spill] sm:$0xff] }
 0x200   :  { %v2082_v17 = vmul.f32 %v2066_v16, %v8111_v49  ;;  %v2089_v1 = vadd.f32 %v2065_v42, %v2057_v56  ;;  %v2251_v10 = vmul.f32 %v5869_v19, %v8113_v50  ;;  %v1534_v12 = vmax.f32 %v1521_v41, 0.0  ;;  %v8116_v60 = vld [vmem:[#allocation18_spill] sm:$0xff] }
 0x201   :  { %v2775_v59 = vmin.f32 %v2767_v34, 6.0  ;;  %v2097_v15 = vmul.f32 %v2073_v8, %v8114_v48  ;;  %v2252_v31 = vmul.f32 %v5869_v19, %v8115_v46  ;;  %v2275_v37 = vmul.f32 %v6548_v0, %v8116_v60  ;;  %v8117_v8 = vld [vmem:[#allocation36_spill] sm:$0xff] }
 0x202   :  { %v2090_v29 = vadd.f32 %v2082_v17, %v2058_v11  ;;  %v2276_v13 = vmul.f32 %v6548_v0, %v8085_v5  ;;  %v2285_v56 = vmul.f32 %v6557_v33, %v8075_v47  ;;  %v1542_v20 = vmin.f32 %v1534_v12, 6.0  ;;  %v8118_v17 = vld [vmem:[#allocation68_spill] sm:$0xff] }
 0x203   :  { %v2780_v42 = vpack.c.bf16 %v2775_v59, %v2774_v55  ;;  %v2105_v16 = vadd.f32 %v2097_v15, %v2089_v1  ;;  %v2286_v34 = vmul.f32 %v6557_v33, %v8071_v18  ;;  %v2298_v19 = vmul.f32 %v6571_v58, %v6403_v28  ;;  %v6657_v59 = vld [vmem:[#allocation2 + $0x160] sm:$0xff] }
 0x204   :  { %v2106_v41 = vadd.f32 %v2090_v29, %v2074_v24  ;;  %v2299_v11 = vmul.f32 %v6571_v58, %v6435_v39  ;;  %v6646_v5 = vsel %vm937_vm4, %v8118_v17, %v8117_v8  ;;  %v1553_v55 = vsel %vm1222_vm13, %v1542_v20, 0.0  ;;  %v6663_v8 = vld [vmem:[#allocation2 + $0x158] sm:$0xff]  ;;  %v8122_v17 = vld [vmem:[#allocation28_spill] sm:$0xff] }
 0x205   :  { %8119 = vst [vmem:[#allocation20_spill] sm:$0xff] %v6646_v5  ;;  %3775 = vmatmul.msk.bf16.gmra.mxu3 %vm661_vm2, %v2780_v42  ;;  %v2113_v47 = vadd.f32 %v6046_v44, %v2105_v16  ;;  %v2311_v18 = vmul.f32 %v6579_v32, %v6421_v62  ;;  %v2312_v24 = vmul.f32 %v6579_v32, %v6415_v2  ;;  %v6659_v16 = vld [vmem:[#allocation2 + $0x150] sm:$0xff] }
 0x206   :  { %v2114_v39 = vadd.f32 %v6046_v44, %v2106_v41  ;;  %v1554_v1 = vadd.f32 %v1553_v55, %v6481_v61  ;;  %v2319_v54 = vadd.f32 %v2285_v56, %v2227_v7  ;;  %v2320_v50 = vadd.f32 %v2286_v34, %v2228_v27  ;;  %v1522_v7 = vpop.f32.mrf.mxu2  ;;  %v8120_v34 = vld [vmem:[#allocation35_spill] sm:$0xff] }
 0x207   :  { %v2121_v15 = vmax.f32 %v2113_v47, 0.0  ;;  %v2327_v12 = vadd.f32 %v2298_v19, %v2251_v10  ;;  %v2328_v46 = vadd.f32 %v2299_v11, %v2252_v31  ;;  %v2335_v29 = vadd.f32 %v2311_v18, %v2275_v37 }
 0x208   :  { %v2122_v60 = vmax.f32 %v2114_v39, 0.0  ;;  %v2336_v42 = vadd.f32 %v2312_v24, %v2276_v13  ;;  %v2345_v20 = vmul.f32 %v6659_v16, %v6589_v30  ;;  %v2346_v61 = vmul.f32 %v6663_v8, %v6589_v30  ;;  %v8121_v13 = vld [vmem:[#allocation42_spill] sm:$0xff] }
 0x209   :  { %v2129_v27 = vmin.f32 %v2121_v15, 6.0  ;;  %v7861_v56 = vrot.slane %v6657_v59, 1  ;;  %v2358_v10 = vmul.f32 %v6601_v57, %v8120_v34  ;;  %v2371_v31 = vmul.f32 %v5974_v45, %v6646_v5 }
 0x20a   :  { %v2130_v37 = vmin.f32 %v2122_v60, 6.0  ;;  %v2372_v41 = vmul.f32 %v5974_v45, %v8121_v13  ;;  %v2379_v19 = vadd.f32 %v2345_v20, %v2319_v54  ;;  %v2380_v11 = vadd.f32 %v2346_v61, %v2320_v50  ;;  %v3899_v60 = vld [vmem:[#allocation2 + $0x180] sm:$0xff]  ;;  %v3900_v20 = vld [vmem:[#allocation2 + $0x188] sm:$0xff] }
 0x20b   :  { %v2352_v47 = vsel %vm911_vm3, %v8122_v17, %v7861_v56  ;;  %v2387_v55 = vadd.f32 %v2358_v10, %v2327_v12  ;;  %v2395_v18 = vadd.f32 %v2371_v31, %v2335_v29  ;;  %v1523_v24 = vadd.f32 %v6373_v35, %v1522_v7  ;;  %v8123_v29 = vld [vmem:[#allocation27_spill] sm:$0xff]  ;;  %v8124_v10 = vld [vmem:[#allocation24_spill] sm:$0xff] }
 0x20c   :  { %v2134_v39 = vpack.c.bf16 %v2130_v37, %v2129_v27  ;;  %v2359_v15 = vmul.f32 %v6601_v57, %v2352_v47  ;;  %v2396_v51 = vadd.f32 %v2372_v41, %v2336_v42  ;;  %v2552_v5 = vmul.f32 %v3899_v60, %v6618_v53  ;;  %v6692_v42 = vld [vmem:[%s7716_s3 + $0x2] ss:$0 sm:$0xff] }
 0x20d   :  { %v2411_v45 = vadd.f32 %v2387_v55, %v2379_v19  ;;  %v2419_v54 = vmul.f32 %v2395_v18, %v8070_v4  ;;  %v1535_v50 = vmax.f32 %v1523_v24, 0.0  ;;  %v2553_v61 = vmul.f32 %v3900_v20, %v6618_v53  ;;  %v3902_v18 = vld [vmem:[#allocation2 + $0x198] sm:$0xff] }
 0x20e   :  { %3768 = vmatmul.msk.bf16.gmra.mxu1 %vm661_vm2, %v2134_v39  ;;  %v2388_v12 = vadd.f32 %v2359_v15, %v2328_v46  ;;  %v2569_v7 = vsel %vm911_vm3, %v8124_v10, %v8123_v29  ;;  %v2576_v27 = vmul.f32 %v6692_v42, %v6236_v52  ;;  %v2600_v31 = vmul.f32 %v6548_v0, %v6262_v21  ;;  %v8125_v39 = vld [vmem:[#allocation29_spill] sm:$0xff] }
 0x20f   :  { %v2427_v37 = vadd.f32 %v2419_v54, %v2411_v45  ;;  %v1543_v41 = vmin.f32 %v1535_v50, 6.0  ;;  %v2577_v46 = vmul.f32 %v6692_v42, %v2569_v7  ;;  %v2601_v19 = vmul.f32 %v6548_v0, %v6256_v23 }
 0x210   :  { %v2404_v47 = vmul.f32 %v2388_v12, %v8097_v22  ;;  %v2610_v55 = vmul.f32 %v6557_v33, %v8087_v26  ;;  %v2611_v24 = vmul.f32 %v3902_v18, %v6557_v33  ;;  %v2616_v52 = vsel %vm911_vm3, %v6479_v36, %v8125_v39 }
 0x211   :  { %v2435_v21 = vadd.f32 %v6046_v44, %v2427_v37  ;;  %v1555_v15 = vsel %vm1222_vm13, %v1543_v41, 0.0  ;;  %v2623_v23 = vmul.f32 %v6571_v58, %v6495_v3  ;;  %v2624_v60 = vmul.f32 %v6571_v58, %v2616_v52 }
 0x212   :  { %v2412_v45 = vadd.f32 %v2404_v47, %v2380_v11  ;;  %v6714_v54 = vadd.f32 %v1555_v15, %v1554_v1  ;;  %v2636_v50 = vmul.f32 %v6579_v32, %v6509_v9  ;;  %v2637_v20 = vmul.f32 %v6579_v32, %v6503_v14  ;;  %v3903_v1 = vld [vmem:[#allocation2 + $0x1a8] sm:$0xff]  ;;  %v6723_v9 = vld [vmem:[#allocation2 + $0x198] sm:$0xff] }
 0x213   :  { %v2443_v12 = vmax.f32 %v2435_v21, 0.0  ;;  %v2644_v36 = vadd.f32 %v2610_v55, %v2552_v5  ;;  %v2645_v29 = vadd.f32 %v2611_v24, %v2553_v61  ;;  %v2652_v10 = vadd.f32 %v2623_v23, %v2576_v27  ;;  %v6729_v61 = vld [vmem:[#allocation2 + $0x1a8] sm:$0xff]  ;;  %v6745_v24 = vld [vmem:[#allocation2 + $0x1c0] sm:$0xff]  ;;  %v8127_v15 = vld [vmem:[#allocation46_spill] sm:$0xff] }
 0x214   :  { %v2428_v7 = vadd.f32 %v2412_v45, %v2396_v51  ;;  %v2653_v37 = vadd.f32 %v2624_v60, %v2577_v46  ;;  %v2660_v41 = vadd.f32 %v2636_v50, %v2600_v31  ;;  %v2661_v18 = vadd.f32 %v2637_v20, %v2601_v19  ;;  %v8126_v46 = vld [vmem:[#allocation30_spill] sm:$0xff] }
 0x215   :  { %v2451_v3 = vmin.f32 %v2443_v12, 6.0  ;;  %v2670_v11 = vmul.f32 %v6589_v30, %v6513_v63  ;;  %v2671_v47 = vmul.f32 %v3903_v1, %v6589_v30  ;;  %v2673_v39 = vrot.slane %v3903_v1, 1  ;;  %v6754_v45 = vld [vmem:[#allocation2 + $0x1b0] sm:$0xff]  ;;  %v6756_v50 = vld [vmem:[#allocation2 + $0x1b8] sm:$0xff]  ;;  %v6765_v12 = vld [vmem:[%s7716_s3 + $0x6] ss:$0 sm:$0xff] }
 0x216   :  { %v2436_v14 = vadd.f32 %v6046_v44, %v2428_v7  ;;  %v6727_v5 = vrot.slane %v6513_v63, 7  ;;  %v6733_v51 = vmul.f32 %v6618_v53, %v8087_v26  ;;  %v6737_v27 = vmul.f32 %v6618_v53, %v6723_v9 }
 0x217   :  { %v2674_v31 = vsel %vm911_vm3, %v6521_v40, %v2673_v39  ;;  %v2676_v44 = vsel %vm911_vm3, %v2673_v39, %v8126_v46  ;;  %v2704_v19 = vadd.f32 %v2670_v11, %v2644_v36  ;;  %v2705_v55 = vadd.f32 %v2671_v47, %v2645_v29 }
 0x218   :  { %v2444_v52 = vmax.f32 %v2436_v14, 0.0  ;;  %v2683_v26 = vmul.f32 %v6601_v57, %v2674_v31  ;;  %v2684_v21 = vmul.f32 %v6601_v57, %v2676_v44  ;;  %v8128_v23 = vrot.slane %v8127_v15, 7 }
 0x219   :  { %v2688_v20 = vsel %vm937_vm4, %v8088_v6, %v6727_v5  ;;  %v2878_v29 = vrot.slane %v6723_v9, 1  ;;  %v2880_v7 = vrot.slane %v6729_v61, 1  ;;  %v6772_v31 = vrot.slane %v6754_v45, 1 }
 0x21a   :  { %v2687_v60 = vsel %vm937_vm4, %v6727_v5, %v8128_v23  ;;  %v2452_v11 = vmin.f32 %v2444_v52, 6.0  ;;  %v2696_v1 = vmul.f32 %v6765_v12, %v2688_v20  ;;  %v2712_v47 = vadd.f32 %v2683_v26, %v2652_v10 }
 0x21b   :  { %v2697_v36 = vmul.f32 %v6765_v12, %v2687_v60  ;;  %v2713_v39 = vadd.f32 %v2684_v21, %v2653_v37  ;;  %8129 = vst [vmem:[#allocation21_spill] sm:$0xff] %v6772_v31  ;;  %v2882_v6 = vrot.slane %v6756_v50, 1  ;;  %v7859_v46 = vrot.slane %v6745_v24, 1 }
 0x21c   :  { %v2457_v44 = vpack.c.bf16 %v2452_v11, %v2451_v3  ;;  %v2720_v15 = vadd.f32 %v2696_v1, %v2660_v41  ;;  %v2736_v60 = vadd.f32 %v2712_v47, %v2704_v19  ;;  %v6791_v37 = vsel %vm911_vm3, %v2880_v7, %v6772_v31 }
 0x21d   :  { %v2721_v14 = vadd.f32 %v2697_v36, %v2661_v18  ;;  %v2729_v23 = vmul.f32 %v2713_v39, %v8111_v49  ;;  %v6781_v52 = vsel %vm911_vm3, %v2882_v6, %v7859_v46  ;;  %v6786_v10 = vsel %vm911_vm3, %v6772_v31, %v2882_v6  ;;  %v6798_v18 = vld [vmem:[#allocation2 + $0x1c8] sm:$0xff]  ;;  %v6816_v6 = vld [vmem:[#allocation2 + $0x1d8] sm:$0xff] }
 0x21e   :  { %8130 = vst [vmem:[#allocation54_spill] sm:$0xff] %v6781_v52  ;;  %v6796_v41 = vsel %vm911_vm3, %v6521_v40, %v2880_v7  ;;  %3771 = vmatmul.msk.bf16.gmra.mxu2 %vm661_vm2, %v2457_v44  ;;  %v2744_v19 = vmul.f32 %v2720_v15, %v8114_v48  ;;  %v2890_v26 = vsel %vm911_vm3, %v2878_v29, %v6521_v40  ;;  %v7857_v7 = vrot.slane %v6723_v9, 7 }
 0x21f   :  { %v2737_v3 = vadd.f32 %v2729_v23, %v2705_v55  ;;  %v2891_v21 = vsel %vm911_vm3, %v6276_v43, %v2878_v29  ;;  %v2894_v36 = vmul.f32 %v6692_v42, %v2890_v26  ;;  %v7858_v11 = vrot.slane %v6729_v61, 7  ;;  %8131 = vst [vmem:[#allocation55_spill] sm:$0xff] %v6816_v6  ;;  %v6838_v23 = vld [vmem:[%s7717_s4] ss:$0 sm:$0xff]  ;;  %v6868_v43 = vld [vmem:[#allocation2 + $0x1e8] sm:$0xff] }
 0x220   :  { %v2893_v20 = vmul.f32 %v6692_v42, %v2891_v21  ;;  %v2752_v1 = vadd.f32 %v2744_v19, %v2736_v60  ;;  %v6813_v47 = vrot.slane %v6754_v45, 7  ;;  %v7860_v39 = vrot.slane %v6756_v50, 7  ;;  %8135 = vst [vmem:[#allocation53_spill] sm:$0xff] %v6868_v43 }
 0x221   :  { %v2753_v55 = vadd.f32 %v2737_v3, %v2721_v14  ;;  %v6819_v44 = vrot.slane %v6798_v18, 7  ;;  %v6826_v29 = vsel %vm937_vm4, %v6727_v5, %v7858_v11  ;;  %v2915_v14 = vsel %vm937_vm4, %v6488_v25, %v7857_v7 }
 0x222   :  { %8132 = vst [vmem:[#allocation66_spill] sm:$0xff] %v6826_v29  ;;  %v2927_v15 = vmul.f32 %v6557_v33, %v6513_v63  ;;  %v2760_v60 = vadd.f32 %v6838_v23, %v2752_v1  ;;  %v6847_v19 = vsel %vm937_vm4, %v6813_v47, %v7860_v39  ;;  %v2918_v26 = vmul.f32 %v6548_v0, %v2915_v14 }
 0x223   :  { %v2761_v3 = vadd.f32 %v6838_v23, %v2753_v55  ;;  %8133 = vst [vmem:[#allocation65_spill] sm:$0xff] %v6847_v19  ;;  %v2916_v21 = vsel %vm937_vm4, %v6819_v44, %v6488_v25  ;;  %v2928_v7 = vmul.f32 %v6557_v33, %v6729_v61  ;;  %v2940_v1 = vmul.f32 %v6571_v58, %v6796_v41 }
 0x224   :  { %v2941_v55 = vmul.f32 %v6571_v58, %v6791_v37  ;;  %v2768_v11 = vmax.f32 %v2760_v60, 0.0  ;;  %v2917_v39 = vmul.f32 %v6548_v0, %v2916_v21  ;;  %v6862_v14 = vrot.slane %v6816_v6, 7 }
 0x225   :  { %v2769_v46 = vmax.f32 %v2761_v3, 0.0  ;;  %v2954_v56 = vmul.f32 %v6579_v32, %v6826_v29  ;;  %v2961_v25 = vadd.f32 %v2927_v15, %v6733_v51  ;;  %v2962_v31 = vadd.f32 %v2928_v7, %v6737_v27  ;;  %v1525_v27 = vpop.f32.mrf.mxu2 }
 0x226   :  { %8134 = vst [vmem:[#allocation64_spill] sm:$0xff] %v6862_v14  ;;  %v2969_v40 = vadd.f32 %v2940_v1, %v2893_v20  ;;  %v2776_v22 = vmin.f32 %v2768_v11, 6.0  ;;  %v2952_v60 = vsel %vm937_vm4, %v6862_v14, %v6727_v5  ;;  %v2970_v3 = vadd.f32 %v2941_v55, %v2894_v36 }
 0x227   :  { %v2777_v4 = vmin.f32 %v2769_v46, 6.0  ;;  %v2953_v21 = vmul.f32 %v6579_v32, %v2952_v60  ;;  %v2978_v6 = vadd.f32 %v2954_v56, %v2918_v26  ;;  %v2987_v29 = vmul.f32 %v6589_v30, %v6754_v45 }
 0x228   :  { %v2988_v51 = vmul.f32 %v6589_v30, %v6756_v50  ;;  %v3000_v46 = vmul.f32 %v6601_v57, %v6786_v10  ;;  %v3001_v7 = vmul.f32 %v6601_v57, %v6781_v52  ;;  %v6884_v11 = vrot.slane %v6868_v43, 7  ;;  %v3907_v43 = vld [vmem:[#allocation2 + $0x148] sm:$0xff]  ;;  %v8139_v52 = vld [vmem:[#allocation11_spill] sm:$0xff] }
 0x229   :  { %v2781_v20 = vpack.c.bf16 %v2777_v4, %v2776_v22  ;;  %v2977_v36 = vadd.f32 %v2953_v21, %v2917_v39  ;;  %v3014_v56 = vmul.f32 %v6765_v12, %v6847_v19  ;;  %v3021_v15 = vadd.f32 %v2987_v29, %v2961_v25  ;;  %v3906_v39 = vld [vmem:[#allocation2 + $0x140] sm:$0xff]  ;;  %v8138_v19 = vld [vmem:[#allocation22_spill] sm:$0xff] }
 0x22a   :  { %8136 = vst [vmem:[#allocation23_spill] sm:$0xff] %v6884_v11  ;;  %v3022_v26 = vadd.f32 %v2988_v51, %v2962_v31  ;;  %v3012_v4 = vsel %vm937_vm4, %v6884_v11, %v6813_v47  ;;  %v3029_v22 = vadd.f32 %v3000_v46, %v2969_v40  ;;  %v3030_v1 = vadd.f32 %v3001_v7, %v2970_v3  ;;  %v8137_v29 = vld [vmem:[#allocation7_spill] sm:$0xff] }
 0x22b   :  { %3776 = vmatmul.msk.bf16.gmra.mxu3 %vm661_vm2, %v2781_v20  ;;  %v1526_v55 = vadd.f32 %v6373_v35, %v1525_v27  ;;  %v3013_v60 = vmul.f32 %v6765_v12, %v3012_v4  ;;  %v3038_v14 = vadd.f32 %v3014_v56, %v2978_v6  ;;  %v2229_v21 = vmul.f32 %v3906_v39, %v6618_v53  ;;  %v8140_v4 = vld [vmem:[#allocation13_spill] sm:$0xff] }
 0x22c   :  { %v2230_v31 = vmul.f32 %v3907_v43, %v6618_v53  ;;  %v3046_v25 = vmul.f32 %v3030_v1, %v8137_v29  ;;  %v3053_v51 = vadd.f32 %v3029_v22, %v3021_v15  ;;  %v2246_v40 = vsel %vm911_vm3, %v8139_v52, %v8138_v19  ;;  %v8141_v19 = vld [vmem:[#allocation59_spill] sm:$0xff]  ;;  %v8142_v1 = vld [vmem:[#allocation20_spill] sm:$0xff] }
 0x22d   :  { %v1536_v20 = vmax.f32 %v1526_v55, 0.0  ;;  %v3037_v3 = vadd.f32 %v3013_v60, %v2977_v36  ;;  %v2253_v27 = vmul.f32 %v6692_v42, %v6403_v28  ;;  %v2254_v6 = vmul.f32 %v6692_v42, %v2246_v40 }
 0x22e   :  { %v2277_v46 = vmul.f32 %v6548_v0, %v6421_v62  ;;  %v3054_v7 = vadd.f32 %v3046_v25, %v3022_v26  ;;  %v2278_v56 = vmul.f32 %v6548_v0, %v6415_v2  ;;  %v2287_v15 = vmul.f32 %v6659_v16, %v6557_v33 }
 0x22f   :  { %v1544_v43 = vmin.f32 %v1536_v20, 6.0  ;;  %v3061_v22 = vmul.f32 %v3037_v3, %v8140_v4  ;;  %v2288_v52 = vmul.f32 %v6663_v8, %v6557_v33  ;;  %v2293_v28 = vsel %vm911_vm3, %v8122_v17, %v8141_v19 }
 0x230   :  { %v2300_v62 = vmul.f32 %v6571_v58, %v8120_v34  ;;  %v3070_v36 = vadd.f32 %v3054_v7, %v3038_v14  ;;  %v2301_v2 = vmul.f32 %v6571_v58, %v2293_v28  ;;  %v2313_v16 = vmul.f32 %v6579_v32, %v8142_v1  ;;  %v1527_v14 = vpop.f32.mrf.mxu2 }
 0x231   :  { %v1557_v26 = vsel %vm1222_vm13, %v1544_v43, 0.0  ;;  %v3069_v55 = vadd.f32 %v3061_v22, %v3053_v51  ;;  %v2314_v8 = vmul.f32 %v6579_v32, %v8121_v13  ;;  %v2321_v39 = vadd.f32 %v2287_v15, %v2229_v21  ;;  %v3908_v22 = vld [vmem:[#allocation2 + $0x168] sm:$0xff] }
 0x232   :  { %v1558_v60 = vadd.f32 %v1557_v26, %v6714_v54  ;;  %v3078_v17 = vadd.f32 %v6838_v23, %v3070_v36  ;;  %v2322_v25 = vadd.f32 %v2288_v52, %v2230_v31  ;;  %v2329_v20 = vadd.f32 %v2300_v62, %v2253_v27  ;;  %v8144_v52 = vld [vmem:[#allocation60_spill] sm:$0xff]  ;;  %v8145_v62 = vld [vmem:[#allocation38_spill] sm:$0xff] }
 0x233   :  { %v2330_v34 = vadd.f32 %v2301_v2, %v2254_v6  ;;  %v3077_v40 = vadd.f32 %v6838_v23, %v3069_v55  ;;  %v2337_v3 = vadd.f32 %v2313_v16, %v2277_v46  ;;  %v2338_v7 = vadd.f32 %v2314_v8, %v2278_v56 }
 0x234   :  { %v2347_v43 = vmul.f32 %v6589_v30, %v6657_v59  ;;  %v3086_v51 = vmax.f32 %v3078_v17, 0.0  ;;  %v2348_v54 = vmul.f32 %v3908_v22, %v6589_v30  ;;  %v2350_v19 = vrot.slane %v3908_v22, 1 }
 0x235   :  { %v2362_v13 = vrot.slane %v6657_v59, 7  ;;  %v3085_v21 = vmax.f32 %v3077_v40, 0.0  ;;  %v1528_v31 = vadd.f32 %v6373_v35, %v1527_v14  ;;  %v2871_v27 = vmul.f32 %v6618_v53, %v6513_v63  ;;  %v8146_v63 = vld [vmem:[#allocation37_spill] sm:$0xff] }
 0x236   :  { %v2381_v15 = vadd.f32 %v2347_v43, %v2321_v39  ;;  %v3094_v6 = vmin.f32 %v3086_v51, 6.0  ;;  %v8143_v46 = vrot.slane %v6657_v59, 1  ;;  %v2353_v28 = vsel %vm911_vm3, %v2350_v19, %v8144_v52 }
 0x237   :  { %v2364_v36 = vsel %vm937_vm4, %v2362_v13, %v8145_v62  ;;  %v3093_v26 = vmin.f32 %v3085_v21, 6.0  ;;  %v2361_v1 = vmul.f32 %v6601_v57, %v2353_v28  ;;  %v2365_v59 = vsel %vm937_vm4, %v8146_v63, %v2362_v13  ;;  %v6986_v28 = vld [vmem:[#allocation2 + $0x1d0] sm:$0xff] }
 0x238   :  { %v2351_v56 = vsel %vm911_vm3, %v8143_v46, %v2350_v19  ;;  %v2373_v16 = vmul.f32 %v6765_v12, %v2365_v59  ;;  %v2374_v55 = vmul.f32 %v6765_v12, %v2364_v36  ;;  %v2382_v8 = vadd.f32 %v2348_v54, %v2322_v25 }
 0x239   :  { %v2360_v2 = vmul.f32 %v6601_v57, %v2351_v56  ;;  %v1537_v39 = vmax.f32 %v1528_v31, 0.0  ;;  %v3101_v17 = vpack.c.bf16 %v3094_v6, %v3093_v26  ;;  %v2390_v40 = vadd.f32 %v2361_v1, %v2330_v34 }
 0x23a   :  { %v2872_v43 = vmul.f32 %v6618_v53, %v6729_v61  ;;  %v2397_v51 = vadd.f32 %v2373_v16, %v2337_v3  ;;  %v2398_v22 = vadd.f32 %v2374_v55, %v2338_v7  ;;  %v6956_v21 = vrot.slane %v6798_v18, 1 }
 0x23b   :  { %v2389_v14 = vadd.f32 %v2360_v2, %v2329_v20  ;;  %v1545_v19 = vmin.f32 %v1537_v39, 6.0  ;;  %3777 = vmatmul.msk.bf16.vlgmr.msrb.gmra.mxu1 %vm661_vm2, %v3101_v17  ;;  %v2406_v13 = vmul.f32 %v2390_v40, %v8111_v49  ;;  %v2895_v25 = vmul.f32 %v6692_v42, %v6796_v41  ;;  %v8152_v2 = vld [vmem:[#allocation66_spill] sm:$0xff] }
 0x23c   :  { %8147 = vst [vmem:[#allocation16_spill] sm:$0xff] %v6956_v21  ;;  %v2896_v20 = vmul.f32 %v6692_v42, %v6791_v37  ;;  %v2421_v34 = vmul.f32 %v2397_v51, %v8114_v48  ;;  %v8148_v7 = vrot.slane %v6745_v24, 1  ;;  %v2907_v31 = vrot.slane %v6745_v24, 7  ;;  %v8154_v17 = vld [vmem:[#allocation54_spill] sm:$0xff] }
 0x23d   :  { %v2413_v46 = vadd.f32 %v2389_v14, %v2381_v15  ;;  %v1559_v3 = vsel %vm1222_vm13, %v1545_v19, 0.0  ;;  %v2414_v15 = vadd.f32 %v2406_v13, %v2382_v8  ;;  %v8149_v41 = vrot.slane %v6729_v61, 7  ;;  %v8155_v19 = vld [vmem:[#allocation65_spill] sm:$0xff] }
 0x23e   :  { %v6971_v54 = vsel %vm911_vm3, %v8148_v7, %v6956_v21  ;;  %v1560_v6 = vadd.f32 %v1559_v3, %v1558_v60  ;;  %v8150_v56 = vrot.slane %v6723_v9, 7  ;;  %v6991_v60 = vsel %vm937_vm4, %v2907_v31, %v6819_v44 }
 0x23f   :  { %v6979_v37 = vsel %vm937_vm4, %v8149_v41, %v6813_v47  ;;  %v2429_v62 = vadd.f32 %v2421_v34, %v2413_v46  ;;  %v8151_v61 = vrot.slane %v6756_v50, 7  ;;  %v2430_v9 = vadd.f32 %v2414_v15, %v2398_v22 }
 0x240   :  { %v2914_v52 = vsel %vm937_vm4, %v8150_v56, %v6727_v5  ;;  %v1561_v26 = vrot.slane %v1560_v6, 4  ;;  %v2920_v5 = vmul.f32 %v6548_v0, %v8152_v2  ;;  %v2929_v1 = vmul.f32 %v6557_v33, %v6754_v45 }
 0x241   :  { %v6997_v47 = vsel %vm937_vm4, %v8151_v61, %v2907_v31  ;;  %v2919_v36 = vmul.f32 %v6548_v0, %v2914_v52  ;;  %v2437_v63 = vadd.f32 %v6838_v23, %v2429_v62  ;;  %v2930_v59 = vmul.f32 %v6557_v33, %v6756_v50 }
 0x242   :  { %v7008_v16 = vrot.slane %v6986_v28, 1  ;;  %v2942_v55 = vmul.f32 %v6571_v58, %v6786_v10  ;;  %v2438_v8 = vadd.f32 %v6838_v23, %v2430_v9  ;;  %v1562_v39 = vadd.f32 %v1561_v26, %v1560_v6 }
 0x243   :  { %v2943_v14 = vmul.f32 %v6571_v58, %v8154_v17  ;;  %v2955_v40 = vmul.f32 %v6579_v32, %v6979_v37  ;;  %v2445_v51 = vmax.f32 %v2437_v63, 0.0  ;;  %v2956_v13 = vmul.f32 %v6579_v32, %v8155_v19  ;;  %v7037_v63 = vld [vmem:[#allocation2 + $0x1d8] sm:$0xff] }
 0x244   :  { %8153 = vst [vmem:[#allocation43_spill] sm:$0xff] %v7008_v16  ;;  %v7021_v22 = vsel %vm911_vm3, %v6956_v21, %v7008_v16  ;;  %v2963_v46 = vadd.f32 %v2929_v1, %v2871_v27  ;;  %v2446_v34 = vmax.f32 %v2438_v8, 0.0  ;;  %v1563_v3 = vrot.slane %v1562_v39, 2 }
 0x245   :  { %v2964_v7 = vadd.f32 %v2930_v59, %v2872_v43  ;;  %v2971_v31 = vadd.f32 %v2942_v55, %v2895_v25  ;;  %v2453_v15 = vmin.f32 %v2445_v51, 6.0  ;;  %v2972_v6 = vadd.f32 %v2943_v14, %v2896_v20  ;;  %v1833_v20 = vpop.f32.mrf.mxu3  ;;  %8156 = vst [vmem:[#allocation25_spill] sm:$0xff] %v7037_v63  ;;  %v7039_v14 = vld [vmem:[#allocation2 + $0x1e0] sm:$0xff] }
 0x246   :  { %v2979_v41 = vadd.f32 %v2955_v40, %v2919_v36  ;;  %v2980_v56 = vadd.f32 %v2956_v13, %v2920_v5  ;;  %v2454_v52 = vmin.f32 %v2446_v34, 6.0  ;;  %v1564_v62 = vadd.f32 %v1563_v3, %v1562_v39  ;;  %v7043_v13 = vld [vmem:[#allocation2 + $0x1f0] sm:$0xff]  ;;  %v7045_v34 = vld [vmem:[#allocation2 + $0x1f8] sm:$0xff] }
 0x247   :  { %v2989_v61 = vmul.f32 %v6589_v30, %v6745_v24  ;;  %v2990_v9 = vmul.f32 %v6589_v30, %v6798_v18  ;;  %v3002_v26 = vmul.f32 %v6601_v57, %v6971_v54  ;;  %v3003_v27 = vmul.f32 %v6601_v57, %v7021_v22 }
 0x248   :  { %v3015_v43 = vmul.f32 %v6765_v12, %v6997_v47  ;;  %v3016_v25 = vmul.f32 %v6765_v12, %v6991_v60  ;;  %v2458_v36 = vpack.c.bf16 %v2454_v52, %v2453_v15  ;;  %v1565_v2 = vrot.slane %v1564_v62, 1 }
 0x249   :  { %v3023_v5 = vadd.f32 %v2989_v61, %v2963_v46  ;;  %v3024_v1 = vadd.f32 %v2990_v9, %v2964_v7  ;;  %v3031_v59 = vadd.f32 %v3002_v26, %v2971_v31  ;;  %v3032_v55 = vadd.f32 %v3003_v27, %v2972_v6  ;;  %v7051_v7 = vld [vmem:[#allocation2 + $0x200] sm:$0xff]  ;;  %v8163_v26 = vld [vmem:[#allocation53_spill] sm:$0xff] }
 0x24a   :  { %v3039_v8 = vadd.f32 %v3015_v43, %v2979_v41  ;;  %v3040_v39 = vadd.f32 %v3016_v25, %v2980_v56  ;;  %3772 = vmatmul.msk.bf16.gmra.mxu2 %vm661_vm2, %v2458_v36  ;;  %v1566_v40 = vadd.f32 %v1565_v2, %v1564_v62  ;;  %v1834_v51 = vadd.f32 %v6373_v35, %v1833_v20  ;;  %v8158_v31 = vld [vmem:[#allocation8_spill] sm:$0xff]  ;;  %v8159_v41 = vld [vmem:[#allocation6_spill] sm:$0xff]  ;;  %v8160_v35 = vld [vmem:[#allocation45_spill] sm:$0xff] }
 0x24b   :  { %v3192_v46 = vmul.f32 %v6618_v53, %v6986_v28  ;;  %v3193_v3 = vmul.f32 %v6618_v53, %v7037_v63  ;;  %8157 = vst [vmem:[#allocation44_spill] sm:$0xff] %v7051_v7  ;;  %v3048_v15 = vmul.f32 %v3032_v55, %v8158_v31  ;;  %v3055_v6 = vadd.f32 %v3031_v59, %v3023_v5 }
 0x24c   :  { %v3063_v56 = vmul.f32 %v3039_v8, %v8159_v41  ;;  %v3201_v52 = vrot.slane %v7037_v63, 1  ;;  %v7057_v62 = vadd.f32 %v1566_v40, %v8160_v35  ;;  %v1853_v61 = vmax.f32 %v1834_v51, 0.0 }
 0x24d   :  { %v7060_v9 = vrot.slane %v7039_v14, 1  ;;  %v7063_v27 = vrot.slane %v8163_v26, 1  ;;  %v3056_v43 = vadd.f32 %v3048_v15, %v3024_v1  ;;  %v7066_v20 = vrot.slane %v7043_v13, 1  ;;  %v7091_v15 = vld [vmem:[#allocation2 + $0x208] sm:$0xff] }
 0x24e   :  { %8161 = vst [vmem:[#allocation40_spill] sm:$0xff] %v7057_v62  ;;  %v3071_v25 = vadd.f32 %v3063_v56, %v3055_v6  ;;  %v3205_v36 = vrot.slane %v7045_v34, 1  ;;  %v1861_v2 = vmin.f32 %v1853_v61, 6.0  ;;  %v7879_v5 = vrot.slane %v7051_v7, 1 }
 0x24f   :  { %8162 = vst [vmem:[#allocation17_spill] sm:$0xff] %v7060_v9  ;;  %v7074_v59 = vsel %vm911_vm3, %v7060_v9, %v7063_v27  ;;  %v3213_v55 = vsel %vm911_vm3, %v3201_v52, %v7060_v9  ;;  %v3072_v1 = vadd.f32 %v3056_v43, %v3040_v39  ;;  %v7089_v51 = vsel %vm911_vm3, %v7063_v27, %v7066_v20 }
 0x250   :  { %8164 = vst [vmem:[#allocation47_spill] sm:$0xff] %v7063_v27  ;;  %v3079_v8 = vadd.f32 %v6838_v23, %v3071_v25  ;;  %v7083_v40 = vsel %vm911_vm3, %v7066_v20, %v3205_v36  ;;  %v7094_v6 = vsel %vm1222_vm13, %v1861_v2, 0.0  ;;  %v7100_v39 = vsel %vm911_vm3, %v3205_v36, %v7879_v5 }
 0x251   :  { %8165 = vst [vmem:[#allocation51_spill] sm:$0xff] %v7066_v20  ;;  %v3214_v56 = vsel %vm911_vm3, %v7008_v16, %v3201_v52  ;;  %v3217_v35 = vmul.f32 %v6692_v42, %v3213_v55  ;;  %v3080_v61 = vadd.f32 %v6838_v23, %v3072_v1  ;;  %v7109_v2 = vrot.slane %v6986_v28, 7 }
 0x252   :  { %8166 = vst [vmem:[#allocation50_spill] sm:$0xff] %v7074_v59  ;;  %v3087_v43 = vmax.f32 %v3079_v8, 0.0  ;;  %v3216_v25 = vmul.f32 %v6692_v42, %v3214_v56  ;;  %v7113_v20 = vrot.slane %v7039_v14, 7  ;;  %v7116_v36 = vrot.slane %v7043_v13, 7  ;;  %v7122_v8 = vld [vmem:[#allocation2 + $0x218] sm:$0xff] }
 0x253   :  { %8167 = vst [vmem:[#allocation49_spill] sm:$0xff] %v7089_v51  ;;  %v7883_v52 = vrot.slane %v7045_v34, 7  ;;  %v3088_v5 = vmax.f32 %v3080_v61, 0.0  ;;  %v7120_v1 = vrot.slane %v7091_v15, 7  ;;  %v3250_v56 = vmul.f32 %v6557_v33, %v7039_v14 }
 0x254   :  { %8168 = vst [vmem:[#allocation31_spill] sm:$0xff] %v7091_v15  ;;  %v3095_v55 = vmin.f32 %v3087_v43, 6.0  ;;  %v7137_v61 = vsel %vm937_vm4, %v7113_v20, %v6884_v11  ;;  %v8173_v43 = vrot.slane %v7037_v63, 7  ;;  %v3251_v49 = vmul.f32 %v6557_v33, %v8163_v26  ;;  %v7161_v26 = vld [vmem:[#allocation2 + $0x228] sm:$0xff] }
 0x255   :  { %8169 = vst [vmem:[#allocation12_spill] sm:$0xff] %v7100_v39  ;;  %v7131_v62 = vsel %vm937_vm4, %v7116_v36, %v7883_v52  ;;  %v3096_v27 = vmin.f32 %v3088_v5, 6.0  ;;  %v3239_v52 = vsel %vm937_vm4, %v7120_v1, %v7109_v2  ;;  %v3263_v21 = vmul.f32 %v6571_v58, %v7074_v59 }
 0x256   :  { %8170 = vst [vmem:[#allocation33_spill] sm:$0xff] %v7120_v1  ;;  %v3238_v48 = vsel %vm937_vm4, %v7109_v2, %v8173_v43  ;;  %v3240_v31 = vmul.f32 %v6548_v0, %v3239_v52  ;;  %v3264_v63 = vmul.f32 %v6571_v58, %v7089_v51  ;;  %v7157_v43 = vrot.slane %v7122_v8, 7 }
 0x257   :  { %8171 = vst [vmem:[#allocation26_spill] sm:$0xff] %v7122_v8  ;;  %v3241_v41 = vmul.f32 %v6548_v0, %v3238_v48  ;;  %v3277_v5 = vmul.f32 %v6579_v32, %v7137_v61  ;;  %v3102_v11 = vpack.c.bf16 %v3096_v27, %v3095_v55  ;;  %v3284_v7 = vadd.f32 %v3250_v56, %v3192_v46  ;;  %v1835_v48 = vpop.f32.mrf.mxu3 }
 0x258   :  { %8172 = vst [vmem:[#allocation41_spill] sm:$0xff] %v7131_v62  ;;  %v3285_v15 = vadd.f32 %v3251_v49, %v3193_v3  ;;  %v3292_v1 = vadd.f32 %v3263_v21, %v3216_v25  ;;  %v3275_v52 = vsel %vm937_vm4, %v7157_v43, %v7113_v20  ;;  %v3293_v59 = vadd.f32 %v3264_v63, %v3217_v35 }
 0x259   :  { %8174 = vst [vmem:[#allocation32_spill] sm:$0xff] %v7157_v43  ;;  %v3301_v51 = vadd.f32 %v3277_v5, %v3241_v41  ;;  %v3310_v8 = vmul.f32 %v6589_v30, %v7043_v13  ;;  %3778 = vmatmul.msk.bf16.gmra.mxu1 %vm661_vm2, %v3102_v11  ;;  %v3276_v27 = vmul.f32 %v6579_v32, %v3275_v52  ;;  %v7905_v3 = vrot.slane %v7161_v26, 7  ;;  %v7183_v11 = vld [vmem:[%s7719_s6] ss:$0 sm:$0xff] }
 0x25a   :  { %8175 = vst [vmem:[#allocation52_spill] sm:$0xff] %v7161_v26  ;;  %v3311_v49 = vmul.f32 %v6589_v30, %v7045_v34  ;;  %v3323_v21 = vmul.f32 %v6601_v57, %v7083_v40  ;;  %v3324_v46 = vmul.f32 %v6601_v57, %v7100_v39  ;;  %v3337_v63 = vmul.f32 %v6765_v12, %v7131_v62 }
 0x25b   :  { %v3344_v41 = vadd.f32 %v3310_v8, %v3284_v7  ;;  %v1836_v35 = vadd.f32 %v7183_v11, %v1835_v48  ;;  %v3300_v25 = vadd.f32 %v3276_v27, %v3240_v31  ;;  %v3335_v52 = vsel %vm937_vm4, %v7905_v3, %v7116_v36 }
 0x25c   :  { %v3345_v55 = vadd.f32 %v3311_v49, %v3285_v15  ;;  %v3352_v56 = vadd.f32 %v3323_v21, %v3292_v1  ;;  %v3353_v5 = vadd.f32 %v3324_v46, %v3293_v59  ;;  %v3361_v43 = vadd.f32 %v3337_v63, %v3301_v51 }
 0x25d   :  { %v1854_v62 = vmax.f32 %v1836_v35, 0.0  ;;  %v2873_v7 = vmul.f32 %v6618_v53, %v6754_v45  ;;  %v3336_v8 = vmul.f32 %v6765_v12, %v3335_v52  ;;  %v2874_v31 = vmul.f32 %v6618_v53, %v6756_v50 }
 0x25e   :  { %v3369_v39 = vmul.f32 %v3353_v5, %v8137_v29  ;;  %v3376_v48 = vadd.f32 %v3352_v56, %v3344_v41  ;;  %v2897_v15 = vmul.f32 %v6692_v42, %v6786_v10  ;;  %v2898_v1 = vmul.f32 %v6692_v42, %v8154_v17  ;;  %v8176_v10 = vld [vmem:[#allocation55_spill] sm:$0xff] }
 0x25f   :  { %v1862_v59 = vmin.f32 %v1854_v62, 6.0  ;;  %v2921_v51 = vmul.f32 %v6548_v0, %v6979_v37  ;;  %v3360_v27 = vadd.f32 %v3336_v8, %v3300_v25  ;;  %v2922_v49 = vmul.f32 %v6548_v0, %v8155_v19  ;;  %v8177_v19 = vld [vmem:[#allocation64_spill] sm:$0xff] }
 0x260   :  { %v3377_v45 = vadd.f32 %v3369_v39, %v3345_v55  ;;  %v2931_v29 = vmul.f32 %v6557_v33, %v6745_v24  ;;  %v2932_v62 = vmul.f32 %v6557_v33, %v6798_v18  ;;  %v7211_v21 = vrot.slane %v8176_v10, 1 }
 0x261   :  { %v1870_v50 = vsel %vm1222_vm13, %v1862_v59, 0.0  ;;  %v2944_v17 = vmul.f32 %v6571_v58, %v6971_v54  ;;  %v3384_v37 = vmul.f32 %v3360_v27, %v8140_v4  ;;  %v2945_v0 = vmul.f32 %v6571_v58, %v7021_v22 }
 0x262   :  { %v3393_v39 = vadd.f32 %v3377_v45, %v3361_v43  ;;  %v7217_v46 = vadd.f32 %v1870_v50, %v7094_v6  ;;  %v7225_v33 = vsel %vm911_vm3, %v7008_v16, %v7211_v21  ;;  %v7231_v63 = vsel %vm937_vm4, %v7109_v2, %v8177_v19 }
 0x263   :  { %v7237_v4 = vsel %vm937_vm4, %v6819_v44, %v7109_v2  ;;  %v2957_v58 = vmul.f32 %v6579_v32, %v6997_v47  ;;  %v3392_v22 = vadd.f32 %v3384_v37, %v3376_v48  ;;  %v2958_v43 = vmul.f32 %v6579_v32, %v6991_v60 }
 0x264   :  { %v3401_v6 = vadd.f32 %v6838_v23, %v3393_v39  ;;  %v2965_v41 = vadd.f32 %v2931_v29, %v2873_v7  ;;  %v2966_v35 = vadd.f32 %v2932_v62, %v2874_v31  ;;  %v2973_v25 = vadd.f32 %v2944_v17, %v2897_v15  ;;  %v1838_v31 = vpop.f32.mrf.mxu3  ;;  %v8178_v39 = vld [vmem:[#allocation9_spill] sm:$0xff] }
 0x265   :  { %v2974_v55 = vadd.f32 %v2945_v0, %v2898_v1  ;;  %v2981_v56 = vadd.f32 %v2957_v58, %v2921_v51  ;;  %v3400_v5 = vadd.f32 %v6838_v23, %v3392_v22  ;;  %v2982_v8 = vadd.f32 %v2958_v43, %v2922_v49  ;;  %v8179_v22 = vld [vmem:[#allocation53_spill] sm:$0xff]  ;;  %v8180_v43 = vld [vmem:[#allocation10_spill] sm:$0xff] }
 0x266   :  { %v3409_v52 = vmax.f32 %v3401_v6, 0.0  ;;  %v2991_v44 = vmul.f32 %v6589_v30, %v6986_v28  ;;  %v2992_v2 = vmul.f32 %v6589_v30, %v8176_v10  ;;  %v2998_v32 = vsel %vm911_vm3, %v7211_v21, %v7060_v9 }
 0x267   :  { %v3004_v7 = vmul.f32 %v6601_v57, %v7225_v33  ;;  %v3017_v48 = vmul.f32 %v6765_v12, %v7237_v4  ;;  %v3408_v59 = vmax.f32 %v3400_v5, 0.0  ;;  %v3005_v1 = vmul.f32 %v6601_v57, %v2998_v32  ;;  %v8183_v5 = vld [vmem:[#allocation50_spill] sm:$0xff] }
 0x268   :  { %v3417_v15 = vmin.f32 %v3409_v52, 6.0  ;;  %v3018_v51 = vmul.f32 %v6765_v12, %v7231_v63  ;;  %v3025_v30 = vadd.f32 %v2991_v44, %v2965_v41  ;;  %v3026_v27 = vadd.f32 %v2992_v2, %v2966_v35  ;;  %v8185_v2 = vld [vmem:[#allocation44_spill] sm:$0xff] }
 0x269   :  { %v3033_v45 = vadd.f32 %v3004_v7, %v2973_v25  ;;  %v3041_v49 = vadd.f32 %v3017_v48, %v2981_v56  ;;  %v3416_v29 = vmin.f32 %v3408_v59, 6.0  ;;  %v3034_v50 = vadd.f32 %v3005_v1, %v2974_v55  ;;  %v8181_v25 = vld [vmem:[#allocation31_spill] sm:$0xff] }
 0x26a   :  { %v3042_v62 = vadd.f32 %v3018_v51, %v2982_v8  ;;  %v1839_v17 = vadd.f32 %v7183_v11, %v1838_v31  ;;  %v3194_v58 = vmul.f32 %v6618_v53, %v7039_v14  ;;  %v3195_v57 = vmul.f32 %v6618_v53, %v8179_v22  ;;  %v8184_v8 = vld [vmem:[#allocation49_spill] sm:$0xff]  ;;  %v8187_v59 = vld [vmem:[#allocation23_spill] sm:$0xff] }
 0x26b   :  { %v3057_v37 = vadd.f32 %v3033_v45, %v3025_v30  ;;  %v3065_v0 = vmul.f32 %v3041_v49, %v8178_v39  ;;  %v3424_v6 = vpack.c.bf16 %v3417_v15, %v3416_v29  ;;  %v3050_v41 = vmul.f32 %v3034_v50, %v8180_v43  ;;  %v8189_v51 = vld [vmem:[#allocation33_spill] sm:$0xff] }
 0x26c   :  { %v1855_v35 = vmax.f32 %v1839_v17, 0.0  ;;  %v7268_v56 = vrot.slane %v8181_v25, 1  ;;  %v3218_v52 = vmul.f32 %v6692_v42, %v8183_v5  ;;  %v3219_v44 = vmul.f32 %v6692_v42, %v8184_v8  ;;  %v8192_v49 = vld [vmem:[#allocation25_spill] sm:$0xff]  ;;  %v7321_v8 = vld [vmem:[%s7716_s3 + $0x4] ss:$0 sm:$0xff]  ;;  %v1840_v3 = vpop.f32.mrf.mxu3 }
 0x26d   :  { %v3073_v55 = vadd.f32 %v3065_v0, %v3057_v37  ;;  %v3230_v32 = vrot.slane %v8185_v2, 7  ;;  %3781 = vmatmul.msk.bf16.vlgmr.msrb.gmra.mxu2 %vm661_vm2, %v3424_v6  ;;  %v3058_v7 = vadd.f32 %v3050_v41, %v3026_v27  ;;  %v8186_v48 = vrot.slane %v8185_v2, 1  ;;  %v7306_v50 = vld [vmem:[#allocation2 + $0x210] sm:$0xff]  ;;  %v7312_v0 = vld [vmem:[%s7716_s3] ss:$0 sm:$0xff] }
 0x26e   :  { %8182 = vst [vmem:[#allocation19_spill] sm:$0xff] %v7268_v56  ;;  %v1863_v53 = vmin.f32 %v1855_v35, 6.0  ;;  %v7287_v15 = vsel %vm937_vm4, %v8187_v59, %v7116_v36  ;;  %v8190_v27 = vrot.slane %v7045_v34, 7  ;;  %v8193_v29 = vrot.slane %v8192_v49, 7  ;;  %v8195_v59 = vld [vmem:[#allocation12_spill] sm:$0xff] }
 0x26f   :  { %v7281_v31 = vsel %vm911_vm3, %v8186_v48, %v7268_v56  ;;  %8188 = vst [vmem:[#allocation58_spill] sm:$0xff] %v7287_v15  ;;  %v3081_v1 = vadd.f32 %v6838_v23, %v3073_v55  ;;  %v7293_v30 = vsel %vm937_vm4, %v3230_v32, %v8189_v51  ;;  %v3074_v17 = vadd.f32 %v3058_v7, %v3042_v62  ;;  %v7332_v48 = vld [vmem:[%s7716_s3 + $0x5] ss:$0 sm:$0xff]  ;;  %v7341_v49 = vld [vmem:[%s7716_s3 + $0x3] ss:$0 sm:$0xff] }
 0x270   :  { %v7299_v45 = vsel %vm937_vm4, %v8190_v27, %v3230_v32  ;;  %v3237_v36 = vsel %vm937_vm4, %v8193_v29, %v7113_v20  ;;  %8194 = vst [vmem:[#allocation67_spill] sm:$0xff] %v7306_v50  ;;  %v1872_v37 = vsel %vm1222_vm13, %v1863_v53, 0.0  ;;  %v3243_v41 = vmul.f32 %v7312_v0, %v7137_v61 }
 0x271   :  { %8191 = vst [vmem:[#allocation61_spill] sm:$0xff] %v7299_v45  ;;  %v3242_v6 = vmul.f32 %v7312_v0, %v3237_v36  ;;  %v3089_v35 = vmax.f32 %v3081_v1, 0.0  ;;  %v1873_v55 = vadd.f32 %v1872_v37, %v7217_v46  ;;  %v3252_v62 = vmul.f32 %v7321_v8, %v7043_v13  ;;  %v8196_v36 = vld [vmem:[#allocation41_spill] sm:$0xff] }
 0x272   :  { %v3253_v32 = vmul.f32 %v7321_v8, %v7045_v34  ;;  %v3082_v7 = vadd.f32 %v6838_v23, %v3074_v17  ;;  %v3265_v46 = vmul.f32 %v7332_v48, %v7083_v40  ;;  %v3266_v1 = vmul.f32 %v7332_v48, %v8195_v59 }
 0x273   :  { %v3097_v27 = vmin.f32 %v3089_v35, 6.0  ;;  %v3278_v29 = vmul.f32 %v7341_v49, %v7287_v15  ;;  %v3279_v17 = vmul.f32 %v7341_v49, %v8196_v36  ;;  %v3286_v37 = vadd.f32 %v3252_v62, %v3194_v58  ;;  %v7357_v15 = vld [vmem:[%s7716_s3 + $0x7] ss:$0 sm:$0xff] }
 0x274   :  { %v3090_v53 = vmax.f32 %v3082_v7, 0.0  ;;  %v8197_v26 = vrot.slane %v7306_v50, 1  ;;  %v3287_v9 = vadd.f32 %v3253_v32, %v3195_v57  ;;  %v3294_v43 = vadd.f32 %v3265_v46, %v3218_v52 }
 0x275   :  { %v3295_v16 = vadd.f32 %v3266_v1, %v3219_v44  ;;  %v3302_v39 = vadd.f32 %v3278_v29, %v3242_v6  ;;  %v3303_v51 = vadd.f32 %v3279_v17, %v3243_v41  ;;  %v3312_v58 = vmul.f32 %v7357_v15, %v8185_v2 }
 0x276   :  { %v7352_v35 = vsel %vm911_vm3, %v7268_v56, %v8197_v26  ;;  %v3098_v62 = vmin.f32 %v3090_v53, 6.0  ;;  %v3313_v7 = vmul.f32 %v7357_v15, %v8181_v25  ;;  %v7366_v26 = vld [vmem:[%s7716_s3 + $0x8] ss:$0 sm:$0xff]  ;;  %v3338_v44 = vmul.f32 %v6765_v12, %v7299_v45 }
 0x277   :  { %8198 = vst [vmem:[#allocation34_spill] sm:$0xff] %v7352_v35  ;;  %v3325_v57 = vmul.f32 %v7366_v26, %v7281_v31  ;;  %v3326_v52 = vmul.f32 %v7366_v26, %v7352_v35  ;;  %v3339_v6 = vmul.f32 %v6765_v12, %v7293_v30  ;;  %v3346_v41 = vadd.f32 %v3312_v58, %v3286_v37  ;;  %v7380_v35 = vld [vmem:[%s7716_s3 + $0x1] ss:$0 sm:$0xff]  ;;  %v8199_v37 = vld [vmem:[#allocation8_spill] sm:$0xff] }
 0x278   :  { %v1841_v32 = vadd.f32 %v7183_v11, %v1840_v3  ;;  %v3103_v53 = vpack.c.bf16 %v3098_v62, %v3097_v27  ;;  %v3347_v46 = vadd.f32 %v3313_v7, %v3287_v9  ;;  %v3362_v17 = vadd.f32 %v3338_v44, %v3302_v39  ;;  %v8201_v39 = vld [vmem:[#allocation16_spill] sm:$0xff] }
 0x279   :  { %v3354_v1 = vadd.f32 %v3325_v57, %v3294_v43  ;;  %v3355_v29 = vadd.f32 %v3326_v52, %v3295_v16  ;;  %v3363_v56 = vadd.f32 %v3339_v6, %v3303_v51  ;;  %v2875_v45 = vmul.f32 %v7380_v35, %v6745_v24  ;;  %v8200_v16 = vld [vmem:[#allocation39_spill] sm:$0xff]  ;;  %v8202_v51 = vld [vmem:[#allocation6_spill] sm:$0xff] }
 0x27a   :  { %v1856_v50 = vmax.f32 %v1841_v32, 0.0  ;;  %3779 = vmatmul.msk.bf16.gmra.mxu1 %vm661_vm2, %v3103_v53  ;;  %v2876_v9 = vmul.f32 %v7380_v35, %v6798_v18  ;;  %v2892_v43 = vsel %vm911_vm3, %v8201_v39, %v8200_v16  ;;  %v3386_v27 = vmul.f32 %v3362_v17, %v8202_v51  ;;  %v8203_v32 = vld [vmem:[#allocation48_spill] sm:$0xff]  ;;  %v1843_v53 = vpop.f32.mrf.mxu3  ;;  %v8205_v51 = vld [vmem:[#allocation47_spill] sm:$0xff] }
 0x27b   :  { %v3371_v58 = vmul.f32 %v3355_v29, %v8199_v37  ;;  %v3378_v3 = vadd.f32 %v3354_v1, %v3346_v41  ;;  %v2899_v7 = vmul.f32 %v6692_v42, %v6971_v54  ;;  %v2900_v24 = vmul.f32 %v6692_v42, %v2892_v43 }
 0x27c   :  { %v1864_v62 = vmin.f32 %v1856_v50, 6.0  ;;  %v2923_v52 = vmul.f32 %v7312_v0, %v6997_v47  ;;  %v2924_v18 = vmul.f32 %v7312_v0, %v6991_v60  ;;  %v2933_v44 = vmul.f32 %v7321_v8, %v6986_v28 }
 0x27d   :  { %v3379_v57 = vadd.f32 %v3371_v58, %v3347_v46  ;;  %v3394_v6 = vadd.f32 %v3386_v27, %v3378_v3  ;;  %v2934_v50 = vmul.f32 %v7321_v8, %v8176_v10  ;;  %v2939_v54 = vsel %vm911_vm3, %v7211_v21, %v8203_v32 }
 0x27e   :  { %v1874_v41 = vsel %vm1222_vm13, %v1864_v62, 0.0  ;;  %v2946_v60 = vmul.f32 %v7332_v48, %v7225_v33  ;;  %v2947_v1 = vmul.f32 %v7332_v48, %v2939_v54  ;;  %v2959_v29 = vmul.f32 %v7341_v49, %v7237_v4  ;;  %v8204_v4 = vld [vmem:[#allocation21_spill] sm:$0xff] }
 0x27f   :  { %v3395_v46 = vadd.f32 %v3379_v57, %v3363_v56  ;;  %v1875_v47 = vadd.f32 %v1874_v41, %v1873_v55  ;;  %v3402_v28 = vadd.f32 %v6838_v23, %v3394_v6  ;;  %v2960_v10 = vmul.f32 %v7341_v49, %v7231_v63 }
 0x280   :  { %v2967_v17 = vadd.f32 %v2933_v44, %v2875_v45  ;;  %v2968_v21 = vadd.f32 %v2934_v50, %v2876_v9  ;;  %v2975_v58 = vadd.f32 %v2946_v60, %v2899_v7  ;;  %v2976_v56 = vadd.f32 %v2947_v1, %v2900_v24  ;;  %v8207_v1 = vld [vmem:[#allocation14_spill] sm:$0xff] }
 0x281   :  { %v3403_v37 = vadd.f32 %v6838_v23, %v3395_v46  ;;  %v3410_v55 = vmax.f32 %v3402_v28, 0.0  ;;  %v2983_v3 = vadd.f32 %v2959_v29, %v2923_v52  ;;  %v2984_v16 = vadd.f32 %v2960_v10, %v2924_v18  ;;  %v7449_v28 = vld [vmem:[%s7716_s3 + $0x2] ss:$0 sm:$0xff] }
 0x282   :  { %v2993_v33 = vmul.f32 %v7357_v15, %v7039_v14  ;;  %v2994_v43 = vmul.f32 %v7357_v15, %v8179_v22  ;;  %v2999_v63 = vsel %vm911_vm3, %v8205_v51, %v8204_v4  ;;  %v3006_v45 = vmul.f32 %v7366_v26, %v8183_v5  ;;  %v1845_v60 = vpop.f32.mrf.mxu3  ;;  %v2156_v51 = vpop.f32.mrf.mxu1 }
 0x283   :  { %v3411_v39 = vmax.f32 %v3403_v37, 0.0  ;;  %v3418_v9 = vmin.f32 %v3410_v55, 6.0  ;;  %v3007_v27 = vmul.f32 %v7366_v26, %v2999_v63  ;;  %v3011_v14 = vsel %vm937_vm4, %v8177_v19, %v7113_v20  ;;  %v8206_v19 = vld [vmem:[#allocation15_spill] sm:$0xff]  ;;  %v8210_v55 = vld [vmem:[#allocation34_spill] sm:$0xff] }
 0x284   :  { %v3020_v62 = vmul.f32 %v6765_v12, %v7137_v61  ;;  %v3019_v7 = vmul.f32 %v6765_v12, %v3011_v14  ;;  %v3027_v24 = vadd.f32 %v2993_v33, %v2967_v17  ;;  %v3028_v57 = vadd.f32 %v2994_v43, %v2968_v21  ;;  %v8211_v33 = vld [vmem:[#allocation67_spill] sm:$0xff]  ;;  %v8212_v43 = vld [vmem:[#allocation61_spill] sm:$0xff] }
 0x285   :  { %v3419_v22 = vmin.f32 %v3411_v39, 6.0  ;;  %v3035_v52 = vadd.f32 %v3006_v45, %v2975_v58  ;;  %v3036_v18 = vadd.f32 %v3007_v27, %v2976_v56  ;;  %v1844_v5 = vadd.f32 %v7183_v11, %v1843_v53  ;;  %v8209_v58 = vld [vmem:[#allocation26_spill] sm:$0xff] }
 0x286   :  { %v3044_v44 = vadd.f32 %v3020_v62, %v2984_v16  ;;  %v3043_v41 = vadd.f32 %v3019_v7, %v2983_v3  ;;  %v3196_v50 = vmul.f32 %v7380_v35, %v7043_v13  ;;  %v3197_v20 = vmul.f32 %v7380_v35, %v7045_v34  ;;  %v8208_v34 = vld [vmem:[#allocation58_spill] sm:$0xff] }
 0x287   :  { %v3425_v6 = vpack.c.bf16 %v3419_v22, %v3418_v9  ;;  %v3052_v61 = vmul.f32 %v3036_v18, %v8206_v19  ;;  %v3059_v32 = vadd.f32 %v3035_v52, %v3027_v24  ;;  %v1857_v54 = vmax.f32 %v1844_v5, 0.0  ;;  %v8214_v22 = vld [vmem:[#allocation32_spill] sm:$0xff]  ;;  %v8215_v24 = vld [vmem:[#allocation33_spill] sm:$0xff] }
 0x288   :  { %v3220_v46 = vmul.f32 %v6692_v42, %v7083_v40  ;;  %v3067_v53 = vmul.f32 %v3043_v41, %v8207_v1  ;;  %v3221_v13 = vmul.f32 %v7449_v28, %v8195_v59  ;;  %v3244_v29 = vmul.f32 %v7312_v0, %v8208_v34  ;;  %v7493_v52 = vld [vmem:[#allocation2 + $0x220] sm:$0xff] }
 0x289   :  { %3782 = vmatmul.msk.bf16.gmra.mxu2 %vm661_vm2, %v3425_v6  ;;  %v3245_v10 = vmul.f32 %v7312_v0, %v8196_v36  ;;  %v3060_v42 = vadd.f32 %v3052_v61, %v3028_v57  ;;  %v1865_v40 = vmin.f32 %v1857_v54, 6.0  ;;  %v3254_v17 = vmul.f32 %v7321_v8, %v8185_v2 }
 0x28a   :  { %v3255_v37 = vmul.f32 %v7321_v8, %v8181_v25  ;;  %v3075_v21 = vadd.f32 %v3067_v53, %v3059_v32  ;;  %v7462_v56 = vrot.slane %v8209_v58, 1  ;;  %v3267_v59 = vmul.f32 %v7332_v48, %v7281_v31 }
 0x28b   :  { %v3268_v3 = vmul.f32 %v7332_v48, %v8210_v55  ;;  %v3076_v16 = vadd.f32 %v3060_v42, %v3044_v44  ;;  %v1876_v36 = vsel %vm1222_vm13, %v1865_v40, 0.0  ;;  %v3271_v39 = vrot.slane %v8211_v33, 7 }
 0x28c   :  { %v3280_v4 = vmul.f32 %v7341_v49, %v8212_v43  ;;  %v3083_v63 = vadd.f32 %v6838_v23, %v3075_v21  ;;  %v1877_v45 = vadd.f32 %v1876_v36, %v1875_v47  ;;  %v8213_v9 = vrot.slane %v8211_v33, 1 }
 0x28d   :  { %v3281_v14 = vmul.f32 %v7341_v49, %v7293_v30  ;;  %v3084_v62 = vadd.f32 %v6838_v23, %v3076_v16  ;;  %v7486_v7 = vsel %vm937_vm4, %v3271_v39, %v8214_v22  ;;  %v7491_v47 = vsel %vm937_vm4, %v8215_v24, %v3271_v39 }
 0x28e   :  { %v7478_v27 = vsel %vm911_vm3, %v8213_v9, %v7462_v56  ;;  %v3288_v57 = vadd.f32 %v3254_v17, %v3196_v50  ;;  %v3091_v18 = vmax.f32 %v3083_v63, 0.0  ;;  %v3289_v44 = vadd.f32 %v3255_v37, %v3197_v20  ;;  %v8216_v9 = vld [vmem:[#allocation9_spill] sm:$0xff] }
 0x28f   :  { %v3296_v5 = vadd.f32 %v3267_v59, %v3220_v46  ;;  %v3297_v6 = vadd.f32 %v3268_v3, %v3221_v13  ;;  %v3092_v41 = vmax.f32 %v3084_v62, 0.0  ;;  %v3304_v61 = vadd.f32 %v3280_v4, %v3244_v29  ;;  %v1848_v29 = vpop.f32.mrf.mxu3  ;;  %v2158_v62 = vpop.f32.mrf.mxu1 }
 0x290   :  { %v3305_v32 = vadd.f32 %v3281_v14, %v3245_v10  ;;  %v3314_v54 = vmul.f32 %v7357_v15, %v8211_v33  ;;  %v3099_v53 = vmin.f32 %v3091_v18, 6.0  ;;  %v3315_v34 = vmul.f32 %v7357_v15, %v8209_v58 }
 0x291   :  { %v3318_v42 = vrot.slane %v7493_v52, 1  ;;  %v3327_v50 = vmul.f32 %v7366_v26, %v7478_v27  ;;  %v3100_v40 = vmin.f32 %v3092_v41, 6.0  ;;  %v3340_v20 = vmul.f32 %v6765_v12, %v7491_v47  ;;  %v8219_v41 = vld [vmem:[#allocation10_spill] sm:$0xff] }
 0x292   :  { %v3341_v46 = vmul.f32 %v6765_v12, %v7486_v7  ;;  %v3348_v13 = vadd.f32 %v3314_v54, %v3288_v57  ;;  %v1846_v37 = vadd.f32 %v7183_v11, %v1845_v60  ;;  %v3349_v55 = vadd.f32 %v3315_v34, %v3289_v44  ;;  %v8217_v44 = vld [vmem:[#allocation43_spill] sm:$0xff] }
 0x293   :  { %v3321_v10 = vsel %vm911_vm3, %v7462_v56, %v3318_v42  ;;  %v3356_v17 = vadd.f32 %v3327_v50, %v3296_v5  ;;  %v3104_v21 = vpack.c.bf16 %v3100_v40, %v3099_v53  ;;  %v3364_v3 = vadd.f32 %v3340_v20, %v3304_v61  ;;  %v8218_v5 = vld [vmem:[#allocation19_spill] sm:$0xff]  ;;  %v7528_v53 = vpop.f32.mrf.mxu2 }
 0x294   :  { %v3328_v59 = vmul.f32 %v7366_v26, %v3321_v10  ;;  %v1858_v36 = vmax.f32 %v1846_v37, 0.0  ;;  %v2157_v12 = vadd.f32 %v7183_v11, %v2156_v51  ;;  %v1849_v39 = vadd.f32 %v7183_v11, %v1848_v29 }
 0x295   :  { %v3380_v16 = vadd.f32 %v3356_v17, %v3348_v13  ;;  %3780 = vmatmul.msk.bf16.gmra.mxu1 %vm661_vm2, %v3104_v21  ;;  %v3365_v63 = vadd.f32 %v3341_v46, %v3305_v32  ;;  %v3388_v14 = vmul.f32 %v3364_v3, %v8216_v9  ;;  %v3198_v60 = vmul.f32 %v7380_v35, %v8185_v2 }
 0x296   :  { %v3357_v4 = vadd.f32 %v3328_v59, %v3297_v6  ;;  %v1866_v24 = vmin.f32 %v1858_v36, 6.0  ;;  %v2176_v57 = vmax.f32 %v2157_v12, 0.0  ;;  %v1859_v18 = vmax.f32 %v1849_v39, 0.0 }
 0x297   :  { %v3215_v51 = vsel %vm911_vm3, %v8218_v5, %v8217_v44  ;;  %v3396_v54 = vadd.f32 %v3388_v14, %v3380_v16  ;;  %v3199_v6 = vmul.f32 %v7380_v35, %v8181_v25  ;;  %v3222_v32 = vmul.f32 %v7449_v28, %v7281_v31 }
 0x298   :  { %v3373_v61 = vmul.f32 %v3357_v4, %v8219_v41  ;;  %v1878_v2 = vsel %vm1222_vm13, %v1866_v24, 0.0  ;;  %v7531_v34 = vmin.f32 %v2176_v57, 6.0  ;;  %v1867_v50 = vmin.f32 %v1859_v18, 6.0  ;;  %v8222_v18 = vld [vmem:[#allocation51_spill] sm:$0xff] }
 0x299   :  { %v3223_v40 = vmul.f32 %v7449_v28, %v3215_v51  ;;  %v3404_v46 = vadd.f32 %v6838_v23, %v3396_v54  ;;  %v1879_v13 = vadd.f32 %v1878_v2, %v1877_v45  ;;  %v3246_v29 = vmul.f32 %v7312_v0, %v8212_v43  ;;  %v8220_v23 = vld [vmem:[#allocation17_spill] sm:$0xff] }
 0x29a   :  { %v3381_v20 = vadd.f32 %v3373_v61, %v3349_v55  ;;  %v1880_v25 = vsel %vm1222_vm13, %v1867_v50, 0.0  ;;  %v3247_v31 = vmul.f32 %v7312_v0, %v7293_v30  ;;  %v3256_v35 = vmul.f32 %v7321_v8, %v8211_v33  ;;  %v1850_v55 = vpop.f32.mrf.mxu3 }
 0x29b   :  { %v3257_v10 = vmul.f32 %v7321_v8, %v8209_v58  ;;  %v3412_v28 = vmax.f32 %v3404_v46, 0.0  ;;  %v7544_v37 = vadd.f32 %v1880_v25, %v1879_v13  ;;  %v3262_v43 = vsel %vm911_vm3, %v7462_v56, %v8220_v23  ;;  %v7560_v58 = vld [vmem:[%s7717_s4] ss:$0 sm:$0xff]  ;;  %v2482_v4 = vpop.f32.mrf.mxu2 }
 0x29c   :  { %v3397_v17 = vadd.f32 %v3381_v20, %v3365_v63  ;;  %v3269_v45 = vmul.f32 %v7332_v48, %v7478_v27  ;;  %v3270_v30 = vmul.f32 %v7332_v48, %v3262_v43  ;;  %v3282_v0 = vmul.f32 %v7341_v49, %v7491_v47  ;;  %v2161_v27 = vpop.f32.mrf.mxu1 }
 0x29d   :  { %v3283_v8 = vmul.f32 %v7341_v49, %v7486_v7  ;;  %v3420_v21 = vmin.f32 %v3412_v28, 6.0  ;;  %v3290_v56 = vadd.f32 %v3256_v35, %v3198_v60  ;;  %v3291_v59 = vadd.f32 %v3257_v10, %v3199_v6  ;;  %v8221_v7 = vld [vmem:[#allocation52_spill] sm:$0xff] }
 0x29e   :  { %v3405_v33 = vadd.f32 %v7560_v58, %v3397_v17  ;;  %v3298_v3 = vadd.f32 %v3269_v45, %v3222_v32  ;;  %v3299_v48 = vadd.f32 %v3270_v30, %v3223_v40  ;;  %v3306_v16 = vadd.f32 %v3282_v0, %v3246_v29 }
 0x29f   :  { %v3307_v36 = vadd.f32 %v3283_v8, %v3247_v31  ;;  %v3316_v49 = vmul.f32 %v7357_v15, %v7493_v52  ;;  %v3317_v12 = vmul.f32 %v7357_v15, %v8221_v7  ;;  %v3319_v39 = vrot.slane %v8221_v7, 1 }
 0x2a0   :  { %v3413_v47 = vmax.f32 %v3405_v33, 0.0  ;;  %v3331_v63 = vrot.slane %v7493_v52, 7  ;;  %v2159_v9 = vadd.f32 %v7183_v11, %v2158_v62  ;;  %v1851_v14 = vadd.f32 %v7183_v11, %v1850_v55 }
 0x2a1   :  { %v2162_v60 = vadd.f32 %v7183_v11, %v2161_v27  ;;  %v3320_v57 = vsel %vm911_vm3, %v3318_v42, %v3319_v39  ;;  %v3322_v15 = vsel %vm911_vm3, %v3319_v39, %v8222_v18  ;;  %v3350_v44 = vadd.f32 %v3316_v49, %v3290_v56  ;;  %v3919_v42 = vld [vmem:[%s7716_s3 + $0x6] ss:$0 sm:$0xff] }
 0x2a2   :  { %v3421_v24 = vmin.f32 %v3413_v47, 6.0  ;;  %v3329_v5 = vmul.f32 %v7366_v26, %v3320_v57  ;;  %v3330_v51 = vmul.f32 %v7366_v26, %v3322_v15  ;;  %v8223_v62 = vrot.slane %v8221_v7, 7 }
 0x2a3   :  { %v3334_v52 = vsel %vm937_vm4, %v8214_v22, %v3331_v63  ;;  %v3351_v32 = vadd.f32 %v3317_v12, %v3291_v59  ;;  %v2177_v26 = vmax.f32 %v2159_v9, 0.0  ;;  %v1860_v40 = vmax.f32 %v1851_v14, 0.0  ;;  %v2485_v23 = vpop.f32.mrf.mxu2 }
 0x2a4   :  { %v3333_v41 = vsel %vm937_vm4, %v3331_v63, %v8223_v62  ;;  %v3426_v61 = vpack.c.bf16 %v3421_v24, %v3420_v21  ;;  %v3342_v54 = vmul.f32 %v3919_v42, %v3334_v52  ;;  %v3358_v2 = vadd.f32 %v3329_v5, %v3298_v3  ;;  %v2163_v29 = vpop.f32.mrf.mxu1 }
 0x2a5   :  { %v3343_v6 = vmul.f32 %v3919_v42, %v3333_v41  ;;  %v3359_v50 = vadd.f32 %v3330_v51, %v3299_v48  ;;  %v2178_v13 = vmax.f32 %v2162_v60, 0.0  ;;  %v2185_v25 = vmin.f32 %v2177_v26, 6.0 }
 0x2a6   :  { %3783 = vmatmul.msk.bf16.gmra.mxu2 %vm661_vm2, %v3426_v61  ;;  %v3366_v20 = vadd.f32 %v3342_v54, %v3306_v16  ;;  %v3382_v22 = vadd.f32 %v3358_v2, %v3350_v44  ;;  %v1868_v31 = vmin.f32 %v1860_v40, 6.0  ;;  %v2192_v35 = vsel %vm1222_vm13, %v7531_v34, 0.0 }
 0x2a7   :  { %v3367_v46 = vadd.f32 %v3343_v6, %v3307_v36  ;;  %v3375_v38 = vmul.f32 %v3359_v50, %v8206_v19  ;;  %v2186_v17 = vmin.f32 %v2178_v13, 6.0  ;;  %v2164_v28 = vadd.f32 %v7183_v11, %v2163_v29 }
 0x2a8   :  { %v3390_v10 = vmul.f32 %v3366_v20, %v8207_v1  ;;  %v2193_v45 = vsel %vm1222_vm13, %v2185_v25, 0.0  ;;  %v1882_v30 = vsel %vm1222_vm13, %v1868_v31, 0.0  ;;  %v2481_v19 = vadd.f32 %v7183_v11, %v7528_v53  ;;  %v8224_v20 = vld [vmem:[#allocation40_spill] sm:$0xff] }
 0x2a9   :  { %v3383_v43 = vadd.f32 %v3375_v38, %v3351_v32  ;;  %v2194_v8 = vadd.f32 %v2193_v45, %v2192_v35  ;;  %v1883_v33 = vadd.f32 %v1882_v30, %v7544_v37  ;;  %v2195_v34 = vsel %vm1222_vm13, %v2186_v17, 0.0 }
 0x2aa   :  { %v3398_v0 = vadd.f32 %v3390_v10, %v3382_v22  ;;  %v2179_v1 = vmax.f32 %v2164_v28, 0.0  ;;  %v2500_v48 = vmax.f32 %v2481_v19, 0.0  ;;  %v2483_v53 = vadd.f32 %v7183_v11, %v2482_v4 }
 0x2ab   :  { %v3399_v21 = vadd.f32 %v3383_v43, %v3367_v46  ;;  %v1884_v59 = vrot.slane %v1883_v33, 4  ;;  %v2196_v55 = vadd.f32 %v2195_v34, %v2194_v8  ;;  %v2487_v9 = vpop.f32.mrf.mxu2  ;;  %v2486_v18 = vadd.f32 %v7183_v11, %v2485_v23 }
 0x2ac   :  { %v3406_v56 = vadd.f32 %v7560_v58, %v3398_v0  ;;  %v2187_v3 = vmin.f32 %v2179_v1, 6.0  ;;  %v2166_v47 = vpop.f32.mrf.mxu1  ;;  %v2508_v60 = vmin.f32 %v2500_v48, 6.0  ;;  %v2488_v15 = vadd.f32 %v7183_v11, %v2487_v9 }
 0x2ad   :  { %v3407_v27 = vadd.f32 %v7560_v58, %v3399_v21  ;;  %v1885_v36 = vadd.f32 %v1884_v59, %v1883_v33  ;;  %v2167_v7 = vadd.f32 %v7183_v11, %v2166_v47  ;;  %v2501_v58 = vmax.f32 %v2483_v53, 0.0 }
 0x2ae   :  { %v3414_v16 = vmax.f32 %v3406_v56, 0.0  ;;  %v2197_v37 = vsel %vm1222_vm13, %v2187_v3, 0.0  ;;  %v2502_v62 = vmax.f32 %v2486_v18, 0.0  ;;  %v2503_v41 = vmax.f32 %v2488_v15, 0.0 }
 0x2af   :  { %v3415_v49 = vmax.f32 %v3407_v27, 0.0  ;;  %v1886_v39 = vrot.slane %v1885_v36, 2  ;;  %v2198_v63 = vadd.f32 %v2197_v37, %v2196_v55  ;;  %v2180_v24 = vmax.f32 %v2167_v7, 0.0 }
 0x2b0   :  { %v3422_v12 = vmin.f32 %v3414_v16, 6.0  ;;  %v2509_v4 = vmin.f32 %v2501_v58, 6.0  ;;  %v2516_v52 = vsel %vm1222_vm13, %v2508_v60, 0.0  ;;  %v2510_v26 = vmin.f32 %v2502_v62, 6.0 }
 0x2b1   :  { %v3423_v14 = vmin.f32 %v3415_v49, 6.0  ;;  %v1887_v57 = vadd.f32 %v1886_v39, %v1885_v36  ;;  %v2188_v44 = vmin.f32 %v2180_v24, 6.0  ;;  %v2511_v40 = vmin.f32 %v2503_v41, 6.0  ;;  %v3840_v41 = vld [vmem:[%s7720_s7 + $0x18] sm:$0xff] }
 0x2b2   :  { %v2517_v42 = vsel %vm1222_vm13, %v2509_v4, 0.0  ;;  %v2519_v29 = vsel %vm1222_vm13, %v2510_v26, 0.0  ;;  %3554 = vmatpush.bf16.msrb.mxu3 %v3840_v41  ;;  %v3839_v26 = vld [vmem:[%s7720_s7 + $0x10] sm:$0xff] }
 0x2b3   :  { %v3427_v5 = vpack.c.bf16 %v3423_v14, %v3422_v12  ;;  %v1888_v51 = vrot.slane %v1887_v57, 1  ;;  %v2199_v61 = vsel %vm1222_vm13, %v2188_v44, 0.0  ;;  %v2518_v32 = vadd.f32 %v2517_v42, %v2516_v52  ;;  %v2490_v23 = vpop.f32.mrf.mxu2  ;;  %v2803_v44 = vpop.f32.mrf.mxu3 }
 0x2b4   :  { %v2200_v6 = vadd.f32 %v2199_v61, %v2198_v63  ;;  %v2168_v2 = vpop.f32.mrf.mxu1  ;;  %v2521_v22 = vsel %vm1222_vm13, %v2511_v40, 0.0  ;;  %v2491_v43 = vadd.f32 %v7183_v11, %v2490_v23 }
 0x2b5   :  { %v1889_v54 = vadd.f32 %v1888_v51, %v1887_v57  ;;  %v2169_v50 = vadd.f32 %v7183_v11, %v2168_v2  ;;  %v2520_v38 = vadd.f32 %v2519_v29, %v2518_v32 }
 0x2b6   :  { %3784 = vmatmul.msk.bf16.gmra.mxu2 %vm661_vm2, %v3427_v5  ;;  %v2504_v30 = vmax.f32 %v2491_v43, 0.0  ;;  %3555 = vmatpush.bf16.msrb.mxu3 %v3839_v26 }
 0x2b7   :  { %v1890_v46 = vadd.f32 %v1889_v54, %v8224_v20  ;;  %v2181_v13 = vmax.f32 %v2169_v50, 0.0  ;;  %v2522_v31 = vadd.f32 %v2521_v22, %v2520_v38 }
 0x2b8   :  { %v2512_v0 = vmin.f32 %v2504_v30, 6.0 }
 0x2b9   :  { %v2189_v25 = vmin.f32 %v2181_v13, 6.0  ;;  %v2804_v13 = vadd.f32 %v7183_v11, %v2803_v44 }
 0x2ba   :  { %v2523_v21 = vsel %vm1222_vm13, %v2512_v0, 0.0 }
 0x2bb   :  { %v2201_v35 = vsel %vm1222_vm13, %v2189_v25, 0.0  ;;  %v2524_v56 = vadd.f32 %v2523_v21, %v2522_v31  ;;  %v2492_v59 = vpop.f32.mrf.mxu2  ;;  %v2805_v5 = vpop.f32.mrf.mxu3  ;;  %v2823_v25 = vmax.f32 %v2804_v13, 0.0 }
 0x2bc   :  { %v2202_v10 = vadd.f32 %v2201_v35, %v2200_v6  ;;  %v2171_v17 = vpop.f32.mrf.mxu1  ;;  %v2493_v55 = vadd.f32 %v7183_v11, %v2492_v59  ;;  %v2806_v29 = vadd.f32 %v7183_v11, %v2805_v5 }
 0x2bd   :  { %v2172_v28 = vadd.f32 %v7183_v11, %v2171_v17 }
 0x2be   :  { %v2505_v3 = vmax.f32 %v2493_v55, 0.0  ;;  %v2824_v35 = vmax.f32 %v2806_v29, 0.0 }
 0x2bf   :  { %v2182_v45 = vmax.f32 %v2172_v28, 0.0 }
 0x2c0   :  { %v2513_v16 = vmin.f32 %v2505_v3, 6.0  ;;  %v2832_v0 = vmin.f32 %v2824_v35, 6.0 }
 0x2c1   :  { %v2190_v19 = vmin.f32 %v2182_v45, 6.0  ;;  %v2831_v45 = vmin.f32 %v2823_v25, 6.0 }
 0x2c2   :  { %v2525_v53 = vsel %vm1222_vm13, %v2513_v16, 0.0 }
 0x2c3   :  { %v2203_v8 = vsel %vm1222_vm13, %v2190_v19, 0.0  ;;  %v2526_v49 = vadd.f32 %v2525_v53, %v2524_v56  ;;  %v2808_v62 = vpop.f32.mrf.mxu3  ;;  %v3838_v19 = vld [vmem:[%s7720_s7 + $0x8] sm:$0xff]  ;;  %v2839_v55 = vsel %vm1222_vm13, %v2831_v45, 0.0 }
 0x2c4   :  { %v2204_v33 = vadd.f32 %v2203_v8, %v2202_v10  ;;  %v2173_v34 = vpop.f32.mrf.mxu1  ;;  %v2809_v38 = vadd.f32 %v7183_v11, %v2808_v62  ;;  %3556 = vmatpush.bf16.msrb.mxu3 %v3838_v19  ;;  %v3920_v19 = vld [vmem:[%s7719_s6] ss:$0 sm:$0xff] }
 0x2c5   :  { %v2174_v1 = vadd.f32 %v7183_v11, %v2173_v34 }
 0x2c6   :  { %v2825_v17 = vmax.f32 %v2809_v38, 0.0 }
 0x2c7   :  { %v2183_v27 = vmax.f32 %v2174_v1, 0.0 }
 0x2c8   :  { %v2833_v34 = vmin.f32 %v2825_v17, 6.0 }
 0x2c9   :  { %v2191_v48 = vmin.f32 %v2183_v27, 6.0 }
 0x2cb   :  { %v2205_v36 = vsel %vm1222_vm13, %v2191_v48, 0.0  ;;  %v2810_v42 = vpop.f32.mrf.mxu3  ;;  %v2840_v48 = vsel %vm1222_vm13, %v2832_v0, 0.0 }
 0x2cc   :  { %v2206_v47 = vadd.f32 %v2205_v36, %v2204_v33  ;;  %v3126_v4 = vpop.f32.mrf.mxu1  ;;  %v2811_v30 = vadd.f32 %v7183_v11, %v2810_v42 }
 0x2cd   :  { %v2495_v37 = vpop.f32.mrf.mxu2  ;;  %v3127_v23 = vadd.f32 %v7183_v11, %v3126_v4 }
 0x2ce   :  { %v2207_v7 = vrot.slane %v2206_v47, 4  ;;  %v2496_v12 = vadd.f32 %v7183_v11, %v2495_v37  ;;  %v2826_v27 = vmax.f32 %v2811_v30, 0.0 }
 0x2cf   :  { %v3146_v1 = vmax.f32 %v3127_v23, 0.0 }
 0x2d0   :  { %v2208_v39 = vadd.f32 %v2207_v7, %v2206_v47  ;;  %v2506_v63 = vmax.f32 %v2496_v12, 0.0 }
 0x2d2   :  { %v2209_v9 = vrot.slane %v2208_v39, 2  ;;  %v2514_v14 = vmin.f32 %v2506_v63, 6.0  ;;  %v3154_v63 = vmin.f32 %v3146_v1, 6.0 }
 0x2d3   :  { %v2813_v32 = vpop.f32.mrf.mxu3 }
 0x2d4   :  { %v2210_v60 = vadd.f32 %v2209_v9, %v2208_v39  ;;  %v2527_v24 = vsel %vm1222_vm13, %v2514_v14, 0.0  ;;  %v3128_v51 = vpop.f32.mrf.mxu1  ;;  %v2814_v21 = vadd.f32 %v7183_v11, %v2813_v32  ;;  %v3162_v32 = vsel %vm1222_vm13, %v3154_v63, 0.0 }
 0x2d5   :  { %v7629_v58 = vadd.f32 %v2527_v24, %v2526_v49  ;;  %v2497_v61 = vpop.f32.mrf.mxu2  ;;  %v3129_v10 = vadd.f32 %v7183_v11, %v3128_v51  ;;  %v2842_v49 = vsel %vm1222_vm13, %v2833_v34, 0.0  ;;  %v2841_v24 = vadd.f32 %v2840_v48, %v2839_v55 }
 0x2d6   :  { %v2211_v57 = vrot.slane %v2210_v60, 1  ;;  %v2827_v37 = vmax.f32 %v2814_v21, 0.0  ;;  %v2498_v12 = vadd.f32 %v7183_v11, %v2497_v61 }
 0x2d7   :  { %v3147_v8 = vmax.f32 %v3129_v10, 0.0 }
 0x2d8   :  { %v2212_v18 = vadd.f32 %v2211_v57, %v2210_v60  ;;  %v2834_v57 = vmin.f32 %v2826_v27, 6.0  ;;  %v2835_v61 = vmin.f32 %v2827_v37, 6.0 }
 0x2d9   :  { %v3155_v16 = vmin.f32 %v3147_v8, 6.0 }
 0x2da   :  { %v7631_v15 = vadd.f32 %v2212_v18, %v1890_v46  ;;  %v2846_v10 = vsel %vm1222_vm13, %v2835_v61, 0.0  ;;  %v3837_v61 = vld [vmem:[%s7720_s7] sm:$0xff] }
 0x2db   :  { %v2815_v40 = vpop.f32.mrf.mxu3  ;;  %v3163_v5 = vsel %vm1222_vm13, %v3155_v16, 0.0  ;;  %3557 = vmatpush.bf16.msrb.mxu3 %v3837_v61 }
 0x2dc   :  { %v3131_v52 = vpop.f32.mrf.mxu1  ;;  %v2816_v3 = vadd.f32 %v7183_v11, %v2815_v40  ;;  %v3164_v29 = vadd.f32 %v3163_v5, %v3162_v32 }
 0x2dd   :  { %v3132_v43 = vadd.f32 %v7183_v11, %v3131_v52  ;;  %v2843_v52 = vadd.f32 %v2842_v49, %v2841_v24 }
 0x2de   :  { %v2828_v18 = vmax.f32 %v2816_v3, 0.0 }
 0x2df   :  { %v3148_v56 = vmax.f32 %v3132_v43, 0.0 }
 0x2e0   :  { %v2836_v13 = vmin.f32 %v2828_v18, 6.0 }
 0x2e1   :  { %v3156_v9 = vmin.f32 %v3148_v56, 6.0 }
 0x2e3   :  { %v2818_v22 = vpop.f32.mrf.mxu3 }
 0x2e4   :  { %v3133_v54 = vpop.f32.mrf.mxu1  ;;  %v2819_v7 = vadd.f32 %v7183_v11, %v2818_v22 }
 0x2e5   :  { %v3134_v33 = vadd.f32 %v7183_v11, %v3133_v54  ;;  %v2507_v54 = vmax.f32 %v2498_v12, 0.0 }
 0x2e6   :  { %v2829_v42 = vmax.f32 %v2819_v7, 0.0 }
 0x2e7   :  { %v3149_v47 = vmax.f32 %v3134_v33, 0.0  ;;  %v2515_v23 = vmin.f32 %v2507_v54, 6.0  ;;  %v2848_v33 = vsel %vm1222_vm13, %v2836_v13, 0.0 }
 0x2e8   :  { %v2837_v17 = vmin.f32 %v2829_v42, 6.0 }
 0x2e9   :  { %v3157_v51 = vmin.f32 %v3149_v47, 6.0  ;;  %v2529_v3 = vsel %vm1222_vm13, %v2515_v23, 0.0 }
 0x2ea   :  { %v2850_v27 = vsel %vm1222_vm13, %v2837_v17, 0.0 }
 0x2eb   :  { %v2820_v36 = vpop.f32.mrf.mxu3  ;;  %v3167_v22 = vsel %vm1222_vm13, %v3157_v51, 0.0 }
 0x2ec   :  { %v2821_v44 = vadd.f32 %v7183_v11, %v2820_v36 }
 0x2ee   :  { %v2830_v38 = vmax.f32 %v2821_v44, 0.0 }
 0x2f0   :  { %v7636_v6 = vpop.f32.mrf.mxu2  ;;  %v2838_v34 = vmin.f32 %v2830_v38, 6.0 }
 0x2f1   :  { %v3450_v45 = vadd.f32 %v7183_v11, %v7636_v6 }
 0x2f2   :  { %v2852_v49 = vsel %vm1222_vm13, %v2838_v34, 0.0 }
 0x2f7   :  { %v3136_v2 = vpop.f32.mrf.mxu1 }
 0x2f8   :  { %v7638_v50 = vpop.f32.mrf.mxu2  ;;  %v3137_v59 = vadd.f32 %v7183_v11, %v3136_v2  ;;  %v3165_v2 = vsel %vm1222_vm13, %v3156_v9, 0.0  ;;  %v2530_v9 = vadd.f32 %v2529_v3, %v7629_v58 }
 0x2f9   :  { %v3452_v25 = vadd.f32 %v7183_v11, %v7638_v50  ;;  %v3166_v43 = vadd.f32 %v3165_v2, %v3164_v29 }
 0x2fa   :  { %v3150_v14 = vmax.f32 %v3137_v59, 0.0 }
 0x2fb   :  { %v3168_v21 = vadd.f32 %v3167_v22, %v3166_v43  ;;  %v3470_v56 = vmax.f32 %v3452_v25, 0.0 }
 0x2fc   :  { %v3158_v26 = vmin.f32 %v3150_v14, 6.0 }
 0x2fd   :  { %v3478_v7 = vmin.f32 %v3470_v56, 6.0 }
 0x2fe   :  { %v3169_v30 = vsel %vm1222_vm13, %v3158_v26, 0.0 }
 0x2ff   :  { %v3138_v20 = vpop.f32.mrf.mxu1  ;;  %v3170_v48 = vadd.f32 %v3169_v30, %v3168_v21 }
 0x300   :  { %v3139_v53 = vadd.f32 %v7183_v11, %v3138_v20  ;;  %v2844_v20 = vsel %vm1222_vm13, %v2834_v57, 0.0 }
 0x301   :  { %v2845_v50 = vadd.f32 %v2844_v20, %v2843_v52  ;;  %v2531_v52 = vrot.slane %v2530_v9, 4 }
 0x302   :  { %v3151_v62 = vmax.f32 %v3139_v53, 0.0 }
 0x303   :  { %v2847_v55 = vadd.f32 %v2846_v10, %v2845_v50  ;;  %v2532_v29 = vadd.f32 %v2531_v52, %v2530_v9 }
 0x305   :  { %v2849_v53 = vadd.f32 %v2848_v33, %v2847_v55 }
 0x307   :  { %v2851_v63 = vadd.f32 %v2850_v27, %v2849_v53 }
 0x309   :  { %v2853_v18 = vadd.f32 %v2852_v49, %v2851_v63  ;;  %v2214_v63 = vmul.f32 0.00390625, %v7631_v15 }
 0x30b   :  { %v2854_v2 = vrot.slane %v2853_v18, 4 }
 0x30c   :  { %v7643_v46 = vpop.f32.mrf.mxu2 }
 0x30d   :  { %v3455_v0 = vadd.f32 %v3920_v19, %v7643_v46  ;;  %v3469_v46 = vmax.f32 %v3450_v45, 0.0  ;;  %v2533_v45 = vrot.slane %v2532_v29, 2 }
 0x30f   :  { %v3471_v16 = vmax.f32 %v3455_v0, 0.0 }
 0x311   :  { %v3479_v24 = vmin.f32 %v3471_v16, 6.0 }
 0x312   :  { %v3141_v31 = vpop.f32.mrf.mxu1 }
 0x313   :  { %v3142_v60 = vadd.f32 %v7183_v11, %v3141_v31  ;;  %v3159_v31 = vmin.f32 %v3151_v62, 6.0  ;;  %v3488_v58 = vsel %vm1222_vm13, %v3479_v24, 0.0  ;;  %v3860_v24 = vld [vmem:[%s7721_s8] ss:$0 sm:$0xff] }
 0x314   :  { %v7649_v28 = vpop.f32.mrf.mxu2 }
 0x315   :  { %v3152_v40 = vmax.f32 %v3142_v60, 0.0  ;;  %v3171_v59 = vsel %vm1222_vm13, %v3159_v31, 0.0  ;;  %v3477_v60 = vmin.f32 %v3469_v46, 6.0  ;;  %v2855_v31 = vadd.f32 %v2854_v2, %v2853_v18 }
 0x316   :  { %v3172_v37 = vadd.f32 %v3171_v59, %v3170_v48 }
 0x317   :  { %v3160_v8 = vmin.f32 %v3152_v40, 6.0  ;;  %v3485_v42 = vsel %vm1222_vm13, %v3477_v60, 0.0  ;;  %v2856_v50 = vrot.slane %v2855_v31, 2 }
 0x319   :  { %v3173_v36 = vsel %vm1222_vm13, %v3160_v8, 0.0 }
 0x31a   :  { %v3143_v39 = vpop.f32.mrf.mxu1  ;;  %v3174_v14 = vadd.f32 %v3173_v36, %v3172_v37 }
 0x31b   :  { %v3144_v41 = vadd.f32 %v7183_v11, %v3143_v39  ;;  %v3457_v11 = vadd.f32 %v3920_v19, %v7649_v28 }
 0x31d   :  { %v3153_v35 = vmax.f32 %v3144_v41, 0.0  ;;  %v3472_v12 = vmax.f32 %v3457_v11, 0.0  ;;  %v2857_v11 = vadd.f32 %v2856_v50, %v2855_v31 }
 0x31f   :  { %v3161_v6 = vmin.f32 %v3153_v35, 6.0  ;;  %v3480_v51 = vmin.f32 %v3472_v12, 6.0  ;;  %v2858_v48 = vrot.slane %v2857_v11, 1 }
 0x321   :  { %v3175_v28 = vsel %vm1222_vm13, %v3161_v6, 0.0  ;;  %v3490_v20 = vsel %vm1222_vm13, %v3480_v51, 0.0 }
 0x322   :  { %v3176_v44 = vadd.f32 %v3175_v28, %v3174_v14 }
 0x324   :  { %v3177_v40 = vrot.slane %v3176_v44, 4 }
 0x326   :  { %v3178_v10 = vadd.f32 %v3177_v40, %v3176_v44 }
 0x328   :  { %v3179_v33 = vrot.slane %v3178_v10, 2 }
 0x329   :  { %v3459_v4 = vpop.f32.mrf.mxu2 }
 0x32a   :  { %v3460_v47 = vadd.f32 %v3920_v19, %v3459_v4  ;;  %v3486_v4 = vsel %vm1222_vm13, %v3478_v7, 0.0  ;;  %v3180_v6 = vadd.f32 %v3179_v33, %v3178_v10 }
 0x32b   :  { %v3487_v26 = vadd.f32 %v3486_v4, %v3485_v42 }
 0x32c   :  { %v3473_v57 = vmax.f32 %v3460_v47, 0.0  ;;  %v2859_v47 = vadd.f32 %v2858_v48, %v2857_v11 }
 0x32d   :  { %v3489_v38 = vadd.f32 %v3488_v58, %v3487_v26 }
 0x32e   :  { %v3481_v54 = vmin.f32 %v3473_v57, 6.0 }
 0x32f   :  { %v3491_v35 = vadd.f32 %v3490_v20, %v3489_v38 }
 0x330   :  { %v3492_v22 = vsel %vm1222_vm13, %v3481_v54, 0.0 }
 0x331   :  { %v3461_v1 = vpop.f32.mrf.mxu2  ;;  %v3493_v30 = vadd.f32 %v3492_v22, %v3491_v35 }
 0x332   :  { %v3462_v39 = vadd.f32 %v3920_v19, %v3461_v1  ;;  %v2534_v1 = vadd.f32 %v2533_v45, %v2532_v29 }
 0x334   :  { %v3474_v62 = vmax.f32 %v3462_v39, 0.0  ;;  %v2535_v27 = vrot.slane %v2534_v1, 1 }
 0x336   :  { %v3482_v13 = vmin.f32 %v3474_v62, 6.0  ;;  %v2536_v16 = vadd.f32 %v2535_v27, %v2534_v1 }
 0x338   :  { %v3494_v23 = vsel %vm1222_vm13, %v3482_v13, 0.0  ;;  %v2860_v37 = vadd.f32 %v2859_v47, %v2536_v16 }
 0x339   :  { %v3464_v5 = vpop.f32.mrf.mxu2  ;;  %v3495_v34 = vadd.f32 %v3494_v23, %v3493_v30 }
 0x33a   :  { %v3465_v41 = vadd.f32 %v3920_v19, %v3464_v5 }
 0x33c   :  { %v3475_v32 = vmax.f32 %v3465_v41, 0.0 }
 0x33e   :  { %v3483_v25 = vmin.f32 %v3475_v32, 6.0 }
 0x340   :  { %v3496_v0 = vsel %vm1222_vm13, %v3483_v25, 0.0 }
 0x341   :  { %v3466_v17 = vpop.f32.mrf.mxu2  ;;  %v3497_v56 = vadd.f32 %v3496_v0, %v3495_v34 }
 0x342   :  { %v3467_v43 = vadd.f32 %v3920_v19, %v3466_v17  ;;  %v3181_v19 = vrot.slane %v3180_v6, 1 }
 0x344   :  { %v3476_v8 = vmax.f32 %v3467_v43, 0.0  ;;  %v3182_v53 = vadd.f32 %v3181_v19, %v3180_v6 }
 0x346   :  { %v3484_v21 = vmin.f32 %v3476_v8, 6.0  ;;  %v3183_v12 = vadd.f32 %v3182_v53, %v2860_v37 }
 0x348   :  { %v3498_v59 = vsel %vm1222_vm13, %v3484_v21, 0.0 }
 0x349   :  { %v3499_v55 = vadd.f32 %v3498_v59, %v3497_v56 }
 0x34b   :  { %v3500_v3 = vrot.slane %v3499_v55, 4 }
 0x34d   :  { %v3501_v46 = vadd.f32 %v3500_v3, %v3499_v55 }
 0x34f   :  { %v3502_v36 = vrot.slane %v3501_v46, 2 }
 0x351   :  { %v3503_v49 = vadd.f32 %v3502_v36, %v3501_v46 }
 0x353   :  { %v3504_v7 = vrot.slane %v3503_v49, 1 }
 0x355   :  { %v3505_v28 = vadd.f32 %v3504_v7, %v3503_v49 }
 0x357   :  { %v3506_v39 = vadd.f32 %v3505_v28, %v3183_v12 }
 0x359   :  { %v3507_v9 = vmul.f32 0.00390625, %v3506_v39 }
 0x35b   :  { %v3509_v14 = vsel %vm3508_vm14, %v2214_v63, %v3507_v9 }
 0x35c   :  { %v3510_v60 = vpack.c.bf16 %v3509_v14, %v3509_v14 }
 0x35e   :  { %3801 = vmatmul.msk.bf16.vlgmr.msrb.gmra.mxu3 %vm1222_vm13, %v3510_v60 }
 0x3e1   :  { %v3559_v57 = vpop.f32.mrf.mxu3 }
 0x3e2   :  { %v3560_v18 = vadd.f32 %v3860_v24, %v3559_v57 }
 0x3e4   :  { %3564 = vst.msk [vmem:[#allocation3] sm:$0x3] %vm3563_vm15, %v3560_v18 }
 0x3e5   :  { %3575 = dma.vmem_to_hbm [thread:$0]  %s3571_s19, 32, %s3573_s21, [#allocation4]  }
 0x3e9   :  { %v3561_v15 = vpop.f32.mrf.mxu3 }
 0x3ea   :  { %3945 = dma.done.wait [#allocation4], 32  }
 0x3eb   :  { %3946 = vsyncadd [#allocation4], 4294967264 }
 0x3ec   :  { %3580 = vsyncpa [#allocation4], 1 }

</bundles_post_ra>
